<compile_context>
chip_gen: v7x
topology: tpu7x:2x2x1
jax: 0.10.0
libtpu: 0.0.40
codegen_flags: <defaults>
</compile_context>

<pallas_src>
import functools

import jax
import jax.numpy as jnp
from jax.experimental import pallas as pl
from jax.experimental.pallas import tpu as pltpu

EPS = 1e-6        # vector-neuron numerical epsilon
BN_EPS = 1e-5     # torch BatchNorm default eps
LN_EPS = 1e-5
LEAKY = 0.2       # TODO(synk): args.leaky not given in the source; assumed 0.2
BIAS_EPS = 1e-6   # bias_eps from the module __init__
NEG_BIG = -1e30   # additive mask for cross-batch attention scores


# ---------------------------------------------------------------------------
# In-kernel helpers. Values have shape [3, R, C]: axis 0 = xyz, R = Bt*N rows
# (batch-major, then points), C = channels on the lane dim.
# ---------------------------------------------------------------------------
def _mm(x3, wt):
    """Channel-mixing matmul: [3, R, Cin] @ [Cin, Cout] -> [3, R, Cout]."""
    d, r, c = x3.shape
    y = jnp.dot(x3.reshape(d * r, c), wt, preferred_element_type=jnp.float32)
    return y.reshape(d, r, wt.shape[-1])


def _sum_xyz(a3, b3):
    """Per-point/channel dot product over the xyz axis: -> [R, C]."""
    return a3[0] * b3[0] + a3[1] * b3[1] + a3[2] * b3[2]


def _vn_linear(x3, wt, b_eps):
    # b_eps: [3, Cout], already scaled by bias_eps on the host.
    return _mm(x3, wt) + b_eps[:, None, :]


def _vn_batchnorm(x3, bnf):
    # Folded eval-mode VN BatchNorm on vector norms; bnf = [2, C] = (scale, shift).
    norm = jnp.sqrt(_sum_xyz(x3, x3)) + EPS                       # [R, C]
    norm_bn = norm * bnf[0:1, :] + bnf[1:2, :]
    return x3 * (norm_bn * pl.reciprocal(norm, approx=True))[None]


def _vn_leaky_relu(x3, ut, slope=LEAKY):
    dirs = _mm(x3, ut)                                            # learned directions
    dot = _sum_xyz(x3, dirs)                                      # [R, C]
    dsq = _sum_xyz(dirs, dirs)
    coef = dot * pl.reciprocal(dsq + EPS, approx=True)
    x_neg = x3 - coef[None] * dirs
    rect = jnp.where((dot >= 0.0)[None], x3, x_neg)
    return slope * x3 + (1.0 - slope) * rect


def _vn_layernorm(x3, ln):
    # Per-point layer norm over the channel norms; ln = [2, C] = (gamma, beta).
    norm = jnp.sqrt(_sum_xyz(x3, x3)) + EPS                       # [R, C]
    mu = jnp.mean(norm, axis=-1, keepdims=True)
    var = jnp.mean((norm - mu) ** 2, axis=-1, keepdims=True)
    norm_ln = (norm - mu) * jax.lax.rsqrt(var + LN_EPS) * ln[0:1, :] + ln[1:2, :]
    return x3 * (norm_ln * pl.reciprocal(norm, approx=True))[None]


# ---------------------------------------------------------------------------
# Fused forward kernel: one grid step per Bt-sized batch block; everything VMEM
# resident; emits the lane-dense invariant pooled feature [Bt, 3H].
# ---------------------------------------------------------------------------
def _classifier_kernel(
        x_ref, amask_ref, pool_ref,
        w1t_ref, wpack_ref, bias_ref, norm_ref,
        wzt_ref, bz_ref, uzt_ref,
        feat_ref,
        *, N, Bt, num_heads):
    R = Bt * N
    H = wpack_ref.shape[-1]
    Cin = x_ref.shape[-1]
    hd = H // num_heads
    scale = float((3.0 * hd) ** -0.5)

    x = x_ref[...].astype(jnp.float32).reshape(3, R, Cin)         # [3, R, Cin]

    # ---- unpack consolidated parameters (static leading-dim loads) ----
    (W2t, U1t, U2t, Wqt, Wkt, Wvt, Wot, Wf1t, Uft, Wf2t) = [
        wpack_ref[i] for i in range(10)]
    (b1, b2, bq, bk, bv, bo, bf1, bf2) = [bias_ref[i] for i in range(8)]
    (bn1, bn2, ln1, ln2) = [norm_ref[i] for i in range(4)]

    # ------------------------- vn_mlp -------------------------
    h = _vn_linear(x, w1t_ref[...], b1)
    h = _vn_batchnorm(h, bn1)
    h = _vn_leaky_relu(h, U1t)
    h = _vn_linear(h, W2t, b2)
    h = _vn_batchnorm(h, bn2)
    h = _vn_leaky_relu(h, U2t)

    # query_proj = nn.Identity() (latent_size=None)
    q = h

    # ---------------------- vn_transformer ---------------------
    Q = _vn_linear(q, Wqt, bq)
    K = _vn_linear(h, Wkt, bk)
    V = _vn_linear(h, Wvt, bv)
    amask = amask_ref[...]                                        # [R, R] additive mask

    heads = []
    for hh in range(num_heads):
        c0 = hh * hd
        qh = Q[:, :, c0:c0 + hd]                                  # [3, R, hd]
        kh = K[:, :, c0:c0 + hd]
        vh = V[:, :, c0:c0 + hd]
        # Frobenius scores over (xyz, head channels): one xyz-batched matmul.
        s3 = jax.lax.dot_general(qh, kh, (((2,), (2,)), ((0,), (0,))),
                                 preferred_element_type=jnp.float32)   # [3, R, R]
        s = (s3[0] + s3[1] + s3[2]) * scale + amask               # block-diag mask
        s = s - jnp.max(s, axis=-1, keepdims=True)
        p = jnp.exp(s)
        p = p * pl.reciprocal(jnp.sum(p, axis=-1, keepdims=True), approx=True)
        pb = jnp.broadcast_to(p[None], (3, R, R))
        heads.append(jax.lax.dot_general(pb, vh, (((2,), (1,)), ((0,), (0,))),
                                         preferred_element_type=jnp.float32))
    attn = jnp.concatenate(heads, axis=-1)                        # [3, R, H]
    attn = _vn_linear(attn, Wot, bo)

    h = _vn_layernorm(q + attn, ln1)                              # residual + VN-LN
    f = _vn_linear(h, Wf1t, bf1)
    f = _vn_leaky_relu(f, Uft)
    f = _vn_linear(f, Wf2t, bf2)
    h = _vn_layernorm(h + f, ln2)                                 # residual + VN-LN

    # ------------------ invariant head + mean pooling ----------------
    z = _vn_linear(h, wzt_ref[...], bz_ref[...])                  # [3, R, 3]
    z = _vn_leaky_relu(z, uzt_ref[...])
    # invariant projection onto the 3 learned directions, k-major columns.
    proj = jnp.concatenate(
        [_sum_xyz(h, jnp.broadcast_to(z[:, :, k:k + 1], h.shape)) for k in range(3)],
        axis=-1)                                                  # [R, 3H]
    # mean_pool over points as one MXU matmul with the block-diagonal pool matrix.
    feat = jnp.dot(pool_ref[...], proj, preferred_element_type=jnp.float32)  # [Bt, 3H]
    feat_ref[0] = feat.astype(feat_ref.dtype)


# ---------------------------------------------------------------------------
# Wrapper: layout transforms, parameter folding/packing, pallas_call plumbing,
# and the final classifier MLP (plain batched XLA matmuls).
# ---------------------------------------------------------------------------
def invariant_classifier_forward(x, params, *, num_heads, batch_tile=8):
    """x: [B, C_in, 3, N] (same convention as the PyTorch module). Returns [B, num_classes]."""
    B, Cin, three, N = x.shape
    assert three == 3
    H = params["W1"].shape[0]
    assert H % num_heads == 0
    f32 = jnp.float32

    # ---- batch blocking ----
    Bt = min(B, batch_tile)
    nblk = -(-B // Bt)                      # cdiv
    Bp = nblk * Bt
    R = Bt * N

    # layout: [B, C_in, 3, N] -> [3, B, N, C_in]  (xyz leading, channels on lanes)
    x4 = jnp.transpose(x, (2, 0, 3, 1)).astype(f32)
    if Bp != B:
        x4 = jnp.pad(x4, ((0, 0), (0, Bp - B), (0, 0), (0, 0)))

    # ---- fold eval BatchNorm + pre-scale VN-Linear biases (host side) ----
    def fold_bn(bn):
        mean, var, gamma, beta = bn[0], bn[1], bn[2], bn[3]
        s = gamma / jnp.sqrt(var + BN_EPS)
        return jnp.stack([s, beta - mean * s], axis=0)            # [2, C]

    wpack = jnp.stack([params[k].T for k in
                       ("W2", "U1", "U2", "Wq", "Wk", "Wv", "Wo", "Wf1", "Uf", "Wf2")],
                      axis=0).astype(f32)                          # [10, H, H]
    bias_pack = (BIAS_EPS * jnp.stack(
        [params[k] for k in ("b1", "b2", "bq", "bk", "bv", "bo", "bf1", "bf2")],
        axis=0)).astype(f32)                                       # [8, 3, H]
    norm_pack = jnp.stack([fold_bn(params["bn1"]), fold_bn(params["bn2"]),
                           params["ln1"], params["ln2"]], axis=0).astype(f32)  # [4, 2, H]

    w1t = params["W1"].T.astype(f32)                               # [Cin, H]
    wzt = params["Wz"].T.astype(f32)                               # [H, 3]
    bz_eps = (BIAS_EPS * params["bz"]).astype(f32)                 # [3, 3]
    uzt = params["Uz"].T.astype(f32)                               # [3, 3]

    # block-diagonal additive attention mask + mean-pool matrix (static in Bt, N)
    bid = jnp.repeat(jnp.arange(Bt, dtype=jnp.int32), N)           # [R]
    amask = jnp.where(bid[:, None] == bid[None, :], 0.0, NEG_BIG).astype(f32)   # [R, R]
    pool = jnp.where(jnp.arange(Bt, dtype=jnp.int32)[:, None] == bid[None, :],
                     1.0 / N, 0.0).astype(f32)                     # [Bt, R]

    args = (x4, amask, pool, w1t, wpack, bias_pack, norm_pack, wzt, bz_eps, uzt)
    in_specs = [pl.BlockSpec((3, Bt, N, Cin), lambda i: (0, i, 0, 0))]
    for a in args[1:]:
        in_specs.append(pl.BlockSpec(a.shape, lambda i, nd=a.ndim: (0,) * nd))

    feat = pl.pallas_call(
        functools.partial(_classifier_kernel, N=N, Bt=Bt, num_heads=num_heads),
        grid=(nblk,),
        in_specs=in_specs,
        out_specs=pl.BlockSpec((1, Bt, 3 * H), lambda i: (i, 0, 0)),
        out_shape=jax.ShapeDtypeStruct((nblk, Bt, 3 * H), jnp.float32),
        compiler_params=pltpu.CompilerParams(dimension_semantics=("parallel",)),
    )(*args)

    feat = feat.reshape(Bp, 3 * H)[:B]                             # [B, 3H], k-major

    # Final classifier MLP as batched XLA matmuls (M=B fills lanes; kernel output
    # stays lane-dense).  torch flattens [C, 3] as c*3+k; our pooled feature is
    # k-major (k*H + c), so permute the first weight's columns to match exactly.
    Wm1p = params["Wm1"].reshape(H, H, 3).transpose(0, 2, 1).reshape(H, 3 * H)
    hmid = jnp.maximum(feat @ Wm1p.T + params["bm1"], 0.0)
    logits = hmid @ params["Wm2"].T + params["bm2"]
    return logits


# ---------------------------------------------------------------------------
# Deterministic synthetic parameter initialisation (shapes from __init__)
# ---------------------------------------------------------------------------
def init_params(key, num_classes, in_features, hidden, num_heads):
    assert hidden % num_heads == 0
    keys = iter(jax.random.split(key, 64))
    f32 = jnp.float32

    def w(shape, fan_in):
        return jax.random.normal(next(keys), shape, f32) / jnp.sqrt(jnp.float32(fan_in))

    def bn(c):
        return jnp.stack([
            0.1 * jax.random.normal(next(keys), (c,), f32),                      # running_mean
            jax.random.uniform(next(keys), (c,), f32, minval=0.5, maxval=1.5),   # running_var
            1.0 + 0.1 * jax.random.normal(next(keys), (c,), f32),                # gamma
            0.1 * jax.random.normal(next(keys), (c,), f32),                      # beta
        ], axis=0)

    def ln(c):
        return jnp.stack([
            1.0 + 0.1 * jax.random.normal(next(keys), (c,), f32),                # gamma
            0.1 * jax.random.normal(next(keys), (c,), f32),                      # beta
        ], axis=0)

    H = hidden
    p = {}
    # vn_mlp
    p["W1"], p["b1"], p["bn1"], p["U1"] = w((H, in_features), in_features), w((3, H), 1.0), bn(H), w((H, H), H)
    p["W2"], p["b2"], p["bn2"], p["U2"] = w((H, H), H), w((3, H), 1.0), bn(H), w((H, H), H)
    # vn_transformer
    p["Wq"], p["bq"] = w((H, H), H), w((3, H), 1.0)
    p["Wk"], p["bk"] = w((H, H), H), w((3, H), 1.0)
    p["Wv"], p["bv"] = w((H, H), H), w((3, H), 1.0)
    p["Wo"], p["bo"] = w((H, H), H), w((3, H), 1.0)
    p["ln1"] = ln(H)
    p["Wf1"], p["bf1"], p["Uf"] = w((H, H), H), w((3, H), 1.0), w((H, H), H)
    p["Wf2"], p["bf2"] = w((H, H), H), w((3, H), 1.0)
    p["ln2"] = ln(H)
    # vn_mlp_inv
    p["Wz"], p["bz"], p["Uz"] = w((3, H), H), w((3, 3), 1.0), w((3, 3), 3.0)
    # final mlp
    p["Wm1"], p["bm1"] = w((H, 3 * H), 3 * H), 0.1 * w((1, H), 1.0)
    p["Wm2"], p["bm2"] = w((num_classes, H), H), 0.1 * w((1, num_classes), 1.0)
    return p


if __name__ == "__main__":
    B, Cin, N = 2, 4, 16            # batch, in_features, num_points
    H, num_heads, ncls = 32, 4, 8   # hidden_features, num_heads, num_classes

    key = jax.random.PRNGKey(0)
    kx, kp = jax.random.split(key)
    x = jax.random.normal(kx, (B, Cin, 3, N), jnp.float32)   # [B, num_features, 3, num_points]
    params = init_params(kp, ncls, Cin, H, num_heads)

    fwd = jax.jit(functools.partial(invariant_classifier_forward, num_heads=num_heads))
    logits = fwd(x, params)
    logits = jax.block_until_ready(logits)

    assert logits.shape == (B, ncls), logits.shape
    assert bool(jnp.all(jnp.isfinite(logits)))
    print("KERNEL_OK")
</pallas_src>

<mosaic_0001>
module attributes {stable_mosaic.version = 11 : i64} {
  func.func @_classifier_kernel(%arg0: i32, %arg1: memref<3x2x16x4xf32, #tpu.memory_space<vmem>>, %arg2: memref<32x32xf32, #tpu.memory_space<vmem>>, %arg3: memref<2x32xf32, #tpu.memory_space<vmem>>, %arg4: memref<4x32xf32, #tpu.memory_space<vmem>>, %arg5: memref<10x32x32xf32, #tpu.memory_space<vmem>>, %arg6: memref<8x3x32xf32, #tpu.memory_space<vmem>>, %arg7: memref<4x2x32xf32, #tpu.memory_space<vmem>>, %arg8: memref<32x3xf32, #tpu.memory_space<vmem>>, %arg9: memref<3x3xf32, #tpu.memory_space<vmem>>, %arg10: memref<3x3xf32, #tpu.memory_space<vmem>>, %arg11: memref<1x2x96xf32, #tpu.memory_space<vmem>>) attributes {dimension_semantics = [#tpu.dimension_semantics<parallel>], iteration_bounds = array<i64: 1>, scalar_prefetch = 0 : i64, scratch_operands = 0 : i64, tpu.core_type = #tpu.core_type<tc>, window_params = [{transform_indices = @transform_0, window_bounds = array<i64: 3, 2, 16, 4>}, {pipeline_mode = #tpu.pipeline_mode<synchronous>, transform_indices = @transform_1, window_bounds = array<i64: 32, 32>}, {pipeline_mode = #tpu.pipeline_mode<synchronous>, transform_indices = @transform_2, window_bounds = array<i64: 2, 32>}, {pipeline_mode = #tpu.pipeline_mode<synchronous>, transform_indices = @transform_3, window_bounds = array<i64: 4, 32>}, {pipeline_mode = #tpu.pipeline_mode<synchronous>, transform_indices = @transform_4, window_bounds = array<i64: 10, 32, 32>}, {pipeline_mode = #tpu.pipeline_mode<synchronous>, transform_indices = @transform_5, window_bounds = array<i64: 8, 3, 32>}, {pipeline_mode = #tpu.pipeline_mode<synchronous>, transform_indices = @transform_6, window_bounds = array<i64: 4, 2, 32>}, {pipeline_mode = #tpu.pipeline_mode<synchronous>, transform_indices = @transform_7, window_bounds = array<i64: 32, 3>}, {pipeline_mode = #tpu.pipeline_mode<synchronous>, transform_indices = @transform_8, window_bounds = array<i64: 3, 3>}, {pipeline_mode = #tpu.pipeline_mode<synchronous>, transform_indices = @transform_9, window_bounds = array<i64: 3, 3>}, {transform_indices = @transform_10, window_bounds = array<i64: 1, 2, 96>}]} {
    %c0 = arith.constant 0 : index
    %c0_0 = arith.constant 0 : index
    %c0_1 = arith.constant 0 : index
    %c0_2 = arith.constant 0 : index
    %0 = vector.load %arg1[%c0, %c0_0, %c0_1, %c0_2] : memref<3x2x16x4xf32, #tpu.memory_space<vmem>>, vector<3x2x16x4xf32>
    %1 = vector.shape_cast %0 : vector<3x2x16x4xf32> to vector<3x32x4xf32>
    %c0_3 = arith.constant 0 : index
    %c0_4 = arith.constant 0 : index
    %c0_5 = arith.constant 0 : index
    %2 = vector.load %arg5[%c0_3, %c0_4, %c0_5] : memref<10x32x32xf32, #tpu.memory_space<vmem>>, vector<1x32x32xf32>
    %3 = vector.shape_cast %2 : vector<1x32x32xf32> to vector<32x32xf32>
    %c1 = arith.constant 1 : index
    %c0_6 = arith.constant 0 : index
    %c0_7 = arith.constant 0 : index
    %4 = vector.load %arg5[%c1, %c0_6, %c0_7] : memref<10x32x32xf32, #tpu.memory_space<vmem>>, vector<1x32x32xf32>
    %5 = vector.shape_cast %4 : vector<1x32x32xf32> to vector<32x32xf32>
    %c2 = arith.constant 2 : index
    %c0_8 = arith.constant 0 : index
    %c0_9 = arith.constant 0 : index
    %6 = vector.load %arg5[%c2, %c0_8, %c0_9] : memref<10x32x32xf32, #tpu.memory_space<vmem>>, vector<1x32x32xf32>
    %7 = vector.shape_cast %6 : vector<1x32x32xf32> to vector<32x32xf32>
    %c3 = arith.constant 3 : index
    %c0_10 = arith.constant 0 : index
    %c0_11 = arith.constant 0 : index
    %8 = vector.load %arg5[%c3, %c0_10, %c0_11] : memref<10x32x32xf32, #tpu.memory_space<vmem>>, vector<1x32x32xf32>
    %9 = vector.shape_cast %8 : vector<1x32x32xf32> to vector<32x32xf32>
    %c4 = arith.constant 4 : index
    %c0_12 = arith.constant 0 : index
    %c0_13 = arith.constant 0 : index
    %10 = vector.load %arg5[%c4, %c0_12, %c0_13] : memref<10x32x32xf32, #tpu.memory_space<vmem>>, vector<1x32x32xf32>
    %11 = vector.shape_cast %10 : vector<1x32x32xf32> to vector<32x32xf32>
    %c5 = arith.constant 5 : index
    %c0_14 = arith.constant 0 : index
    %c0_15 = arith.constant 0 : index
    %12 = vector.load %arg5[%c5, %c0_14, %c0_15] : memref<10x32x32xf32, #tpu.memory_space<vmem>>, vector<1x32x32xf32>
    %13 = vector.shape_cast %12 : vector<1x32x32xf32> to vector<32x32xf32>
    %c6 = arith.constant 6 : index
    %c0_16 = arith.constant 0 : index
    %c0_17 = arith.constant 0 : index
    %14 = vector.load %arg5[%c6, %c0_16, %c0_17] : memref<10x32x32xf32, #tpu.memory_space<vmem>>, vector<1x32x32xf32>
    %15 = vector.shape_cast %14 : vector<1x32x32xf32> to vector<32x32xf32>
    %c7 = arith.constant 7 : index
    %c0_18 = arith.constant 0 : index
    %c0_19 = arith.constant 0 : index
    %16 = vector.load %arg5[%c7, %c0_18, %c0_19] : memref<10x32x32xf32, #tpu.memory_space<vmem>>, vector<1x32x32xf32>
    %17 = vector.shape_cast %16 : vector<1x32x32xf32> to vector<32x32xf32>
    %c8 = arith.constant 8 : index
    %c0_20 = arith.constant 0 : index
    %c0_21 = arith.constant 0 : index
    %18 = vector.load %arg5[%c8, %c0_20, %c0_21] : memref<10x32x32xf32, #tpu.memory_space<vmem>>, vector<1x32x32xf32>
    %19 = vector.shape_cast %18 : vector<1x32x32xf32> to vector<32x32xf32>
    %c9 = arith.constant 9 : index
    %c0_22 = arith.constant 0 : index
    %c0_23 = arith.constant 0 : index
    %20 = vector.load %arg5[%c9, %c0_22, %c0_23] : memref<10x32x32xf32, #tpu.memory_space<vmem>>, vector<1x32x32xf32>
    %21 = vector.shape_cast %20 : vector<1x32x32xf32> to vector<32x32xf32>
    %c0_24 = arith.constant 0 : index
    %c0_25 = arith.constant 0 : index
    %c0_26 = arith.constant 0 : index
    %22 = vector.load %arg6[%c0_24, %c0_25, %c0_26] : memref<8x3x32xf32, #tpu.memory_space<vmem>>, vector<1x3x32xf32>
    %23 = vector.shape_cast %22 : vector<1x3x32xf32> to vector<3x32xf32>
    %c1_27 = arith.constant 1 : index
    %c0_28 = arith.constant 0 : index
    %c0_29 = arith.constant 0 : index
    %24 = vector.load %arg6[%c1_27, %c0_28, %c0_29] : memref<8x3x32xf32, #tpu.memory_space<vmem>>, vector<1x3x32xf32>
    %25 = vector.shape_cast %24 : vector<1x3x32xf32> to vector<3x32xf32>
    %c2_30 = arith.constant 2 : index
    %c0_31 = arith.constant 0 : index
    %c0_32 = arith.constant 0 : index
    %26 = vector.load %arg6[%c2_30, %c0_31, %c0_32] : memref<8x3x32xf32, #tpu.memory_space<vmem>>, vector<1x3x32xf32>
    %27 = vector.shape_cast %26 : vector<1x3x32xf32> to vector<3x32xf32>
    %c3_33 = arith.constant 3 : index
    %c0_34 = arith.constant 0 : index
    %c0_35 = arith.constant 0 : index
    %28 = vector.load %arg6[%c3_33, %c0_34, %c0_35] : memref<8x3x32xf32, #tpu.memory_space<vmem>>, vector<1x3x32xf32>
    %29 = vector.shape_cast %28 : vector<1x3x32xf32> to vector<3x32xf32>
    %c4_36 = arith.constant 4 : index
    %c0_37 = arith.constant 0 : index
    %c0_38 = arith.constant 0 : index
    %30 = vector.load %arg6[%c4_36, %c0_37, %c0_38] : memref<8x3x32xf32, #tpu.memory_space<vmem>>, vector<1x3x32xf32>
    %31 = vector.shape_cast %30 : vector<1x3x32xf32> to vector<3x32xf32>
    %c5_39 = arith.constant 5 : index
    %c0_40 = arith.constant 0 : index
    %c0_41 = arith.constant 0 : index
    %32 = vector.load %arg6[%c5_39, %c0_40, %c0_41] : memref<8x3x32xf32, #tpu.memory_space<vmem>>, vector<1x3x32xf32>
    %33 = vector.shape_cast %32 : vector<1x3x32xf32> to vector<3x32xf32>
    %c6_42 = arith.constant 6 : index
    %c0_43 = arith.constant 0 : index
    %c0_44 = arith.constant 0 : index
    %34 = vector.load %arg6[%c6_42, %c0_43, %c0_44] : memref<8x3x32xf32, #tpu.memory_space<vmem>>, vector<1x3x32xf32>
    %35 = vector.shape_cast %34 : vector<1x3x32xf32> to vector<3x32xf32>
    %c7_45 = arith.constant 7 : index
    %c0_46 = arith.constant 0 : index
    %c0_47 = arith.constant 0 : index
    %36 = vector.load %arg6[%c7_45, %c0_46, %c0_47] : memref<8x3x32xf32, #tpu.memory_space<vmem>>, vector<1x3x32xf32>
    %37 = vector.shape_cast %36 : vector<1x3x32xf32> to vector<3x32xf32>
    %c0_48 = arith.constant 0 : index
    %c0_49 = arith.constant 0 : index
    %c0_50 = arith.constant 0 : index
    %38 = vector.load %arg7[%c0_48, %c0_49, %c0_50] : memref<4x2x32xf32, #tpu.memory_space<vmem>>, vector<1x2x32xf32>
    %39 = vector.shape_cast %38 : vector<1x2x32xf32> to vector<2x32xf32>
    %c1_51 = arith.constant 1 : index
    %c0_52 = arith.constant 0 : index
    %c0_53 = arith.constant 0 : index
    %40 = vector.load %arg7[%c1_51, %c0_52, %c0_53] : memref<4x2x32xf32, #tpu.memory_space<vmem>>, vector<1x2x32xf32>
    %41 = vector.shape_cast %40 : vector<1x2x32xf32> to vector<2x32xf32>
    %c2_54 = arith.constant 2 : index
    %c0_55 = arith.constant 0 : index
    %c0_56 = arith.constant 0 : index
    %42 = vector.load %arg7[%c2_54, %c0_55, %c0_56] : memref<4x2x32xf32, #tpu.memory_space<vmem>>, vector<1x2x32xf32>
    %43 = vector.shape_cast %42 : vector<1x2x32xf32> to vector<2x32xf32>
    %c3_57 = arith.constant 3 : index
    %c0_58 = arith.constant 0 : index
    %c0_59 = arith.constant 0 : index
    %44 = vector.load %arg7[%c3_57, %c0_58, %c0_59] : memref<4x2x32xf32, #tpu.memory_space<vmem>>, vector<1x2x32xf32>
    %45 = vector.shape_cast %44 : vector<1x2x32xf32> to vector<2x32xf32>
    %c0_60 = arith.constant 0 : index
    %c0_61 = arith.constant 0 : index
    %46 = vector.load %arg4[%c0_60, %c0_61] : memref<4x32xf32, #tpu.memory_space<vmem>>, vector<4x32xf32>
    %47 = vector.shape_cast %1 : vector<3x32x4xf32> to vector<96x4xf32>
    %cst = arith.constant dense<0.000000e+00> : vector<96x32xf32>
    %48 = tpu.matmul %47, %46, %cst {dimension_numbers = #tpu.dot_dimension_numbers<[1], [0], [0], [1], [0, 0, 1, 1], [], []>} : vector<96x4xf32>, vector<4x32xf32>, vector<96x32xf32> -> vector<96x32xf32>
    %49 = vector.shape_cast %48 : vector<96x32xf32> to vector<3x32x32xf32>
    %50 = vector.shape_cast %23 : vector<3x32xf32> to vector<3x1x32xf32>
    %51 = vector.broadcast %50 : vector<3x1x32xf32> to vector<3x32x32xf32>
    %52 = arith.addf %49, %51 : vector<3x32x32xf32>
    %53 = vector.extract_strided_slice %52 {offsets = [0, 0, 0], sizes = [1, 32, 32], strides = [1, 1, 1]} : vector<3x32x32xf32> to vector<1x32x32xf32>
    %54 = vector.shape_cast %53 : vector<1x32x32xf32> to vector<32x32xf32>
    %55 = vector.extract_strided_slice %52 {offsets = [0, 0, 0], sizes = [1, 32, 32], strides = [1, 1, 1]} : vector<3x32x32xf32> to vector<1x32x32xf32>
    %56 = vector.shape_cast %55 : vector<1x32x32xf32> to vector<32x32xf32>
    %57 = arith.mulf %54, %56 : vector<32x32xf32>
    %58 = vector.extract_strided_slice %52 {offsets = [1, 0, 0], sizes = [1, 32, 32], strides = [1, 1, 1]} : vector<3x32x32xf32> to vector<1x32x32xf32>
    %59 = vector.shape_cast %58 : vector<1x32x32xf32> to vector<32x32xf32>
    %60 = vector.extract_strided_slice %52 {offsets = [1, 0, 0], sizes = [1, 32, 32], strides = [1, 1, 1]} : vector<3x32x32xf32> to vector<1x32x32xf32>
    %61 = vector.shape_cast %60 : vector<1x32x32xf32> to vector<32x32xf32>
    %62 = arith.mulf %59, %61 : vector<32x32xf32>
    %63 = arith.addf %57, %62 : vector<32x32xf32>
    %64 = vector.extract_strided_slice %52 {offsets = [2, 0, 0], sizes = [1, 32, 32], strides = [1, 1, 1]} : vector<3x32x32xf32> to vector<1x32x32xf32>
    %65 = vector.shape_cast %64 : vector<1x32x32xf32> to vector<32x32xf32>
    %66 = vector.extract_strided_slice %52 {offsets = [2, 0, 0], sizes = [1, 32, 32], strides = [1, 1, 1]} : vector<3x32x32xf32> to vector<1x32x32xf32>
    %67 = vector.shape_cast %66 : vector<1x32x32xf32> to vector<32x32xf32>
    %68 = arith.mulf %65, %67 : vector<32x32xf32>
    %69 = arith.addf %63, %68 : vector<32x32xf32>
    %70 = math.sqrt %69 : vector<32x32xf32>
    %cst_62 = arith.constant 9.99999997E-7 : f32
    %71 = vector.broadcast %cst_62 : f32 to vector<32x32xf32>
    %72 = arith.addf %70, %71 : vector<32x32xf32>
    %73 = vector.extract_strided_slice %39 {offsets = [0, 0], sizes = [1, 32], strides = [1, 1]} : vector<2x32xf32> to vector<1x32xf32>
    %74 = vector.broadcast %73 : vector<1x32xf32> to vector<32x32xf32>
    %75 = arith.mulf %72, %74 : vector<32x32xf32>
    %76 = vector.extract_strided_slice %39 {offsets = [1, 0], sizes = [1, 32], strides = [1, 1]} : vector<2x32xf32> to vector<1x32xf32>
    %77 = vector.broadcast %76 : vector<1x32xf32> to vector<32x32xf32>
    %78 = arith.addf %75, %77 : vector<32x32xf32>
    %79 = tpu.reciprocal %72 {approx = true} : vector<32x32xf32> -> vector<32x32xf32>
    %80 = arith.mulf %78, %79 : vector<32x32xf32>
    %81 = vector.shape_cast %80 : vector<32x32xf32> to vector<1x32x32xf32>
    %82 = vector.broadcast %81 : vector<1x32x32xf32> to vector<3x32x32xf32>
    %83 = arith.mulf %52, %82 : vector<3x32x32xf32>
    %84 = vector.shape_cast %83 : vector<3x32x32xf32> to vector<96x32xf32>
    %cst_63 = arith.constant dense<0.000000e+00> : vector<96x32xf32>
    %85 = tpu.matmul %84, %5, %cst_63 {dimension_numbers = #tpu.dot_dimension_numbers<[1], [0], [0], [1], [0, 0, 1, 1], [], []>} : vector<96x32xf32>, vector<32x32xf32>, vector<96x32xf32> -> vector<96x32xf32>
    %86 = vector.shape_cast %85 : vector<96x32xf32> to vector<3x32x32xf32>
    %87 = vector.extract_strided_slice %83 {offsets = [0, 0, 0], sizes = [1, 32, 32], strides = [1, 1, 1]} : vector<3x32x32xf32> to vector<1x32x32xf32>
    %88 = vector.shape_cast %87 : vector<1x32x32xf32> to vector<32x32xf32>
    %89 = vector.extract_strided_slice %86 {offsets = [0, 0, 0], sizes = [1, 32, 32], strides = [1, 1, 1]} : vector<3x32x32xf32> to vector<1x32x32xf32>
    %90 = vector.shape_cast %89 : vector<1x32x32xf32> to vector<32x32xf32>
    %91 = arith.mulf %88, %90 : vector<32x32xf32>
    %92 = vector.extract_strided_slice %83 {offsets = [1, 0, 0], sizes = [1, 32, 32], strides = [1, 1, 1]} : vector<3x32x32xf32> to vector<1x32x32xf32>
    %93 = vector.shape_cast %92 : vector<1x32x32xf32> to vector<32x32xf32>
    %94 = vector.extract_strided_slice %86 {offsets = [1, 0, 0], sizes = [1, 32, 32], strides = [1, 1, 1]} : vector<3x32x32xf32> to vector<1x32x32xf32>
    %95 = vector.shape_cast %94 : vector<1x32x32xf32> to vector<32x32xf32>
    %96 = arith.mulf %93, %95 : vector<32x32xf32>
    %97 = arith.addf %91, %96 : vector<32x32xf32>
    %98 = vector.extract_strided_slice %83 {offsets = [2, 0, 0], sizes = [1, 32, 32], strides = [1, 1, 1]} : vector<3x32x32xf32> to vector<1x32x32xf32>
    %99 = vector.shape_cast %98 : vector<1x32x32xf32> to vector<32x32xf32>
    %100 = vector.extract_strided_slice %86 {offsets = [2, 0, 0], sizes = [1, 32, 32], strides = [1, 1, 1]} : vector<3x32x32xf32> to vector<1x32x32xf32>
    %101 = vector.shape_cast %100 : vector<1x32x32xf32> to vector<32x32xf32>
    %102 = arith.mulf %99, %101 : vector<32x32xf32>
    %103 = arith.addf %97, %102 : vector<32x32xf32>
    %104 = vector.extract_strided_slice %86 {offsets = [0, 0, 0], sizes = [1, 32, 32], strides = [1, 1, 1]} : vector<3x32x32xf32> to vector<1x32x32xf32>
    %105 = vector.shape_cast %104 : vector<1x32x32xf32> to vector<32x32xf32>
    %106 = vector.extract_strided_slice %86 {offsets = [0, 0, 0], sizes = [1, 32, 32], strides = [1, 1, 1]} : vector<3x32x32xf32> to vector<1x32x32xf32>
    %107 = vector.shape_cast %106 : vector<1x32x32xf32> to vector<32x32xf32>
    %108 = arith.mulf %105, %107 : vector<32x32xf32>
    %109 = vector.extract_strided_slice %86 {offsets = [1, 0, 0], sizes = [1, 32, 32], strides = [1, 1, 1]} : vector<3x32x32xf32> to vector<1x32x32xf32>
    %110 = vector.shape_cast %109 : vector<1x32x32xf32> to vector<32x32xf32>
    %111 = vector.extract_strided_slice %86 {offsets = [1, 0, 0], sizes = [1, 32, 32], strides = [1, 1, 1]} : vector<3x32x32xf32> to vector<1x32x32xf32>
    %112 = vector.shape_cast %111 : vector<1x32x32xf32> to vector<32x32xf32>
    %113 = arith.mulf %110, %112 : vector<32x32xf32>
    %114 = arith.addf %108, %113 : vector<32x32xf32>
    %115 = vector.extract_strided_slice %86 {offsets = [2, 0, 0], sizes = [1, 32, 32], strides = [1, 1, 1]} : vector<3x32x32xf32> to vector<1x32x32xf32>
    %116 = vector.shape_cast %115 : vector<1x32x32xf32> to vector<32x32xf32>
    %117 = vector.extract_strided_slice %86 {offsets = [2, 0, 0], sizes = [1, 32, 32], strides = [1, 1, 1]} : vector<3x32x32xf32> to vector<1x32x32xf32>
    %118 = vector.shape_cast %117 : vector<1x32x32xf32> to vector<32x32xf32>
    %119 = arith.mulf %116, %118 : vector<32x32xf32>
    %120 = arith.addf %114, %119 : vector<32x32xf32>
    %cst_64 = arith.constant 9.99999997E-7 : f32
    %121 = vector.broadcast %cst_64 : f32 to vector<32x32xf32>
    %122 = arith.addf %120, %121 : vector<32x32xf32>
    %123 = tpu.reciprocal %122 {approx = true} : vector<32x32xf32> -> vector<32x32xf32>
    %124 = arith.mulf %103, %123 : vector<32x32xf32>
    %125 = vector.shape_cast %124 : vector<32x32xf32> to vector<1x32x32xf32>
    %126 = vector.broadcast %125 : vector<1x32x32xf32> to vector<3x32x32xf32>
    %127 = arith.mulf %126, %86 : vector<3x32x32xf32>
    %128 = arith.subf %83, %127 : vector<3x32x32xf32>
    %cst_65 = arith.constant 0.000000e+00 : f32
    %129 = vector.broadcast %cst_65 : f32 to vector<32x32xf32>
    %130 = arith.cmpf oge, %103, %129 : vector<32x32xf32>
    %131 = vector.shape_cast %130 : vector<32x32xi1> to vector<1x32x32xi1>
    %132 = vector.shape_cast %131 : vector<1x32x32xi1> to vector<1x32x32xi1>
    %133 = vector.broadcast %132 : vector<1x32x32xi1> to vector<3x32x32xi1>
    %134 = arith.select %133, %83, %128 : vector<3x32x32xi1>, vector<3x32x32xf32>
    %cst_66 = arith.constant 2.000000e-01 : f32
    %135 = vector.broadcast %cst_66 : f32 to vector<3x32x32xf32>
    %136 = arith.mulf %135, %83 : vector<3x32x32xf32>
    %cst_67 = arith.constant 8.000000e-01 : f32
    %137 = vector.broadcast %cst_67 : f32 to vector<3x32x32xf32>
    %138 = arith.mulf %137, %134 : vector<3x32x32xf32>
    %139 = arith.addf %136, %138 : vector<3x32x32xf32>
    %140 = vector.shape_cast %139 : vector<3x32x32xf32> to vector<96x32xf32>
    %cst_68 = arith.constant dense<0.000000e+00> : vector<96x32xf32>
    %141 = tpu.matmul %140, %3, %cst_68 {dimension_numbers = #tpu.dot_dimension_numbers<[1], [0], [0], [1], [0, 0, 1, 1], [], []>} : vector<96x32xf32>, vector<32x32xf32>, vector<96x32xf32> -> vector<96x32xf32>
    %142 = vector.shape_cast %141 : vector<96x32xf32> to vector<3x32x32xf32>
    %143 = vector.shape_cast %25 : vector<3x32xf32> to vector<3x1x32xf32>
    %144 = vector.broadcast %143 : vector<3x1x32xf32> to vector<3x32x32xf32>
    %145 = arith.addf %142, %144 : vector<3x32x32xf32>
    %146 = vector.extract_strided_slice %145 {offsets = [0, 0, 0], sizes = [1, 32, 32], strides = [1, 1, 1]} : vector<3x32x32xf32> to vector<1x32x32xf32>
    %147 = vector.shape_cast %146 : vector<1x32x32xf32> to vector<32x32xf32>
    %148 = vector.extract_strided_slice %145 {offsets = [0, 0, 0], sizes = [1, 32, 32], strides = [1, 1, 1]} : vector<3x32x32xf32> to vector<1x32x32xf32>
    %149 = vector.shape_cast %148 : vector<1x32x32xf32> to vector<32x32xf32>
    %150 = arith.mulf %147, %149 : vector<32x32xf32>
    %151 = vector.extract_strided_slice %145 {offsets = [1, 0, 0], sizes = [1, 32, 32], strides = [1, 1, 1]} : vector<3x32x32xf32> to vector<1x32x32xf32>
    %152 = vector.shape_cast %151 : vector<1x32x32xf32> to vector<32x32xf32>
    %153 = vector.extract_strided_slice %145 {offsets = [1, 0, 0], sizes = [1, 32, 32], strides = [1, 1, 1]} : vector<3x32x32xf32> to vector<1x32x32xf32>
    %154 = vector.shape_cast %153 : vector<1x32x32xf32> to vector<32x32xf32>
    %155 = arith.mulf %152, %154 : vector<32x32xf32>
    %156 = arith.addf %150, %155 : vector<32x32xf32>
    %157 = vector.extract_strided_slice %145 {offsets = [2, 0, 0], sizes = [1, 32, 32], strides = [1, 1, 1]} : vector<3x32x32xf32> to vector<1x32x32xf32>
    %158 = vector.shape_cast %157 : vector<1x32x32xf32> to vector<32x32xf32>
    %159 = vector.extract_strided_slice %145 {offsets = [2, 0, 0], sizes = [1, 32, 32], strides = [1, 1, 1]} : vector<3x32x32xf32> to vector<1x32x32xf32>
    %160 = vector.shape_cast %159 : vector<1x32x32xf32> to vector<32x32xf32>
    %161 = arith.mulf %158, %160 : vector<32x32xf32>
    %162 = arith.addf %156, %161 : vector<32x32xf32>
    %163 = math.sqrt %162 : vector<32x32xf32>
    %cst_69 = arith.constant 9.99999997E-7 : f32
    %164 = vector.broadcast %cst_69 : f32 to vector<32x32xf32>
    %165 = arith.addf %163, %164 : vector<32x32xf32>
    %166 = vector.extract_strided_slice %41 {offsets = [0, 0], sizes = [1, 32], strides = [1, 1]} : vector<2x32xf32> to vector<1x32xf32>
    %167 = vector.broadcast %166 : vector<1x32xf32> to vector<32x32xf32>
    %168 = arith.mulf %165, %167 : vector<32x32xf32>
    %169 = vector.extract_strided_slice %41 {offsets = [1, 0], sizes = [1, 32], strides = [1, 1]} : vector<2x32xf32> to vector<1x32xf32>
    %170 = vector.broadcast %169 : vector<1x32xf32> to vector<32x32xf32>
    %171 = arith.addf %168, %170 : vector<32x32xf32>
    %172 = tpu.reciprocal %165 {approx = true} : vector<32x32xf32> -> vector<32x32xf32>
    %173 = arith.mulf %171, %172 : vector<32x32xf32>
    %174 = vector.shape_cast %173 : vector<32x32xf32> to vector<1x32x32xf32>
    %175 = vector.broadcast %174 : vector<1x32x32xf32> to vector<3x32x32xf32>
    %176 = arith.mulf %145, %175 : vector<3x32x32xf32>
    %177 = vector.shape_cast %176 : vector<3x32x32xf32> to vector<96x32xf32>
    %cst_70 = arith.constant dense<0.000000e+00> : vector<96x32xf32>
    %178 = tpu.matmul %177, %7, %cst_70 {dimension_numbers = #tpu.dot_dimension_numbers<[1], [0], [0], [1], [0, 0, 1, 1], [], []>} : vector<96x32xf32>, vector<32x32xf32>, vector<96x32xf32> -> vector<96x32xf32>
    %179 = vector.shape_cast %178 : vector<96x32xf32> to vector<3x32x32xf32>
    %180 = vector.extract_strided_slice %176 {offsets = [0, 0, 0], sizes = [1, 32, 32], strides = [1, 1, 1]} : vector<3x32x32xf32> to vector<1x32x32xf32>
    %181 = vector.shape_cast %180 : vector<1x32x32xf32> to vector<32x32xf32>
    %182 = vector.extract_strided_slice %179 {offsets = [0, 0, 0], sizes = [1, 32, 32], strides = [1, 1, 1]} : vector<3x32x32xf32> to vector<1x32x32xf32>
    %183 = vector.shape_cast %182 : vector<1x32x32xf32> to vector<32x32xf32>
    %184 = arith.mulf %181, %183 : vector<32x32xf32>
    %185 = vector.extract_strided_slice %176 {offsets = [1, 0, 0], sizes = [1, 32, 32], strides = [1, 1, 1]} : vector<3x32x32xf32> to vector<1x32x32xf32>
    %186 = vector.shape_cast %185 : vector<1x32x32xf32> to vector<32x32xf32>
    %187 = vector.extract_strided_slice %179 {offsets = [1, 0, 0], sizes = [1, 32, 32], strides = [1, 1, 1]} : vector<3x32x32xf32> to vector<1x32x32xf32>
    %188 = vector.shape_cast %187 : vector<1x32x32xf32> to vector<32x32xf32>
    %189 = arith.mulf %186, %188 : vector<32x32xf32>
    %190 = arith.addf %184, %189 : vector<32x32xf32>
    %191 = vector.extract_strided_slice %176 {offsets = [2, 0, 0], sizes = [1, 32, 32], strides = [1, 1, 1]} : vector<3x32x32xf32> to vector<1x32x32xf32>
    %192 = vector.shape_cast %191 : vector<1x32x32xf32> to vector<32x32xf32>
    %193 = vector.extract_strided_slice %179 {offsets = [2, 0, 0], sizes = [1, 32, 32], strides = [1, 1, 1]} : vector<3x32x32xf32> to vector<1x32x32xf32>
    %194 = vector.shape_cast %193 : vector<1x32x32xf32> to vector<32x32xf32>
    %195 = arith.mulf %192, %194 : vector<32x32xf32>
    %196 = arith.addf %190, %195 : vector<32x32xf32>
    %197 = vector.extract_strided_slice %179 {offsets = [0, 0, 0], sizes = [1, 32, 32], strides = [1, 1, 1]} : vector<3x32x32xf32> to vector<1x32x32xf32>
    %198 = vector.shape_cast %197 : vector<1x32x32xf32> to vector<32x32xf32>
    %199 = vector.extract_strided_slice %179 {offsets = [0, 0, 0], sizes = [1, 32, 32], strides = [1, 1, 1]} : vector<3x32x32xf32> to vector<1x32x32xf32>
    %200 = vector.shape_cast %199 : vector<1x32x32xf32> to vector<32x32xf32>
    %201 = arith.mulf %198, %200 : vector<32x32xf32>
    %202 = vector.extract_strided_slice %179 {offsets = [1, 0, 0], sizes = [1, 32, 32], strides = [1, 1, 1]} : vector<3x32x32xf32> to vector<1x32x32xf32>
    %203 = vector.shape_cast %202 : vector<1x32x32xf32> to vector<32x32xf32>
    %204 = vector.extract_strided_slice %179 {offsets = [1, 0, 0], sizes = [1, 32, 32], strides = [1, 1, 1]} : vector<3x32x32xf32> to vector<1x32x32xf32>
    %205 = vector.shape_cast %204 : vector<1x32x32xf32> to vector<32x32xf32>
    %206 = arith.mulf %203, %205 : vector<32x32xf32>
    %207 = arith.addf %201, %206 : vector<32x32xf32>
    %208 = vector.extract_strided_slice %179 {offsets = [2, 0, 0], sizes = [1, 32, 32], strides = [1, 1, 1]} : vector<3x32x32xf32> to vector<1x32x32xf32>
    %209 = vector.shape_cast %208 : vector<1x32x32xf32> to vector<32x32xf32>
    %210 = vector.extract_strided_slice %179 {offsets = [2, 0, 0], sizes = [1, 32, 32], strides = [1, 1, 1]} : vector<3x32x32xf32> to vector<1x32x32xf32>
    %211 = vector.shape_cast %210 : vector<1x32x32xf32> to vector<32x32xf32>
    %212 = arith.mulf %209, %211 : vector<32x32xf32>
    %213 = arith.addf %207, %212 : vector<32x32xf32>
    %cst_71 = arith.constant 9.99999997E-7 : f32
    %214 = vector.broadcast %cst_71 : f32 to vector<32x32xf32>
    %215 = arith.addf %213, %214 : vector<32x32xf32>
    %216 = tpu.reciprocal %215 {approx = true} : vector<32x32xf32> -> vector<32x32xf32>
    %217 = arith.mulf %196, %216 : vector<32x32xf32>
    %218 = vector.shape_cast %217 : vector<32x32xf32> to vector<1x32x32xf32>
    %219 = vector.broadcast %218 : vector<1x32x32xf32> to vector<3x32x32xf32>
    %220 = arith.mulf %219, %179 : vector<3x32x32xf32>
    %221 = arith.subf %176, %220 : vector<3x32x32xf32>
    %cst_72 = arith.constant 0.000000e+00 : f32
    %222 = vector.broadcast %cst_72 : f32 to vector<32x32xf32>
    %223 = arith.cmpf oge, %196, %222 : vector<32x32xf32>
    %224 = vector.shape_cast %223 : vector<32x32xi1> to vector<1x32x32xi1>
    %225 = vector.shape_cast %224 : vector<1x32x32xi1> to vector<1x32x32xi1>
    %226 = vector.broadcast %225 : vector<1x32x32xi1> to vector<3x32x32xi1>
    %227 = arith.select %226, %176, %221 : vector<3x32x32xi1>, vector<3x32x32xf32>
    %cst_73 = arith.constant 2.000000e-01 : f32
    %228 = vector.broadcast %cst_73 : f32 to vector<3x32x32xf32>
    %229 = arith.mulf %228, %176 : vector<3x32x32xf32>
    %cst_74 = arith.constant 8.000000e-01 : f32
    %230 = vector.broadcast %cst_74 : f32 to vector<3x32x32xf32>
    %231 = arith.mulf %230, %227 : vector<3x32x32xf32>
    %232 = arith.addf %229, %231 : vector<3x32x32xf32>
    %233 = vector.shape_cast %232 : vector<3x32x32xf32> to vector<96x32xf32>
    %cst_75 = arith.constant dense<0.000000e+00> : vector<96x32xf32>
    %234 = tpu.matmul %233, %9, %cst_75 {dimension_numbers = #tpu.dot_dimension_numbers<[1], [0], [0], [1], [0, 0, 1, 1], [], []>} : vector<96x32xf32>, vector<32x32xf32>, vector<96x32xf32> -> vector<96x32xf32>
    %235 = vector.shape_cast %234 : vector<96x32xf32> to vector<3x32x32xf32>
    %236 = vector.shape_cast %27 : vector<3x32xf32> to vector<3x1x32xf32>
    %237 = vector.broadcast %236 : vector<3x1x32xf32> to vector<3x32x32xf32>
    %238 = arith.addf %235, %237 : vector<3x32x32xf32>
    %239 = vector.shape_cast %232 : vector<3x32x32xf32> to vector<96x32xf32>
    %cst_76 = arith.constant dense<0.000000e+00> : vector<96x32xf32>
    %240 = tpu.matmul %239, %11, %cst_76 {dimension_numbers = #tpu.dot_dimension_numbers<[1], [0], [0], [1], [0, 0, 1, 1], [], []>} : vector<96x32xf32>, vector<32x32xf32>, vector<96x32xf32> -> vector<96x32xf32>
    %241 = vector.shape_cast %240 : vector<96x32xf32> to vector<3x32x32xf32>
    %242 = vector.shape_cast %29 : vector<3x32xf32> to vector<3x1x32xf32>
    %243 = vector.broadcast %242 : vector<3x1x32xf32> to vector<3x32x32xf32>
    %244 = arith.addf %241, %243 : vector<3x32x32xf32>
    %245 = vector.shape_cast %232 : vector<3x32x32xf32> to vector<96x32xf32>
    %cst_77 = arith.constant dense<0.000000e+00> : vector<96x32xf32>
    %246 = tpu.matmul %245, %13, %cst_77 {dimension_numbers = #tpu.dot_dimension_numbers<[1], [0], [0], [1], [0, 0, 1, 1], [], []>} : vector<96x32xf32>, vector<32x32xf32>, vector<96x32xf32> -> vector<96x32xf32>
    %247 = vector.shape_cast %246 : vector<96x32xf32> to vector<3x32x32xf32>
    %248 = vector.shape_cast %31 : vector<3x32xf32> to vector<3x1x32xf32>
    %249 = vector.broadcast %248 : vector<3x1x32xf32> to vector<3x32x32xf32>
    %250 = arith.addf %247, %249 : vector<3x32x32xf32>
    %c0_78 = arith.constant 0 : index
    %c0_79 = arith.constant 0 : index
    %251 = vector.load %arg2[%c0_78, %c0_79] : memref<32x32xf32, #tpu.memory_space<vmem>>, vector<32x32xf32>
    %252 = vector.extract_strided_slice %238 {offsets = [0, 0, 0], sizes = [3, 32, 8], strides = [1, 1, 1]} : vector<3x32x32xf32> to vector<3x32x8xf32>
    %253 = vector.extract_strided_slice %244 {offsets = [0, 0, 0], sizes = [3, 32, 8], strides = [1, 1, 1]} : vector<3x32x32xf32> to vector<3x32x8xf32>
    %254 = vector.extract_strided_slice %250 {offsets = [0, 0, 0], sizes = [3, 32, 8], strides = [1, 1, 1]} : vector<3x32x32xf32> to vector<3x32x8xf32>
    %cst_80 = arith.constant dense<0.000000e+00> : vector<3x32x32xf32>
    %255 = tpu.matmul %252, %253, %cst_80 {dimension_numbers = #tpu.dot_dimension_numbers<[2], [2], [1], [1], [0, 0, 0, 1, 1, 1], [0], [0]>} : vector<3x32x8xf32>, vector<3x32x8xf32>, vector<3x32x32xf32> -> vector<3x32x32xf32>
    %256 = vector.extract_strided_slice %255 {offsets = [0, 0, 0], sizes = [1, 32, 32], strides = [1, 1, 1]} : vector<3x32x32xf32> to vector<1x32x32xf32>
    %257 = vector.shape_cast %256 : vector<1x32x32xf32> to vector<32x32xf32>
    %258 = vector.extract_strided_slice %255 {offsets = [1, 0, 0], sizes = [1, 32, 32], strides = [1, 1, 1]} : vector<3x32x32xf32> to vector<1x32x32xf32>
    %259 = vector.shape_cast %258 : vector<1x32x32xf32> to vector<32x32xf32>
    %260 = arith.addf %257, %259 : vector<32x32xf32>
    %261 = vector.extract_strided_slice %255 {offsets = [2, 0, 0], sizes = [1, 32, 32], strides = [1, 1, 1]} : vector<3x32x32xf32> to vector<1x32x32xf32>
    %262 = vector.shape_cast %261 : vector<1x32x32xf32> to vector<32x32xf32>
    %263 = arith.addf %260, %262 : vector<32x32xf32>
    %cst_81 = arith.constant 0.204124153 : f32
    %264 = vector.broadcast %cst_81 : f32 to vector<32x32xf32>
    %265 = arith.mulf %263, %264 : vector<32x32xf32>
    %266 = arith.addf %265, %251 : vector<32x32xf32>
    %cst_82 = arith.constant dense<0xFF800000> : vector<32xf32>
    %267 = vector.multi_reduction <maximumf>, %266, %cst_82 [1] : vector<32x32xf32> to vector<32xf32>
    %268 = vector.shape_cast %267 : vector<32xf32> to vector<32x1xf32>
    %269 = vector.broadcast %268 : vector<32x1xf32> to vector<32x32xf32>
    %270 = arith.subf %266, %269 : vector<32x32xf32>
    %271 = math.exp %270 : vector<32x32xf32>
    %cst_83 = arith.constant dense<0.000000e+00> : vector<32xf32>
    %272 = vector.multi_reduction <add>, %271, %cst_83 [1] : vector<32x32xf32> to vector<32xf32>
    %273 = vector.shape_cast %272 : vector<32xf32> to vector<32x1xf32>
    %274 = tpu.reciprocal %273 {approx = true} : vector<32x1xf32> -> vector<32x1xf32>
    %275 = vector.broadcast %274 : vector<32x1xf32> to vector<32x32xf32>
    %276 = arith.mulf %271, %275 : vector<32x32xf32>
    %277 = vector.shape_cast %276 : vector<32x32xf32> to vector<1x32x32xf32>
    %278 = vector.shape_cast %277 : vector<1x32x32xf32> to vector<1x32x32xf32>
    %279 = vector.broadcast %278 : vector<1x32x32xf32> to vector<3x32x32xf32>
    %cst_84 = arith.constant dense<0.000000e+00> : vector<3x32x8xf32>
    %280 = tpu.matmul %279, %254, %cst_84 {dimension_numbers = #tpu.dot_dimension_numbers<[2], [1], [1], [2], [0, 0, 0, 1, 1, 2], [0], [0]>} : vector<3x32x32xf32>, vector<3x32x8xf32>, vector<3x32x8xf32> -> vector<3x32x8xf32>
    %281 = vector.extract_strided_slice %238 {offsets = [0, 0, 8], sizes = [3, 32, 8], strides = [1, 1, 1]} : vector<3x32x32xf32> to vector<3x32x8xf32>
    %282 = vector.extract_strided_slice %244 {offsets = [0, 0, 8], sizes = [3, 32, 8], strides = [1, 1, 1]} : vector<3x32x32xf32> to vector<3x32x8xf32>
    %283 = vector.extract_strided_slice %250 {offsets = [0, 0, 8], sizes = [3, 32, 8], strides = [1, 1, 1]} : vector<3x32x32xf32> to vector<3x32x8xf32>
    %cst_85 = arith.constant dense<0.000000e+00> : vector<3x32x32xf32>
    %284 = tpu.matmul %281, %282, %cst_85 {dimension_numbers = #tpu.dot_dimension_numbers<[2], [2], [1], [1], [0, 0, 0, 1, 1, 1], [0], [0]>} : vector<3x32x8xf32>, vector<3x32x8xf32>, vector<3x32x32xf32> -> vector<3x32x32xf32>
    %285 = vector.extract_strided_slice %284 {offsets = [0, 0, 0], sizes = [1, 32, 32], strides = [1, 1, 1]} : vector<3x32x32xf32> to vector<1x32x32xf32>
    %286 = vector.shape_cast %285 : vector<1x32x32xf32> to vector<32x32xf32>
    %287 = vector.extract_strided_slice %284 {offsets = [1, 0, 0], sizes = [1, 32, 32], strides = [1, 1, 1]} : vector<3x32x32xf32> to vector<1x32x32xf32>
    %288 = vector.shape_cast %287 : vector<1x32x32xf32> to vector<32x32xf32>
    %289 = arith.addf %286, %288 : vector<32x32xf32>
    %290 = vector.extract_strided_slice %284 {offsets = [2, 0, 0], sizes = [1, 32, 32], strides = [1, 1, 1]} : vector<3x32x32xf32> to vector<1x32x32xf32>
    %291 = vector.shape_cast %290 : vector<1x32x32xf32> to vector<32x32xf32>
    %292 = arith.addf %289, %291 : vector<32x32xf32>
    %cst_86 = arith.constant 0.204124153 : f32
    %293 = vector.broadcast %cst_86 : f32 to vector<32x32xf32>
    %294 = arith.mulf %292, %293 : vector<32x32xf32>
    %295 = arith.addf %294, %251 : vector<32x32xf32>
    %cst_87 = arith.constant dense<0xFF800000> : vector<32xf32>
    %296 = vector.multi_reduction <maximumf>, %295, %cst_87 [1] : vector<32x32xf32> to vector<32xf32>
    %297 = vector.shape_cast %296 : vector<32xf32> to vector<32x1xf32>
    %298 = vector.broadcast %297 : vector<32x1xf32> to vector<32x32xf32>
    %299 = arith.subf %295, %298 : vector<32x32xf32>
    %300 = math.exp %299 : vector<32x32xf32>
    %cst_88 = arith.constant dense<0.000000e+00> : vector<32xf32>
    %301 = vector.multi_reduction <add>, %300, %cst_88 [1] : vector<32x32xf32> to vector<32xf32>
    %302 = vector.shape_cast %301 : vector<32xf32> to vector<32x1xf32>
    %303 = tpu.reciprocal %302 {approx = true} : vector<32x1xf32> -> vector<32x1xf32>
    %304 = vector.broadcast %303 : vector<32x1xf32> to vector<32x32xf32>
    %305 = arith.mulf %300, %304 : vector<32x32xf32>
    %306 = vector.shape_cast %305 : vector<32x32xf32> to vector<1x32x32xf32>
    %307 = vector.shape_cast %306 : vector<1x32x32xf32> to vector<1x32x32xf32>
    %308 = vector.broadcast %307 : vector<1x32x32xf32> to vector<3x32x32xf32>
    %cst_89 = arith.constant dense<0.000000e+00> : vector<3x32x8xf32>
    %309 = tpu.matmul %308, %283, %cst_89 {dimension_numbers = #tpu.dot_dimension_numbers<[2], [1], [1], [2], [0, 0, 0, 1, 1, 2], [0], [0]>} : vector<3x32x32xf32>, vector<3x32x8xf32>, vector<3x32x8xf32> -> vector<3x32x8xf32>
    %310 = vector.extract_strided_slice %238 {offsets = [0, 0, 16], sizes = [3, 32, 8], strides = [1, 1, 1]} : vector<3x32x32xf32> to vector<3x32x8xf32>
    %311 = vector.extract_strided_slice %244 {offsets = [0, 0, 16], sizes = [3, 32, 8], strides = [1, 1, 1]} : vector<3x32x32xf32> to vector<3x32x8xf32>
    %312 = vector.extract_strided_slice %250 {offsets = [0, 0, 16], sizes = [3, 32, 8], strides = [1, 1, 1]} : vector<3x32x32xf32> to vector<3x32x8xf32>
    %cst_90 = arith.constant dense<0.000000e+00> : vector<3x32x32xf32>
    %313 = tpu.matmul %310, %311, %cst_90 {dimension_numbers = #tpu.dot_dimension_numbers<[2], [2], [1], [1], [0, 0, 0, 1, 1, 1], [0], [0]>} : vector<3x32x8xf32>, vector<3x32x8xf32>, vector<3x32x32xf32> -> vector<3x32x32xf32>
    %314 = vector.extract_strided_slice %313 {offsets = [0, 0, 0], sizes = [1, 32, 32], strides = [1, 1, 1]} : vector<3x32x32xf32> to vector<1x32x32xf32>
    %315 = vector.shape_cast %314 : vector<1x32x32xf32> to vector<32x32xf32>
    %316 = vector.extract_strided_slice %313 {offsets = [1, 0, 0], sizes = [1, 32, 32], strides = [1, 1, 1]} : vector<3x32x32xf32> to vector<1x32x32xf32>
    %317 = vector.shape_cast %316 : vector<1x32x32xf32> to vector<32x32xf32>
    %318 = arith.addf %315, %317 : vector<32x32xf32>
    %319 = vector.extract_strided_slice %313 {offsets = [2, 0, 0], sizes = [1, 32, 32], strides = [1, 1, 1]} : vector<3x32x32xf32> to vector<1x32x32xf32>
    %320 = vector.shape_cast %319 : vector<1x32x32xf32> to vector<32x32xf32>
    %321 = arith.addf %318, %320 : vector<32x32xf32>
    %cst_91 = arith.constant 0.204124153 : f32
    %322 = vector.broadcast %cst_91 : f32 to vector<32x32xf32>
    %323 = arith.mulf %321, %322 : vector<32x32xf32>
    %324 = arith.addf %323, %251 : vector<32x32xf32>
    %cst_92 = arith.constant dense<0xFF800000> : vector<32xf32>
    %325 = vector.multi_reduction <maximumf>, %324, %cst_92 [1] : vector<32x32xf32> to vector<32xf32>
    %326 = vector.shape_cast %325 : vector<32xf32> to vector<32x1xf32>
    %327 = vector.broadcast %326 : vector<32x1xf32> to vector<32x32xf32>
    %328 = arith.subf %324, %327 : vector<32x32xf32>
    %329 = math.exp %328 : vector<32x32xf32>
    %cst_93 = arith.constant dense<0.000000e+00> : vector<32xf32>
    %330 = vector.multi_reduction <add>, %329, %cst_93 [1] : vector<32x32xf32> to vector<32xf32>
    %331 = vector.shape_cast %330 : vector<32xf32> to vector<32x1xf32>
    %332 = tpu.reciprocal %331 {approx = true} : vector<32x1xf32> -> vector<32x1xf32>
    %333 = vector.broadcast %332 : vector<32x1xf32> to vector<32x32xf32>
    %334 = arith.mulf %329, %333 : vector<32x32xf32>
    %335 = vector.shape_cast %334 : vector<32x32xf32> to vector<1x32x32xf32>
    %336 = vector.shape_cast %335 : vector<1x32x32xf32> to vector<1x32x32xf32>
    %337 = vector.broadcast %336 : vector<1x32x32xf32> to vector<3x32x32xf32>
    %cst_94 = arith.constant dense<0.000000e+00> : vector<3x32x8xf32>
    %338 = tpu.matmul %337, %312, %cst_94 {dimension_numbers = #tpu.dot_dimension_numbers<[2], [1], [1], [2], [0, 0, 0, 1, 1, 2], [0], [0]>} : vector<3x32x32xf32>, vector<3x32x8xf32>, vector<3x32x8xf32> -> vector<3x32x8xf32>
    %339 = vector.extract_strided_slice %238 {offsets = [0, 0, 24], sizes = [3, 32, 8], strides = [1, 1, 1]} : vector<3x32x32xf32> to vector<3x32x8xf32>
    %340 = vector.extract_strided_slice %244 {offsets = [0, 0, 24], sizes = [3, 32, 8], strides = [1, 1, 1]} : vector<3x32x32xf32> to vector<3x32x8xf32>
    %341 = vector.extract_strided_slice %250 {offsets = [0, 0, 24], sizes = [3, 32, 8], strides = [1, 1, 1]} : vector<3x32x32xf32> to vector<3x32x8xf32>
    %cst_95 = arith.constant dense<0.000000e+00> : vector<3x32x32xf32>
    %342 = tpu.matmul %339, %340, %cst_95 {dimension_numbers = #tpu.dot_dimension_numbers<[2], [2], [1], [1], [0, 0, 0, 1, 1, 1], [0], [0]>} : vector<3x32x8xf32>, vector<3x32x8xf32>, vector<3x32x32xf32> -> vector<3x32x32xf32>
    %343 = vector.extract_strided_slice %342 {offsets = [0, 0, 0], sizes = [1, 32, 32], strides = [1, 1, 1]} : vector<3x32x32xf32> to vector<1x32x32xf32>
    %344 = vector.shape_cast %343 : vector<1x32x32xf32> to vector<32x32xf32>
    %345 = vector.extract_strided_slice %342 {offsets = [1, 0, 0], sizes = [1, 32, 32], strides = [1, 1, 1]} : vector<3x32x32xf32> to vector<1x32x32xf32>
    %346 = vector.shape_cast %345 : vector<1x32x32xf32> to vector<32x32xf32>
    %347 = arith.addf %344, %346 : vector<32x32xf32>
    %348 = vector.extract_strided_slice %342 {offsets = [2, 0, 0], sizes = [1, 32, 32], strides = [1, 1, 1]} : vector<3x32x32xf32> to vector<1x32x32xf32>
    %349 = vector.shape_cast %348 : vector<1x32x32xf32> to vector<32x32xf32>
    %350 = arith.addf %347, %349 : vector<32x32xf32>
    %cst_96 = arith.constant 0.204124153 : f32
    %351 = vector.broadcast %cst_96 : f32 to vector<32x32xf32>
    %352 = arith.mulf %350, %351 : vector<32x32xf32>
    %353 = arith.addf %352, %251 : vector<32x32xf32>
    %cst_97 = arith.constant dense<0xFF800000> : vector<32xf32>
    %354 = vector.multi_reduction <maximumf>, %353, %cst_97 [1] : vector<32x32xf32> to vector<32xf32>
    %355 = vector.shape_cast %354 : vector<32xf32> to vector<32x1xf32>
    %356 = vector.broadcast %355 : vector<32x1xf32> to vector<32x32xf32>
    %357 = arith.subf %353, %356 : vector<32x32xf32>
    %358 = math.exp %357 : vector<32x32xf32>
    %cst_98 = arith.constant dense<0.000000e+00> : vector<32xf32>
    %359 = vector.multi_reduction <add>, %358, %cst_98 [1] : vector<32x32xf32> to vector<32xf32>
    %360 = vector.shape_cast %359 : vector<32xf32> to vector<32x1xf32>
    %361 = tpu.reciprocal %360 {approx = true} : vector<32x1xf32> -> vector<32x1xf32>
    %362 = vector.broadcast %361 : vector<32x1xf32> to vector<32x32xf32>
    %363 = arith.mulf %358, %362 : vector<32x32xf32>
    %364 = vector.shape_cast %363 : vector<32x32xf32> to vector<1x32x32xf32>
    %365 = vector.shape_cast %364 : vector<1x32x32xf32> to vector<1x32x32xf32>
    %366 = vector.broadcast %365 : vector<1x32x32xf32> to vector<3x32x32xf32>
    %cst_99 = arith.constant dense<0.000000e+00> : vector<3x32x8xf32>
    %367 = tpu.matmul %366, %341, %cst_99 {dimension_numbers = #tpu.dot_dimension_numbers<[2], [1], [1], [2], [0, 0, 0, 1, 1, 2], [0], [0]>} : vector<3x32x32xf32>, vector<3x32x8xf32>, vector<3x32x8xf32> -> vector<3x32x8xf32>
    %368 = tpu.concatenate %280, %309, %338, %367 in 2 : vector<3x32x8xf32>, vector<3x32x8xf32>, vector<3x32x8xf32>, vector<3x32x8xf32> -> vector<3x32x32xf32>
    %369 = vector.shape_cast %368 : vector<3x32x32xf32> to vector<96x32xf32>
    %cst_100 = arith.constant dense<0.000000e+00> : vector<96x32xf32>
    %370 = tpu.matmul %369, %15, %cst_100 {dimension_numbers = #tpu.dot_dimension_numbers<[1], [0], [0], [1], [0, 0, 1, 1], [], []>} : vector<96x32xf32>, vector<32x32xf32>, vector<96x32xf32> -> vector<96x32xf32>
    %371 = vector.shape_cast %370 : vector<96x32xf32> to vector<3x32x32xf32>
    %372 = vector.shape_cast %33 : vector<3x32xf32> to vector<3x1x32xf32>
    %373 = vector.broadcast %372 : vector<3x1x32xf32> to vector<3x32x32xf32>
    %374 = arith.addf %371, %373 : vector<3x32x32xf32>
    %375 = arith.addf %232, %374 : vector<3x32x32xf32>
    %376 = vector.extract_strided_slice %375 {offsets = [0, 0, 0], sizes = [1, 32, 32], strides = [1, 1, 1]} : vector<3x32x32xf32> to vector<1x32x32xf32>
    %377 = vector.shape_cast %376 : vector<1x32x32xf32> to vector<32x32xf32>
    %378 = vector.extract_strided_slice %375 {offsets = [0, 0, 0], sizes = [1, 32, 32], strides = [1, 1, 1]} : vector<3x32x32xf32> to vector<1x32x32xf32>
    %379 = vector.shape_cast %378 : vector<1x32x32xf32> to vector<32x32xf32>
    %380 = arith.mulf %377, %379 : vector<32x32xf32>
    %381 = vector.extract_strided_slice %375 {offsets = [1, 0, 0], sizes = [1, 32, 32], strides = [1, 1, 1]} : vector<3x32x32xf32> to vector<1x32x32xf32>
    %382 = vector.shape_cast %381 : vector<1x32x32xf32> to vector<32x32xf32>
    %383 = vector.extract_strided_slice %375 {offsets = [1, 0, 0], sizes = [1, 32, 32], strides = [1, 1, 1]} : vector<3x32x32xf32> to vector<1x32x32xf32>
    %384 = vector.shape_cast %383 : vector<1x32x32xf32> to vector<32x32xf32>
    %385 = arith.mulf %382, %384 : vector<32x32xf32>
    %386 = arith.addf %380, %385 : vector<32x32xf32>
    %387 = vector.extract_strided_slice %375 {offsets = [2, 0, 0], sizes = [1, 32, 32], strides = [1, 1, 1]} : vector<3x32x32xf32> to vector<1x32x32xf32>
    %388 = vector.shape_cast %387 : vector<1x32x32xf32> to vector<32x32xf32>
    %389 = vector.extract_strided_slice %375 {offsets = [2, 0, 0], sizes = [1, 32, 32], strides = [1, 1, 1]} : vector<3x32x32xf32> to vector<1x32x32xf32>
    %390 = vector.shape_cast %389 : vector<1x32x32xf32> to vector<32x32xf32>
    %391 = arith.mulf %388, %390 : vector<32x32xf32>
    %392 = arith.addf %386, %391 : vector<32x32xf32>
    %393 = math.sqrt %392 : vector<32x32xf32>
    %cst_101 = arith.constant 9.99999997E-7 : f32
    %394 = vector.broadcast %cst_101 : f32 to vector<32x32xf32>
    %395 = arith.addf %393, %394 : vector<32x32xf32>
    %cst_102 = arith.constant dense<0.000000e+00> : vector<32xf32>
    %396 = vector.multi_reduction <add>, %395, %cst_102 [1] : vector<32x32xf32> to vector<32xf32>
    %397 = vector.shape_cast %396 : vector<32xf32> to vector<32x1xf32>
    %cst_103 = arith.constant 3.200000e+01 : f32
    %398 = vector.broadcast %cst_103 : f32 to vector<32x1xf32>
    %399 = arith.divf %397, %398 : vector<32x1xf32>
    %400 = vector.broadcast %399 : vector<32x1xf32> to vector<32x32xf32>
    %401 = arith.subf %395, %400 : vector<32x32xf32>
    %402 = arith.mulf %401, %401 : vector<32x32xf32>
    %cst_104 = arith.constant dense<0.000000e+00> : vector<32xf32>
    %403 = vector.multi_reduction <add>, %402, %cst_104 [1] : vector<32x32xf32> to vector<32xf32>
    %404 = vector.shape_cast %403 : vector<32xf32> to vector<32x1xf32>
    %cst_105 = arith.constant 3.200000e+01 : f32
    %405 = vector.broadcast %cst_105 : f32 to vector<32x1xf32>
    %406 = arith.divf %404, %405 : vector<32x1xf32>
    %407 = vector.broadcast %399 : vector<32x1xf32> to vector<32x32xf32>
    %408 = arith.subf %395, %407 : vector<32x32xf32>
    %cst_106 = arith.constant 9.99999974E-6 : f32
    %409 = vector.broadcast %cst_106 : f32 to vector<32x1xf32>
    %410 = arith.addf %406, %409 : vector<32x1xf32>
    %411 = math.rsqrt %410 : vector<32x1xf32>
    %412 = vector.broadcast %411 : vector<32x1xf32> to vector<32x32xf32>
    %413 = arith.mulf %408, %412 : vector<32x32xf32>
    %414 = vector.extract_strided_slice %43 {offsets = [0, 0], sizes = [1, 32], strides = [1, 1]} : vector<2x32xf32> to vector<1x32xf32>
    %415 = vector.broadcast %414 : vector<1x32xf32> to vector<32x32xf32>
    %416 = arith.mulf %413, %415 : vector<32x32xf32>
    %417 = vector.extract_strided_slice %43 {offsets = [1, 0], sizes = [1, 32], strides = [1, 1]} : vector<2x32xf32> to vector<1x32xf32>
    %418 = vector.broadcast %417 : vector<1x32xf32> to vector<32x32xf32>
    %419 = arith.addf %416, %418 : vector<32x32xf32>
    %420 = tpu.reciprocal %395 {approx = true} : vector<32x32xf32> -> vector<32x32xf32>
    %421 = arith.mulf %419, %420 : vector<32x32xf32>
    %422 = vector.shape_cast %421 : vector<32x32xf32> to vector<1x32x32xf32>
    %423 = vector.broadcast %422 : vector<1x32x32xf32> to vector<3x32x32xf32>
    %424 = arith.mulf %375, %423 : vector<3x32x32xf32>
    %425 = vector.shape_cast %424 : vector<3x32x32xf32> to vector<96x32xf32>
    %cst_107 = arith.constant dense<0.000000e+00> : vector<96x32xf32>
    %426 = tpu.matmul %425, %17, %cst_107 {dimension_numbers = #tpu.dot_dimension_numbers<[1], [0], [0], [1], [0, 0, 1, 1], [], []>} : vector<96x32xf32>, vector<32x32xf32>, vector<96x32xf32> -> vector<96x32xf32>
    %427 = vector.shape_cast %426 : vector<96x32xf32> to vector<3x32x32xf32>
    %428 = vector.shape_cast %35 : vector<3x32xf32> to vector<3x1x32xf32>
    %429 = vector.broadcast %428 : vector<3x1x32xf32> to vector<3x32x32xf32>
    %430 = arith.addf %427, %429 : vector<3x32x32xf32>
    %431 = vector.shape_cast %430 : vector<3x32x32xf32> to vector<96x32xf32>
    %cst_108 = arith.constant dense<0.000000e+00> : vector<96x32xf32>
    %432 = tpu.matmul %431, %19, %cst_108 {dimension_numbers = #tpu.dot_dimension_numbers<[1], [0], [0], [1], [0, 0, 1, 1], [], []>} : vector<96x32xf32>, vector<32x32xf32>, vector<96x32xf32> -> vector<96x32xf32>
    %433 = vector.shape_cast %432 : vector<96x32xf32> to vector<3x32x32xf32>
    %434 = vector.extract_strided_slice %430 {offsets = [0, 0, 0], sizes = [1, 32, 32], strides = [1, 1, 1]} : vector<3x32x32xf32> to vector<1x32x32xf32>
    %435 = vector.shape_cast %434 : vector<1x32x32xf32> to vector<32x32xf32>
    %436 = vector.extract_strided_slice %433 {offsets = [0, 0, 0], sizes = [1, 32, 32], strides = [1, 1, 1]} : vector<3x32x32xf32> to vector<1x32x32xf32>
    %437 = vector.shape_cast %436 : vector<1x32x32xf32> to vector<32x32xf32>
    %438 = arith.mulf %435, %437 : vector<32x32xf32>
    %439 = vector.extract_strided_slice %430 {offsets = [1, 0, 0], sizes = [1, 32, 32], strides = [1, 1, 1]} : vector<3x32x32xf32> to vector<1x32x32xf32>
    %440 = vector.shape_cast %439 : vector<1x32x32xf32> to vector<32x32xf32>
    %441 = vector.extract_strided_slice %433 {offsets = [1, 0, 0], sizes = [1, 32, 32], strides = [1, 1, 1]} : vector<3x32x32xf32> to vector<1x32x32xf32>
    %442 = vector.shape_cast %441 : vector<1x32x32xf32> to vector<32x32xf32>
    %443 = arith.mulf %440, %442 : vector<32x32xf32>
    %444 = arith.addf %438, %443 : vector<32x32xf32>
    %445 = vector.extract_strided_slice %430 {offsets = [2, 0, 0], sizes = [1, 32, 32], strides = [1, 1, 1]} : vector<3x32x32xf32> to vector<1x32x32xf32>
    %446 = vector.shape_cast %445 : vector<1x32x32xf32> to vector<32x32xf32>
    %447 = vector.extract_strided_slice %433 {offsets = [2, 0, 0], sizes = [1, 32, 32], strides = [1, 1, 1]} : vector<3x32x32xf32> to vector<1x32x32xf32>
    %448 = vector.shape_cast %447 : vector<1x32x32xf32> to vector<32x32xf32>
    %449 = arith.mulf %446, %448 : vector<32x32xf32>
    %450 = arith.addf %444, %449 : vector<32x32xf32>
    %451 = vector.extract_strided_slice %433 {offsets = [0, 0, 0], sizes = [1, 32, 32], strides = [1, 1, 1]} : vector<3x32x32xf32> to vector<1x32x32xf32>
    %452 = vector.shape_cast %451 : vector<1x32x32xf32> to vector<32x32xf32>
    %453 = vector.extract_strided_slice %433 {offsets = [0, 0, 0], sizes = [1, 32, 32], strides = [1, 1, 1]} : vector<3x32x32xf32> to vector<1x32x32xf32>
    %454 = vector.shape_cast %453 : vector<1x32x32xf32> to vector<32x32xf32>
    %455 = arith.mulf %452, %454 : vector<32x32xf32>
    %456 = vector.extract_strided_slice %433 {offsets = [1, 0, 0], sizes = [1, 32, 32], strides = [1, 1, 1]} : vector<3x32x32xf32> to vector<1x32x32xf32>
    %457 = vector.shape_cast %456 : vector<1x32x32xf32> to vector<32x32xf32>
    %458 = vector.extract_strided_slice %433 {offsets = [1, 0, 0], sizes = [1, 32, 32], strides = [1, 1, 1]} : vector<3x32x32xf32> to vector<1x32x32xf32>
    %459 = vector.shape_cast %458 : vector<1x32x32xf32> to vector<32x32xf32>
    %460 = arith.mulf %457, %459 : vector<32x32xf32>
    %461 = arith.addf %455, %460 : vector<32x32xf32>
    %462 = vector.extract_strided_slice %433 {offsets = [2, 0, 0], sizes = [1, 32, 32], strides = [1, 1, 1]} : vector<3x32x32xf32> to vector<1x32x32xf32>
    %463 = vector.shape_cast %462 : vector<1x32x32xf32> to vector<32x32xf32>
    %464 = vector.extract_strided_slice %433 {offsets = [2, 0, 0], sizes = [1, 32, 32], strides = [1, 1, 1]} : vector<3x32x32xf32> to vector<1x32x32xf32>
    %465 = vector.shape_cast %464 : vector<1x32x32xf32> to vector<32x32xf32>
    %466 = arith.mulf %463, %465 : vector<32x32xf32>
    %467 = arith.addf %461, %466 : vector<32x32xf32>
    %cst_109 = arith.constant 9.99999997E-7 : f32
    %468 = vector.broadcast %cst_109 : f32 to vector<32x32xf32>
    %469 = arith.addf %467, %468 : vector<32x32xf32>
    %470 = tpu.reciprocal %469 {approx = true} : vector<32x32xf32> -> vector<32x32xf32>
    %471 = arith.mulf %450, %470 : vector<32x32xf32>
    %472 = vector.shape_cast %471 : vector<32x32xf32> to vector<1x32x32xf32>
    %473 = vector.broadcast %472 : vector<1x32x32xf32> to vector<3x32x32xf32>
    %474 = arith.mulf %473, %433 : vector<3x32x32xf32>
    %475 = arith.subf %430, %474 : vector<3x32x32xf32>
    %cst_110 = arith.constant 0.000000e+00 : f32
    %476 = vector.broadcast %cst_110 : f32 to vector<32x32xf32>
    %477 = arith.cmpf oge, %450, %476 : vector<32x32xf32>
    %478 = vector.shape_cast %477 : vector<32x32xi1> to vector<1x32x32xi1>
    %479 = vector.shape_cast %478 : vector<1x32x32xi1> to vector<1x32x32xi1>
    %480 = vector.broadcast %479 : vector<1x32x32xi1> to vector<3x32x32xi1>
    %481 = arith.select %480, %430, %475 : vector<3x32x32xi1>, vector<3x32x32xf32>
    %cst_111 = arith.constant 2.000000e-01 : f32
    %482 = vector.broadcast %cst_111 : f32 to vector<3x32x32xf32>
    %483 = arith.mulf %482, %430 : vector<3x32x32xf32>
    %cst_112 = arith.constant 8.000000e-01 : f32
    %484 = vector.broadcast %cst_112 : f32 to vector<3x32x32xf32>
    %485 = arith.mulf %484, %481 : vector<3x32x32xf32>
    %486 = arith.addf %483, %485 : vector<3x32x32xf32>
    %487 = vector.shape_cast %486 : vector<3x32x32xf32> to vector<96x32xf32>
    %cst_113 = arith.constant dense<0.000000e+00> : vector<96x32xf32>
    %488 = tpu.matmul %487, %21, %cst_113 {dimension_numbers = #tpu.dot_dimension_numbers<[1], [0], [0], [1], [0, 0, 1, 1], [], []>} : vector<96x32xf32>, vector<32x32xf32>, vector<96x32xf32> -> vector<96x32xf32>
    %489 = vector.shape_cast %488 : vector<96x32xf32> to vector<3x32x32xf32>
    %490 = vector.shape_cast %37 : vector<3x32xf32> to vector<3x1x32xf32>
    %491 = vector.broadcast %490 : vector<3x1x32xf32> to vector<3x32x32xf32>
    %492 = arith.addf %489, %491 : vector<3x32x32xf32>
    %493 = arith.addf %424, %492 : vector<3x32x32xf32>
    %494 = vector.extract_strided_slice %493 {offsets = [0, 0, 0], sizes = [1, 32, 32], strides = [1, 1, 1]} : vector<3x32x32xf32> to vector<1x32x32xf32>
    %495 = vector.shape_cast %494 : vector<1x32x32xf32> to vector<32x32xf32>
    %496 = vector.extract_strided_slice %493 {offsets = [0, 0, 0], sizes = [1, 32, 32], strides = [1, 1, 1]} : vector<3x32x32xf32> to vector<1x32x32xf32>
    %497 = vector.shape_cast %496 : vector<1x32x32xf32> to vector<32x32xf32>
    %498 = arith.mulf %495, %497 : vector<32x32xf32>
    %499 = vector.extract_strided_slice %493 {offsets = [1, 0, 0], sizes = [1, 32, 32], strides = [1, 1, 1]} : vector<3x32x32xf32> to vector<1x32x32xf32>
    %500 = vector.shape_cast %499 : vector<1x32x32xf32> to vector<32x32xf32>
    %501 = vector.extract_strided_slice %493 {offsets = [1, 0, 0], sizes = [1, 32, 32], strides = [1, 1, 1]} : vector<3x32x32xf32> to vector<1x32x32xf32>
    %502 = vector.shape_cast %501 : vector<1x32x32xf32> to vector<32x32xf32>
    %503 = arith.mulf %500, %502 : vector<32x32xf32>
    %504 = arith.addf %498, %503 : vector<32x32xf32>
    %505 = vector.extract_strided_slice %493 {offsets = [2, 0, 0], sizes = [1, 32, 32], strides = [1, 1, 1]} : vector<3x32x32xf32> to vector<1x32x32xf32>
    %506 = vector.shape_cast %505 : vector<1x32x32xf32> to vector<32x32xf32>
    %507 = vector.extract_strided_slice %493 {offsets = [2, 0, 0], sizes = [1, 32, 32], strides = [1, 1, 1]} : vector<3x32x32xf32> to vector<1x32x32xf32>
    %508 = vector.shape_cast %507 : vector<1x32x32xf32> to vector<32x32xf32>
    %509 = arith.mulf %506, %508 : vector<32x32xf32>
    %510 = arith.addf %504, %509 : vector<32x32xf32>
    %511 = math.sqrt %510 : vector<32x32xf32>
    %cst_114 = arith.constant 9.99999997E-7 : f32
    %512 = vector.broadcast %cst_114 : f32 to vector<32x32xf32>
    %513 = arith.addf %511, %512 : vector<32x32xf32>
    %cst_115 = arith.constant dense<0.000000e+00> : vector<32xf32>
    %514 = vector.multi_reduction <add>, %513, %cst_115 [1] : vector<32x32xf32> to vector<32xf32>
    %515 = vector.shape_cast %514 : vector<32xf32> to vector<32x1xf32>
    %cst_116 = arith.constant 3.200000e+01 : f32
    %516 = vector.broadcast %cst_116 : f32 to vector<32x1xf32>
    %517 = arith.divf %515, %516 : vector<32x1xf32>
    %518 = vector.broadcast %517 : vector<32x1xf32> to vector<32x32xf32>
    %519 = arith.subf %513, %518 : vector<32x32xf32>
    %520 = arith.mulf %519, %519 : vector<32x32xf32>
    %cst_117 = arith.constant dense<0.000000e+00> : vector<32xf32>
    %521 = vector.multi_reduction <add>, %520, %cst_117 [1] : vector<32x32xf32> to vector<32xf32>
    %522 = vector.shape_cast %521 : vector<32xf32> to vector<32x1xf32>
    %cst_118 = arith.constant 3.200000e+01 : f32
    %523 = vector.broadcast %cst_118 : f32 to vector<32x1xf32>
    %524 = arith.divf %522, %523 : vector<32x1xf32>
    %525 = vector.broadcast %517 : vector<32x1xf32> to vector<32x32xf32>
    %526 = arith.subf %513, %525 : vector<32x32xf32>
    %cst_119 = arith.constant 9.99999974E-6 : f32
    %527 = vector.broadcast %cst_119 : f32 to vector<32x1xf32>
    %528 = arith.addf %524, %527 : vector<32x1xf32>
    %529 = math.rsqrt %528 : vector<32x1xf32>
    %530 = vector.broadcast %529 : vector<32x1xf32> to vector<32x32xf32>
    %531 = arith.mulf %526, %530 : vector<32x32xf32>
    %532 = vector.extract_strided_slice %45 {offsets = [0, 0], sizes = [1, 32], strides = [1, 1]} : vector<2x32xf32> to vector<1x32xf32>
    %533 = vector.broadcast %532 : vector<1x32xf32> to vector<32x32xf32>
    %534 = arith.mulf %531, %533 : vector<32x32xf32>
    %535 = vector.extract_strided_slice %45 {offsets = [1, 0], sizes = [1, 32], strides = [1, 1]} : vector<2x32xf32> to vector<1x32xf32>
    %536 = vector.broadcast %535 : vector<1x32xf32> to vector<32x32xf32>
    %537 = arith.addf %534, %536 : vector<32x32xf32>
    %538 = tpu.reciprocal %513 {approx = true} : vector<32x32xf32> -> vector<32x32xf32>
    %539 = arith.mulf %537, %538 : vector<32x32xf32>
    %540 = vector.shape_cast %539 : vector<32x32xf32> to vector<1x32x32xf32>
    %541 = vector.broadcast %540 : vector<1x32x32xf32> to vector<3x32x32xf32>
    %542 = arith.mulf %493, %541 : vector<3x32x32xf32>
    %c0_120 = arith.constant 0 : index
    %c0_121 = arith.constant 0 : index
    %543 = vector.load %arg8[%c0_120, %c0_121] : memref<32x3xf32, #tpu.memory_space<vmem>>, vector<32x3xf32>
    %c0_122 = arith.constant 0 : index
    %c0_123 = arith.constant 0 : index
    %544 = vector.load %arg9[%c0_122, %c0_123] : memref<3x3xf32, #tpu.memory_space<vmem>>, vector<3x3xf32>
    %545 = vector.shape_cast %542 : vector<3x32x32xf32> to vector<96x32xf32>
    %cst_124 = arith.constant dense<0.000000e+00> : vector<96x3xf32>
    %546 = tpu.matmul %545, %543, %cst_124 {dimension_numbers = #tpu.dot_dimension_numbers<[1], [0], [0], [1], [0, 0, 1, 1], [], []>} : vector<96x32xf32>, vector<32x3xf32>, vector<96x3xf32> -> vector<96x3xf32>
    %547 = vector.shape_cast %546 : vector<96x3xf32> to vector<3x32x3xf32>
    %548 = vector.shape_cast %544 : vector<3x3xf32> to vector<3x1x3xf32>
    %549 = vector.broadcast %548 : vector<3x1x3xf32> to vector<3x32x3xf32>
    %550 = arith.addf %547, %549 : vector<3x32x3xf32>
    %c0_125 = arith.constant 0 : index
    %c0_126 = arith.constant 0 : index
    %551 = vector.load %arg10[%c0_125, %c0_126] : memref<3x3xf32, #tpu.memory_space<vmem>>, vector<3x3xf32>
    %552 = vector.shape_cast %550 : vector<3x32x3xf32> to vector<96x3xf32>
    %cst_127 = arith.constant dense<0.000000e+00> : vector<96x3xf32>
    %553 = tpu.matmul %552, %551, %cst_127 {dimension_numbers = #tpu.dot_dimension_numbers<[1], [0], [0], [1], [0, 0, 1, 1], [], []>} : vector<96x3xf32>, vector<3x3xf32>, vector<96x3xf32> -> vector<96x3xf32>
    %554 = vector.shape_cast %553 : vector<96x3xf32> to vector<3x32x3xf32>
    %555 = vector.extract_strided_slice %550 {offsets = [0, 0, 0], sizes = [1, 32, 3], strides = [1, 1, 1]} : vector<3x32x3xf32> to vector<1x32x3xf32>
    %556 = vector.shape_cast %555 : vector<1x32x3xf32> to vector<32x3xf32>
    %557 = vector.extract_strided_slice %554 {offsets = [0, 0, 0], sizes = [1, 32, 3], strides = [1, 1, 1]} : vector<3x32x3xf32> to vector<1x32x3xf32>
    %558 = vector.shape_cast %557 : vector<1x32x3xf32> to vector<32x3xf32>
    %559 = arith.mulf %556, %558 : vector<32x3xf32>
    %560 = vector.extract_strided_slice %550 {offsets = [1, 0, 0], sizes = [1, 32, 3], strides = [1, 1, 1]} : vector<3x32x3xf32> to vector<1x32x3xf32>
    %561 = vector.shape_cast %560 : vector<1x32x3xf32> to vector<32x3xf32>
    %562 = vector.extract_strided_slice %554 {offsets = [1, 0, 0], sizes = [1, 32, 3], strides = [1, 1, 1]} : vector<3x32x3xf32> to vector<1x32x3xf32>
    %563 = vector.shape_cast %562 : vector<1x32x3xf32> to vector<32x3xf32>
    %564 = arith.mulf %561, %563 : vector<32x3xf32>
    %565 = arith.addf %559, %564 : vector<32x3xf32>
    %566 = vector.extract_strided_slice %550 {offsets = [2, 0, 0], sizes = [1, 32, 3], strides = [1, 1, 1]} : vector<3x32x3xf32> to vector<1x32x3xf32>
    %567 = vector.shape_cast %566 : vector<1x32x3xf32> to vector<32x3xf32>
    %568 = vector.extract_strided_slice %554 {offsets = [2, 0, 0], sizes = [1, 32, 3], strides = [1, 1, 1]} : vector<3x32x3xf32> to vector<1x32x3xf32>
    %569 = vector.shape_cast %568 : vector<1x32x3xf32> to vector<32x3xf32>
    %570 = arith.mulf %567, %569 : vector<32x3xf32>
    %571 = arith.addf %565, %570 : vector<32x3xf32>
    %572 = vector.extract_strided_slice %554 {offsets = [0, 0, 0], sizes = [1, 32, 3], strides = [1, 1, 1]} : vector<3x32x3xf32> to vector<1x32x3xf32>
    %573 = vector.shape_cast %572 : vector<1x32x3xf32> to vector<32x3xf32>
    %574 = vector.extract_strided_slice %554 {offsets = [0, 0, 0], sizes = [1, 32, 3], strides = [1, 1, 1]} : vector<3x32x3xf32> to vector<1x32x3xf32>
    %575 = vector.shape_cast %574 : vector<1x32x3xf32> to vector<32x3xf32>
    %576 = arith.mulf %573, %575 : vector<32x3xf32>
    %577 = vector.extract_strided_slice %554 {offsets = [1, 0, 0], sizes = [1, 32, 3], strides = [1, 1, 1]} : vector<3x32x3xf32> to vector<1x32x3xf32>
    %578 = vector.shape_cast %577 : vector<1x32x3xf32> to vector<32x3xf32>
    %579 = vector.extract_strided_slice %554 {offsets = [1, 0, 0], sizes = [1, 32, 3], strides = [1, 1, 1]} : vector<3x32x3xf32> to vector<1x32x3xf32>
    %580 = vector.shape_cast %579 : vector<1x32x3xf32> to vector<32x3xf32>
    %581 = arith.mulf %578, %580 : vector<32x3xf32>
    %582 = arith.addf %576, %581 : vector<32x3xf32>
    %583 = vector.extract_strided_slice %554 {offsets = [2, 0, 0], sizes = [1, 32, 3], strides = [1, 1, 1]} : vector<3x32x3xf32> to vector<1x32x3xf32>
    %584 = vector.shape_cast %583 : vector<1x32x3xf32> to vector<32x3xf32>
    %585 = vector.extract_strided_slice %554 {offsets = [2, 0, 0], sizes = [1, 32, 3], strides = [1, 1, 1]} : vector<3x32x3xf32> to vector<1x32x3xf32>
    %586 = vector.shape_cast %585 : vector<1x32x3xf32> to vector<32x3xf32>
    %587 = arith.mulf %584, %586 : vector<32x3xf32>
    %588 = arith.addf %582, %587 : vector<32x3xf32>
    %cst_128 = arith.constant 9.99999997E-7 : f32
    %589 = vector.broadcast %cst_128 : f32 to vector<32x3xf32>
    %590 = arith.addf %588, %589 : vector<32x3xf32>
    %591 = tpu.reciprocal %590 {approx = true} : vector<32x3xf32> -> vector<32x3xf32>
    %592 = arith.mulf %571, %591 : vector<32x3xf32>
    %593 = vector.shape_cast %592 : vector<32x3xf32> to vector<1x32x3xf32>
    %594 = vector.broadcast %593 : vector<1x32x3xf32> to vector<3x32x3xf32>
    %595 = arith.mulf %594, %554 : vector<3x32x3xf32>
    %596 = arith.subf %550, %595 : vector<3x32x3xf32>
    %cst_129 = arith.constant 0.000000e+00 : f32
    %597 = vector.broadcast %cst_129 : f32 to vector<32x3xf32>
    %598 = arith.cmpf oge, %571, %597 : vector<32x3xf32>
    %599 = vector.shape_cast %598 : vector<32x3xi1> to vector<1x32x3xi1>
    %600 = vector.shape_cast %599 : vector<1x32x3xi1> to vector<1x32x3xi1>
    %601 = vector.broadcast %600 : vector<1x32x3xi1> to vector<3x32x3xi1>
    %602 = arith.select %601, %550, %596 : vector<3x32x3xi1>, vector<3x32x3xf32>
    %cst_130 = arith.constant 2.000000e-01 : f32
    %603 = vector.broadcast %cst_130 : f32 to vector<3x32x3xf32>
    %604 = arith.mulf %603, %550 : vector<3x32x3xf32>
    %cst_131 = arith.constant 8.000000e-01 : f32
    %605 = vector.broadcast %cst_131 : f32 to vector<3x32x3xf32>
    %606 = arith.mulf %605, %602 : vector<3x32x3xf32>
    %607 = arith.addf %604, %606 : vector<3x32x3xf32>
    %608 = vector.extract_strided_slice %607 {offsets = [0, 0, 0], sizes = [3, 32, 1], strides = [1, 1, 1]} : vector<3x32x3xf32> to vector<3x32x1xf32>
    %609 = vector.shape_cast %608 : vector<3x32x1xf32> to vector<3x32x1xf32>
    %610 = vector.broadcast %609 : vector<3x32x1xf32> to vector<3x32x32xf32>
    %611 = vector.extract_strided_slice %542 {offsets = [0, 0, 0], sizes = [1, 32, 32], strides = [1, 1, 1]} : vector<3x32x32xf32> to vector<1x32x32xf32>
    %612 = vector.shape_cast %611 : vector<1x32x32xf32> to vector<32x32xf32>
    %613 = vector.extract_strided_slice %610 {offsets = [0, 0, 0], sizes = [1, 32, 32], strides = [1, 1, 1]} : vector<3x32x32xf32> to vector<1x32x32xf32>
    %614 = vector.shape_cast %613 : vector<1x32x32xf32> to vector<32x32xf32>
    %615 = arith.mulf %612, %614 : vector<32x32xf32>
    %616 = vector.extract_strided_slice %542 {offsets = [1, 0, 0], sizes = [1, 32, 32], strides = [1, 1, 1]} : vector<3x32x32xf32> to vector<1x32x32xf32>
    %617 = vector.shape_cast %616 : vector<1x32x32xf32> to vector<32x32xf32>
    %618 = vector.extract_strided_slice %610 {offsets = [1, 0, 0], sizes = [1, 32, 32], strides = [1, 1, 1]} : vector<3x32x32xf32> to vector<1x32x32xf32>
    %619 = vector.shape_cast %618 : vector<1x32x32xf32> to vector<32x32xf32>
    %620 = arith.mulf %617, %619 : vector<32x32xf32>
    %621 = arith.addf %615, %620 : vector<32x32xf32>
    %622 = vector.extract_strided_slice %542 {offsets = [2, 0, 0], sizes = [1, 32, 32], strides = [1, 1, 1]} : vector<3x32x32xf32> to vector<1x32x32xf32>
    %623 = vector.shape_cast %622 : vector<1x32x32xf32> to vector<32x32xf32>
    %624 = vector.extract_strided_slice %610 {offsets = [2, 0, 0], sizes = [1, 32, 32], strides = [1, 1, 1]} : vector<3x32x32xf32> to vector<1x32x32xf32>
    %625 = vector.shape_cast %624 : vector<1x32x32xf32> to vector<32x32xf32>
    %626 = arith.mulf %623, %625 : vector<32x32xf32>
    %627 = arith.addf %621, %626 : vector<32x32xf32>
    %628 = vector.extract_strided_slice %607 {offsets = [0, 0, 1], sizes = [3, 32, 1], strides = [1, 1, 1]} : vector<3x32x3xf32> to vector<3x32x1xf32>
    %629 = vector.shape_cast %628 : vector<3x32x1xf32> to vector<3x32x1xf32>
    %630 = vector.broadcast %629 : vector<3x32x1xf32> to vector<3x32x32xf32>
    %631 = vector.extract_strided_slice %542 {offsets = [0, 0, 0], sizes = [1, 32, 32], strides = [1, 1, 1]} : vector<3x32x32xf32> to vector<1x32x32xf32>
    %632 = vector.shape_cast %631 : vector<1x32x32xf32> to vector<32x32xf32>
    %633 = vector.extract_strided_slice %630 {offsets = [0, 0, 0], sizes = [1, 32, 32], strides = [1, 1, 1]} : vector<3x32x32xf32> to vector<1x32x32xf32>
    %634 = vector.shape_cast %633 : vector<1x32x32xf32> to vector<32x32xf32>
    %635 = arith.mulf %632, %634 : vector<32x32xf32>
    %636 = vector.extract_strided_slice %542 {offsets = [1, 0, 0], sizes = [1, 32, 32], strides = [1, 1, 1]} : vector<3x32x32xf32> to vector<1x32x32xf32>
    %637 = vector.shape_cast %636 : vector<1x32x32xf32> to vector<32x32xf32>
    %638 = vector.extract_strided_slice %630 {offsets = [1, 0, 0], sizes = [1, 32, 32], strides = [1, 1, 1]} : vector<3x32x32xf32> to vector<1x32x32xf32>
    %639 = vector.shape_cast %638 : vector<1x32x32xf32> to vector<32x32xf32>
    %640 = arith.mulf %637, %639 : vector<32x32xf32>
    %641 = arith.addf %635, %640 : vector<32x32xf32>
    %642 = vector.extract_strided_slice %542 {offsets = [2, 0, 0], sizes = [1, 32, 32], strides = [1, 1, 1]} : vector<3x32x32xf32> to vector<1x32x32xf32>
    %643 = vector.shape_cast %642 : vector<1x32x32xf32> to vector<32x32xf32>
    %644 = vector.extract_strided_slice %630 {offsets = [2, 0, 0], sizes = [1, 32, 32], strides = [1, 1, 1]} : vector<3x32x32xf32> to vector<1x32x32xf32>
    %645 = vector.shape_cast %644 : vector<1x32x32xf32> to vector<32x32xf32>
    %646 = arith.mulf %643, %645 : vector<32x32xf32>
    %647 = arith.addf %641, %646 : vector<32x32xf32>
    %648 = vector.extract_strided_slice %607 {offsets = [0, 0, 2], sizes = [3, 32, 1], strides = [1, 1, 1]} : vector<3x32x3xf32> to vector<3x32x1xf32>
    %649 = vector.shape_cast %648 : vector<3x32x1xf32> to vector<3x32x1xf32>
    %650 = vector.broadcast %649 : vector<3x32x1xf32> to vector<3x32x32xf32>
    %651 = vector.extract_strided_slice %542 {offsets = [0, 0, 0], sizes = [1, 32, 32], strides = [1, 1, 1]} : vector<3x32x32xf32> to vector<1x32x32xf32>
    %652 = vector.shape_cast %651 : vector<1x32x32xf32> to vector<32x32xf32>
    %653 = vector.extract_strided_slice %650 {offsets = [0, 0, 0], sizes = [1, 32, 32], strides = [1, 1, 1]} : vector<3x32x32xf32> to vector<1x32x32xf32>
    %654 = vector.shape_cast %653 : vector<1x32x32xf32> to vector<32x32xf32>
    %655 = arith.mulf %652, %654 : vector<32x32xf32>
    %656 = vector.extract_strided_slice %542 {offsets = [1, 0, 0], sizes = [1, 32, 32], strides = [1, 1, 1]} : vector<3x32x32xf32> to vector<1x32x32xf32>
    %657 = vector.shape_cast %656 : vector<1x32x32xf32> to vector<32x32xf32>
    %658 = vector.extract_strided_slice %650 {offsets = [1, 0, 0], sizes = [1, 32, 32], strides = [1, 1, 1]} : vector<3x32x32xf32> to vector<1x32x32xf32>
    %659 = vector.shape_cast %658 : vector<1x32x32xf32> to vector<32x32xf32>
    %660 = arith.mulf %657, %659 : vector<32x32xf32>
    %661 = arith.addf %655, %660 : vector<32x32xf32>
    %662 = vector.extract_strided_slice %542 {offsets = [2, 0, 0], sizes = [1, 32, 32], strides = [1, 1, 1]} : vector<3x32x32xf32> to vector<1x32x32xf32>
    %663 = vector.shape_cast %662 : vector<1x32x32xf32> to vector<32x32xf32>
    %664 = vector.extract_strided_slice %650 {offsets = [2, 0, 0], sizes = [1, 32, 32], strides = [1, 1, 1]} : vector<3x32x32xf32> to vector<1x32x32xf32>
    %665 = vector.shape_cast %664 : vector<1x32x32xf32> to vector<32x32xf32>
    %666 = arith.mulf %663, %665 : vector<32x32xf32>
    %667 = arith.addf %661, %666 : vector<32x32xf32>
    %668 = tpu.concatenate %627, %647, %667 in 1 : vector<32x32xf32>, vector<32x32xf32>, vector<32x32xf32> -> vector<32x96xf32>
    %c0_132 = arith.constant 0 : index
    %c0_133 = arith.constant 0 : index
    %669 = vector.load %arg3[%c0_132, %c0_133] : memref<2x32xf32, #tpu.memory_space<vmem>>, vector<2x32xf32>
    %cst_134 = arith.constant dense<0.000000e+00> : vector<2x96xf32>
    %670 = tpu.matmul %669, %668, %cst_134 {dimension_numbers = #tpu.dot_dimension_numbers<[1], [0], [0], [1], [0, 0, 1, 1], [], []>} : vector<2x32xf32>, vector<32x96xf32>, vector<2x96xf32> -> vector<2x96xf32>
    %c0_135 = arith.constant 0 : index
    %c0_136 = arith.constant 0 : index
    %c0_137 = arith.constant 0 : index
    %671 = vector.load %arg11[%c0_135, %c0_136, %c0_137] : memref<1x2x96xf32, #tpu.memory_space<vmem>>, vector<1x2x96xf32>
    %672 = vector.shape_cast %671 : vector<1x2x96xf32> to vector<2x96xf32>
    %673 = vector.shape_cast %670 : vector<2x96xf32> to vector<1x2x96xf32>
    tpu.vector_store %arg11[%c0_135, %c0_136, %c0_137], %673 {strides = array<i32>} : memref<1x2x96xf32, #tpu.memory_space<vmem>>, vector<1x2x96xf32>,
    return
  }
  func.func @transform_0(%arg0: i32) -> (i32, i32, i32, i32) {
    %c0_i32 = arith.constant 0 : i32
    %c0_i32_0 = arith.constant 0 : i32
    %c0_i32_1 = arith.constant 0 : i32
    %c0_i32_2 = arith.constant 0 : i32
    return %c0_i32, %arg0, %c0_i32_0, %c0_i32_1 : i32, i32, i32, i32
  }
  func.func @transform_1(%arg0: i32) -> (i32, i32) {
    %c0_i32 = arith.constant 0 : i32
    %c0_i32_0 = arith.constant 0 : i32
    %c0_i32_1 = arith.constant 0 : i32
    return %c0_i32, %c0_i32_0 : i32, i32
  }
  func.func @transform_2(%arg0: i32) -> (i32, i32) {
    %c0_i32 = arith.constant 0 : i32
    %c0_i32_0 = arith.constant 0 : i32
    %c0_i32_1 = arith.constant 0 : i32
    return %c0_i32, %c0_i32_0 : i32, i32
  }
  func.func @transform_3(%arg0: i32) -> (i32, i32) {
    %c0_i32 = arith.constant 0 : i32
    %c0_i32_0 = arith.constant 0 : i32
    %c0_i32_1 = arith.constant 0 : i32
    return %c0_i32, %c0_i32_0 : i32, i32
  }
  func.func @transform_4(%arg0: i32) -> (i32, i32, i32) {
    %c0_i32 = arith.constant 0 : i32
    %c0_i32_0 = arith.constant 0 : i32
    %c0_i32_1 = arith.constant 0 : i32
    %c0_i32_2 = arith.constant 0 : i32
    return %c0_i32, %c0_i32_0, %c0_i32_1 : i32, i32, i32
  }
  func.func @transform_5(%arg0: i32) -> (i32, i32, i32) {
    %c0_i32 = arith.constant 0 : i32
    %c0_i32_0 = arith.constant 0 : i32
    %c0_i32_1 = arith.constant 0 : i32
    %c0_i32_2 = arith.constant 0 : i32
    return %c0_i32, %c0_i32_0, %c0_i32_1 : i32, i32, i32
  }
  func.func @transform_6(%arg0: i32) -> (i32, i32, i32) {
    %c0_i32 = arith.constant 0 : i32
    %c0_i32_0 = arith.constant 0 : i32
    %c0_i32_1 = arith.constant 0 : i32
    %c0_i32_2 = arith.constant 0 : i32
    return %c0_i32, %c0_i32_0, %c0_i32_1 : i32, i32, i32
  }
  func.func @transform_7(%arg0: i32) -> (i32, i32) {
    %c0_i32 = arith.constant 0 : i32
    %c0_i32_0 = arith.constant 0 : i32
    %c0_i32_1 = arith.constant 0 : i32
    return %c0_i32, %c0_i32_0 : i32, i32
  }
  func.func @transform_8(%arg0: i32) -> (i32, i32) {
    %c0_i32 = arith.constant 0 : i32
    %c0_i32_0 = arith.constant 0 : i32
    %c0_i32_1 = arith.constant 0 : i32
    return %c0_i32, %c0_i32_0 : i32, i32
  }
  func.func @transform_9(%arg0: i32) -> (i32, i32) {
    %c0_i32 = arith.constant 0 : i32
    %c0_i32_0 = arith.constant 0 : i32
    %c0_i32_1 = arith.constant 0 : i32
    return %c0_i32, %c0_i32_0 : i32, i32
  }
  func.func @transform_10(%arg0: i32) -> (i32, i32, i32) {
    %c0_i32 = arith.constant 0 : i32
    %c0_i32_0 = arith.constant 0 : i32
    %c0_i32_1 = arith.constant 0 : i32
    return %arg0, %c0_i32, %c0_i32_0 : i32, i32, i32
  }
}

</mosaic_0001>

<bundles_post_ra>
// kernel: eq.15
= control target key start
LH: loop header
LB: loop body
LE: loop exit
PB: predicated region body
PF: predicated region fallthrough
CT: control target
= control target key end

     0   :  { %vm7_vm0 = vcmask 130048   ;;  %vm13_vm1 = vcmask 261248   ;;  %s39_s0 = inlined_call_operand.vmem [shape: s32[2,16], index: 0, kind: input, shape index: {}]   ;;  %s40_s1 = inlined_call_operand.vmem [shape: s32[32], index: 1, kind: output, shape index: {}]  }
   0x1   :  { %v4_v0 = vld [vmem:[%s39_s0] sm:$0x3]  ;;  %s22_s0 = smov 16  }
   0x2   :  { %5 = vst [vmem:[#allocation1] sm:$0x3] %v4_v0 }
   0x9   :  { %v10_v1 = vld [vmem:[#allocation1 + $0x1] sm:$0x1]   ;;  %v6_v2 = vld [vmem:[#allocation1] sm:$0x1]  }
   0xa   :  { %11 = vrot.lane.b32.xlu0 %v10_v1, %s22_s0  ;;  %8 = vst.msk [vmem:[#allocation0] sm:$0x1] %vm7_vm0, %v6_v2  }
  0x7c   :  { %v12_v3 = vpop.permute.xlu0 %11  }
  0x7d   :  { %14 = vst.msk [vmem:[#allocation0] sm:$0x1] %vm13_vm1, %v12_v3  }
  0x84   :  { %v18_v4 = vld [vmem:[#allocation0] sm:$0x1] }
  0x85   :  { %20 = vst [vmem:[%s40_s1] sm:$0x1] %v18_v4 }

// kernel: invariant_classifier_forward.1
= control target key start
LH: loop header
LB: loop body
LE: loop exit
PB: predicated region body
PF: predicated region fallthrough
CT: control target
= control target key end

     0   :  { %vm156_vm0 = vcmask 1043456   ;;  %vm119_vm1 = vcmask 31744   ;;  %v9184_v19 = vmov 1966171168   ;;  %v297_v21 = vlaneseq  ;;  %s9185_s12 = smov 120   ;;  %s9186_s22 = smov 112   ;;  %s11602_s3 = inlined_call_operand.vmem [shape: f32[4,32], index: 3, kind: input, shape index: {}]   ;;  %s11603_s0 = inlined_call_operand.vmem [shape: f32[3,2,16,4], index: 0, kind: input, shape index: {}]   ;;  %s11604_s4 = inlined_call_operand.vmem [shape: f32[10,32,32], index: 4, kind: input, shape index: {}]   ;;  %s11605_s5 = inlined_call_operand.vmem [shape: f32[8,3,32], index: 5, kind: input, shape index: {}]   ;;  %s11606_s6 = inlined_call_operand.vmem [shape: f32[4,2,32], index: 6, kind: input, shape index: {}]   ;;  %s11607_s1 = inlined_call_operand.vmem [shape: f32[32,32], index: 1, kind: input, shape index: {}]   ;;  %s11608_s7 = inlined_call_operand.vmem [shape: f32[32,3], index: 7, kind: input, shape index: {}]   ;;  %s11609_s9 = inlined_call_operand.vmem [shape: f32[3,3], index: 9, kind: input, shape index: {}]   ;;  %s11610_s8 = inlined_call_operand.vmem [shape: f32[3,3], index: 8, kind: input, shape index: {}]   ;;  %s11611_s2 = inlined_call_operand.vmem [shape: f32[2,32], index: 2, kind: input, shape index: {}]   ;;  %s11612_s10 = inlined_call_operand.vmem [shape: f32[1,2,96], index: 10, kind: output, shape index: {}]  }
   0x1   :  { %v118_v0 = vld [vmem:[%s11602_s3] sm:$0xf]  ;;  %v36_v2 = vld [vmem:[%s11603_s0 + $0x8] sm:$0xff]  ;;  %v37_v3 = vld [vmem:[%s11603_s0 + $0x10] sm:$0xff]  ;;  %v295_v20 = vunpack.c.l.s4 %v9184_v19  ;;  %vm424_vm10 = vcmask 261120   ;;  %s9187_s23 = smov 104  }
   0x2   :  { %v35_v1 = vld [vmem:[%s11603_s0] sm:$0xff]  ;;  %7730 = vmatprep.subr.msk.mxu0 %vm156_vm0, %v118_v0  ;;  %v38_v4 = vld [vmem:[%s11603_s0 + $0x18] sm:$0xff]  ;;  %v40_v6 = vld [vmem:[%s11603_s0 + $0x28] sm:$0xff]  ;;  %v9317_v23 = vshrl.u32 %v297_v21, 7  ;;  %s9189_s11 = smov 16   ;;  %s9190_s20 = smov 24  }
   0x3   :  { %7732 = vmatprep.mubr.msk.f32.mxu0 %vm119_vm1, %v35_v1  ;;  %7731 = vmatpush3.msk.msra.mxu0 %vm156_vm0, %v118_v0  ;;  %v39_v5 = vld [vmem:[%s11603_s0 + $0x20] sm:$0xff]  ;;  %v41_v7 = vld [vmem:[%s11603_s0 + $0x30] sm:$0xff]  ;;  %v42_v8 = vld [vmem:[%s11603_s0 + $0x38] sm:$0xff]  ;;  %v296_v22 = vunpack.c.0.s8 %v295_v20  ;;  %s9196_s16 = smov 32  }
   0x4   :  { %7733 = vmatmul.mubr.msk.f32.vlgmr.msra.gmra.mrb[0].mxu0 %vm119_vm1, %v36_v2  ;;  %v43_v9 = vld [vmem:[%s11603_s0 + $0x40] sm:$0xff]  ;;  %v44_v10 = vld [vmem:[%s11603_s0 + $0x48] sm:$0xff]  ;;  %v45_v11 = vld [vmem:[%s11603_s0 + $0x50] sm:$0xff]  ;;  %v9327_v28 = vsub.s32 0, %v9317_v23 }
   0x5   :  { %7735 = vmatprep.mubr.msk.f32.mxu0 %vm119_vm1, %v37_v3  ;;  %v46_v12 = vld [vmem:[%s11603_s0 + $0x58] sm:$0xff]  ;;  %v6973_v13 = vld [vmem:[%s11604_s4 + $0x20] sm:$0xff]  ;;  %v6974_v14 = vld [vmem:[%s11604_s4 + $0x28] sm:$0xff]  ;;  %v9320_v24 = vsub.s32 %v296_v22, %v9317_v23 }
   0x6   :  { %v8403_v15 = vpack.c.bf16 %v6974_v14, %v6973_v13  ;;  %v6975_v16 = vld [vmem:[%s11604_s4 + $0x30] sm:$0xff]  ;;  %v6976_v17 = vld [vmem:[%s11604_s4 + $0x38] sm:$0xff]  ;;  %v7032_v25 = vld.sshfl [vmem:[%s11605_s5] sm:$0x13 pattern:$0x75316420] }
   0x7   :  { %v8407_v18 = vpack.c.bf16 %v6976_v17, %v6975_v16  ;;  %11631 = vst [vmem:[#allocation2_spill] sm:$0xff] %v9320_v24  ;;  %v293_v26 = vcombine.high %v7032_v25, %v7032_v25  ;;  %v300_v27 = vrot.slane %v7032_v25, %v9320_v24  ;;  %11632 = vst [vmem:[#allocation3_spill] sm:$0xff] %v9327_v28  ;;  %v111_v21 = vld [vmem:[%s11606_s6] sm:$0x3] }
   0x8   :  { %7736 = vmatmul.mubr.msk.f32.gmra.mrb[2].mxu0 %vm119_vm1, %v38_v4  ;;  %8404 = vmatprep.subr.bf16.mxu1 %v8403_v15 }
   0x9   :  { %7738 = vmatprep.mubr.msk.f32.mxu0 %vm119_vm1, %v39_v5  ;;  %8406 = vmatpush3.bf16.msra.mxu1 %v8403_v15  ;;  %v307_v31 = vrot.slane %v293_v26, %v9320_v24  ;;  %v312_v32 = vrot.slane %v300_v27, %v9327_v28  ;;  %v308_v41 = vcombine.high %v300_v27, %v300_v27 }
   0xa   :  { %8408 = vmatprep.subr.bf16.mxu1 %v8407_v18 }
   0xb   :  { %v316_v35 = vrot.slane %v307_v31, %v9327_v28  ;;  %v320_v53 = vrot.slane %v308_v41, %v9327_v28 }
   0xc   :  { %7739 = vmatmul.mubr.msk.f32.gmra.mrb[4].mxu0 %vm119_vm1, %v40_v6 }
   0xd   :  { %7741 = vmatprep.mubr.msk.f32.mxu0 %vm119_vm1, %v41_v7  ;;  %8410 = vmatpush3.bf16.msra.mxu1 %v8407_v18 }
  0x10   :  { %7742 = vmatmul.mubr.msk.f32.gmra.mrb[6].mxu0 %vm119_vm1, %v42_v8 }
  0x11   :  { %7744 = vmatprep.mubr.msk.f32.mxu0 %vm119_vm1, %v43_v9 }
  0x14   :  { %7745 = vmatmul.mubr.msk.f32.gmra.mrb[8].mxu0 %vm119_vm1, %v44_v10 }
  0x15   :  { %7747 = vmatprep.mubr.msk.f32.mxu0 %vm119_vm1, %v45_v11 }
  0x18   :  { %7748 = vmatmul.mubr.msk.f32.gmra.mrb[10].mxu0 %vm119_vm1, %v46_v12 }
  0xd7   :  { %v7734_v29 = vpop.f32.mrb[0].mxu0 }
  0xd8   :  { %v226_v30 = vpop.f32.mrb[1].mxu0  ;;  %v9332_v36 = vadd.f32 %v7734_v29, %v312_v32 }
  0xd9   :  { %v9334_v37 = vadd.f32 %v312_v32, %v226_v30 }
  0xda   :  { %v337_v43 = vmul.f32 %v9332_v36, %v9332_v36 }
  0xdb   :  { %v7737_v33 = vpop.f32.mrb[2].mxu0  ;;  %v336_v46 = vmul.f32 %v9334_v37, %v9334_v37 }
  0xdc   :  { %v236_v34 = vpop.f32.mrb[3].mxu0  ;;  %v9342_v44 = vadd.f32 %v7737_v33, %v312_v32  ;;  %v9386_v33 = vsub.s32 1, %v9317_v23 }
  0xdd   :  { %v9348_v47 = vadd.f32 %v312_v32, %v236_v34  ;;  %v391_v32 = vrot.slane %v111_v21, %v9327_v28 }
  0xde   :  { %v339_v56 = vmul.f32 %v9342_v44, %v9342_v44  ;;  %11633 = vst [vmem:[#allocation4_spill] sm:$0xff] %v9386_v33 }
  0xdf   :  { %v7740_v38 = vpop.f32.mrb[4].mxu0  ;;  %v338_v58 = vmul.f32 %v9348_v47, %v9348_v47 }
  0xe0   :  { %v9336_v39 = vadd.f32 %v7740_v38, %v316_v35  ;;  %v246_v40 = vpop.f32.mrb[5].mxu0 }
  0xe1   :  { %v9338_v42 = vadd.f32 %v316_v35, %v246_v40 }
  0xe2   :  { %v341_v45 = vmul.f32 %v9336_v39, %v9336_v39 }
  0xe3   :  { %v340_v48 = vmul.f32 %v9338_v42, %v9338_v42  ;;  %v7743_v49 = vpop.f32.mrb[6].mxu0 }
  0xe4   :  { %v345_v50 = vadd.f32 %v341_v45, %v337_v43  ;;  %v9352_v51 = vadd.f32 %v7743_v49, %v316_v35  ;;  %v256_v52 = vpop.f32.mrb[7].mxu0 }
  0xe5   :  { %v344_v54 = vadd.f32 %v340_v48, %v336_v46  ;;  %v9355_v55 = vadd.f32 %v316_v35, %v256_v52 }
  0xe6   :  { %v343_v57 = vmul.f32 %v9352_v51, %v9352_v51 }
  0xe7   :  { %v342_v59 = vmul.f32 %v9355_v55, %v9355_v55  ;;  %v7746_v60 = vpop.f32.mrb[8].mxu0 }
  0xe8   :  { %v347_v61 = vadd.f32 %v343_v57, %v339_v56  ;;  %v9365_v62 = vadd.f32 %v7746_v60, %v320_v53  ;;  %v266_v63 = vpop.f32.mrb[9].mxu0 }
  0xe9   :  { %v346_v0 = vadd.f32 %v342_v59, %v338_v58  ;;  %v9367_v1 = vadd.f32 %v320_v53, %v266_v63 }
  0xea   :  { %v349_v2 = vmul.f32 %v9365_v62, %v9365_v62 }
  0xeb   :  { %v348_v3 = vmul.f32 %v9367_v1, %v9367_v1  ;;  %v7749_v4 = vpop.f32.mrb[10].mxu0 }
  0xec   :  { %v353_v5 = vadd.f32 %v349_v2, %v345_v50  ;;  %v9373_v6 = vadd.f32 %v7749_v4, %v320_v53  ;;  %v276_v7 = vpop.f32.mrb[11].mxu0  ;;  %v399_v50 = vrot.slane %v111_v21, %v9386_v33 }
  0xed   :  { %v352_v8 = vadd.f32 %v348_v3, %v344_v54  ;;  %v9375_v9 = vadd.f32 %v320_v53, %v276_v7 }
  0xee   :  { %9004 = vrsqrt.f32 %v353_v5  ;;  %v351_v10 = vmul.f32 %v9373_v6, %v9373_v6  ;;  %vm365_vm2 = vcmp.eq.f32.partialorder %v353_v5, inf  ;;  %v368_v17 = vand.u32 2147483648, %v353_v5 }
  0xef   :  { %9006 = vrsqrt.f32 %v352_v8  ;;  %v350_v11 = vmul.f32 %v9375_v9, %v9375_v9  ;;  %vm367_vm3 = vcmp.eq.f32.partialorder %v353_v5, 0.0  ;;  %vm358_vm4 = vcmp.eq.f32.partialorder %v352_v8, inf }
  0xf0   :  { %v355_v12 = vadd.f32 %v351_v10, %v347_v61  ;;  %v361_v20 = vand.u32 2147483648, %v352_v8  ;;  %vm360_vm5 = vcmp.eq.f32.partialorder %v352_v8, 0.0 }
  0xf1   :  { %v354_v13 = vadd.f32 %v350_v11, %v346_v0 }
  0xf2   :  { %9008 = vrsqrt.f32 %v355_v12  ;;  %vm379_vm6 = vcmp.eq.f32.partialorder %v355_v12, inf  ;;  %v382_v35 = vand.u32 2147483648, %v355_v12  ;;  %vm381_vm7 = vcmp.eq.f32.partialorder %v355_v12, 0.0 }
  0xf3   :  { %9010 = vrsqrt.f32 %v354_v13  ;;  %vm372_vm8 = vcmp.eq.f32.partialorder %v354_v13, inf  ;;  %v375_v41 = vand.u32 2147483648, %v354_v13  ;;  %vm374_vm9 = vcmp.eq.f32.partialorder %v354_v13, 0.0 }
  0xf8   :  { %v9005_v14 = vpop.eup %9004 }
  0xf9   :  { %v9007_v15 = vpop.eup %9006  ;;  %v364_v16 = vmul.f32 %v9005_v14, %v353_v5 }
  0xfa   :  { %v357_v18 = vmul.f32 %v9007_v15, %v352_v8 }
  0xfb   :  { %v366_v19 = vsel %vm365_vm2, %v353_v5, %v364_v16 }
  0xfc   :  { %v369_v22 = vsel %vm367_vm3, %v368_v17, %v366_v19  ;;  %v359_v25 = vsel %vm358_vm4, %v352_v8, %v357_v18  ;;  %v9009_v29 = vpop.eup %9008 }
  0xfd   :  { %v385_v26 = vadd.f32 1e-06, %v369_v22  ;;  %v362_v27 = vsel %vm360_vm5, %v361_v20, %v359_v25  ;;  %v9011_v31 = vpop.eup %9010  ;;  %v378_v34 = vmul.f32 %v9009_v29, %v355_v12 }
  0xfe   :  { %v384_v30 = vadd.f32 1e-06, %v362_v27  ;;  %v371_v38 = vmul.f32 %v9011_v31, %v354_v13 }
  0xff   :  { %9012 = vrcp.f32 %v385_v26  ;;  %v380_v40 = vsel %vm379_vm6, %v355_v12, %v378_v34  ;;  %v393_v49 = vmul.f32 %v391_v32, %v385_v26 }
 0x100   :  { %9014 = vrcp.f32 %v384_v30  ;;  %v383_v43 = vsel %vm381_vm7, %v382_v35, %v380_v40  ;;  %v373_v45 = vsel %vm372_vm8, %v354_v13, %v371_v38  ;;  %v392_v52 = vmul.f32 %v391_v32, %v384_v30 }
 0x101   :  { %v387_v46 = vadd.f32 1e-06, %v383_v43  ;;  %v376_v48 = vsel %vm374_vm9, %v375_v41, %v373_v45  ;;  %v401_v53 = vadd.f32 %v399_v50, %v393_v49 }
 0x102   :  { %v386_v23 = vadd.f32 1e-06, %v376_v48  ;;  %v400_v56 = vadd.f32 %v399_v50, %v392_v52 }
 0x103   :  { %9016 = vrcp.f32 %v387_v46  ;;  %v395_v59 = vmul.f32 %v391_v32, %v387_v46 }
 0x104   :  { %9018 = vrcp.f32 %v386_v23  ;;  %v394_v61 = vmul.f32 %v391_v32, %v386_v23 }
 0x105   :  { %v403_v7 = vadd.f32 %v399_v50, %v395_v59 }
 0x109   :  { %v9013_v54 = vpop.eup %9012 }
 0x10a   :  { %v9015_v57 = vpop.eup %9014  ;;  %v409_v58 = vmul.f32 %v9013_v54, %v401_v53 }
 0x10b   :  { %v408_v60 = vmul.f32 %v9015_v57, %v400_v56 }
 0x10c   :  { %v9390_v63 = vmul.f32 %v409_v58, %v9332_v36  ;;  %v9393_v0 = vmul.f32 %v409_v58, %v9336_v39  ;;  %v9396_v2 = vmul.f32 %v409_v58, %v9365_v62  ;;  %v402_v36 = vadd.f32 %v399_v50, %v394_v61 }
 0x10d   :  { %v9399_v3 = vmul.f32 %v408_v60, %v9334_v37  ;;  %v9402_v4 = vmul.f32 %v408_v60, %v9338_v42  ;;  %v9405_v5 = vmul.f32 %v408_v60, %v9367_v1  ;;  %v9017_v8 = vpop.eup %9016 }
 0x10e   :  { %v9019_v39 = vpop.eup %9018  ;;  %v411_v10 = vmul.f32 %v9017_v8, %v403_v7 }
 0x10f   :  { %7758 = vmatprep.mubr.msk.f32.mxu1 %vm424_vm10, %v9399_v3  ;;  %v410_v62 = vmul.f32 %v9019_v39, %v402_v36 }
 0x110   :  { %7759 = vmatmul.mubr.msk.f32.vlgmr.msra.gmra.mrb[0].mxu1 %vm424_vm10, %v9390_v63  ;;  %v9412_v37 = vmul.f32 %v411_v10, %v9342_v44  ;;  %v9415_v42 = vmul.f32 %v411_v10, %v9352_v51  ;;  %v9418_v1 = vmul.f32 %v411_v10, %v9373_v6  ;;  %v47_v44 = vld [vmem:[%s11604_s4] sm:$0xff]  ;;  %v50_v6 = vld [vmem:[%s11604_s4 + $0x18] sm:$0xff] }
 0x111   :  { %v9421_v11 = vmul.f32 %v410_v62, %v9348_v47  ;;  %v9424_v12 = vmul.f32 %v410_v62, %v9355_v55  ;;  %v9427_v13 = vmul.f32 %v410_v62, %v9375_v9  ;;  %v48_v47 = vld [vmem:[%s11604_s4 + $0x8] sm:$0xff]  ;;  %v49_v55 = vld [vmem:[%s11604_s4 + $0x10] sm:$0xff] }
 0x112   :  { %v8411_v51 = vpack.c.bf16 %v48_v47, %v47_v44  ;;  %v8415_v9 = vpack.c.bf16 %v50_v6, %v49_v55 }
 0x113   :  { %7761 = vmatprep.mubr.msk.f32.mxu1 %vm424_vm10, %v9421_v11 }
 0x114   :  { %7762 = vmatmul.mubr.msk.f32.gmra.mrb[2].mxu1 %vm424_vm10, %v9412_v37  ;;  %8412 = vmatprep.subr.bf16.mxu0 %v8411_v51 }
 0x115   :  { %7764 = vmatprep.mubr.msk.f32.mxu1 %vm424_vm10, %v9402_v4  ;;  %8414 = vmatpush3.bf16.msra.mxu0 %v8411_v51 }
 0x116   :  { %8416 = vmatprep.subr.bf16.mxu0 %v8415_v9 }
 0x118   :  { %7765 = vmatmul.mubr.msk.f32.gmra.mrb[4].mxu1 %vm424_vm10, %v9393_v0 }
 0x119   :  { %7767 = vmatprep.mubr.msk.f32.mxu1 %vm424_vm10, %v9424_v12  ;;  %8418 = vmatpush3.bf16.msra.mxu0 %v8415_v9 }
 0x11c   :  { %7768 = vmatmul.mubr.msk.f32.gmra.mrb[6].mxu1 %vm424_vm10, %v9415_v42 }
 0x11d   :  { %7770 = vmatprep.mubr.msk.f32.mxu1 %vm424_vm10, %v9405_v5 }
 0x120   :  { %7771 = vmatmul.mubr.msk.f32.gmra.mrb[8].mxu1 %vm424_vm10, %v9396_v2 }
 0x121   :  { %7773 = vmatprep.mubr.msk.f32.mxu1 %vm424_vm10, %v9427_v13 }
 0x124   :  { %7774 = vmatmul.mubr.msk.f32.gmra.mrb[10].mxu1 %vm424_vm10, %v9418_v1 }
 0x1e3   :  { %v9461_v14 = vpop.f32.mrb[0].mxu1 }
 0x1e4   :  { %v9463_v15 = vpop.f32.mrb[1].mxu1  ;;  %v587_v19 = vmul.f32 %v9461_v14, %v9390_v63  ;;  %v607_v20 = vmul.f32 %v9461_v14, %v9461_v14 }
 0x1e5   :  { %v586_v26 = vmul.f32 %v9463_v15, %v9399_v3  ;;  %v606_v27 = vmul.f32 %v9463_v15, %v9463_v15 }
 0x1e7   :  { %v9465_v16 = vpop.f32.mrb[2].mxu1 }
 0x1e8   :  { %v9467_v17 = vpop.f32.mrb[3].mxu1  ;;  %v589_v40 = vmul.f32 %v9465_v16, %v9412_v37  ;;  %v609_v41 = vmul.f32 %v9465_v16, %v9465_v16 }
 0x1e9   :  { %v588_v48 = vmul.f32 %v9467_v17, %v9421_v11  ;;  %v608_v49 = vmul.f32 %v9467_v17, %v9467_v17 }
 0x1eb   :  { %v7766_v18 = vpop.f32.mrb[4].mxu1 }
 0x1ec   :  { %v591_v21 = vmul.f32 %v7766_v18, %v9393_v0  ;;  %v611_v22 = vmul.f32 %v7766_v18, %v7766_v18  ;;  %v9474_v25 = vpop.f32.mrb[5].mxu1 }
 0x1ed   :  { %v590_v29 = vmul.f32 %v9474_v25, %v9402_v4  ;;  %v610_v30 = vmul.f32 %v9474_v25, %v9474_v25 }
 0x1ee   :  { %v595_v31 = vadd.f32 %v591_v21, %v587_v19  ;;  %v615_v32 = vadd.f32 %v611_v22, %v607_v20 }
 0x1ef   :  { %v594_v34 = vadd.f32 %v590_v29, %v586_v26  ;;  %v614_v35 = vadd.f32 %v610_v30, %v606_v27  ;;  %v9484_v38 = vpop.f32.mrb[6].mxu1 }
 0x1f0   :  { %v593_v43 = vmul.f32 %v9484_v38, %v9415_v42  ;;  %v613_v45 = vmul.f32 %v9484_v38, %v9484_v38  ;;  %v9494_v46 = vpop.f32.mrb[7].mxu1 }
 0x1f1   :  { %v592_v50 = vmul.f32 %v9494_v46, %v9424_v12  ;;  %v612_v23 = vmul.f32 %v9494_v46, %v9494_v46 }
 0x1f2   :  { %v597_v52 = vadd.f32 %v593_v43, %v589_v40  ;;  %v617_v53 = vadd.f32 %v613_v45, %v609_v41  ;;  %v686_v45 = vmul.f32 0.2, %v9399_v3 }
 0x1f3   :  { %v596_v54 = vadd.f32 %v592_v50, %v588_v48  ;;  %v616_v56 = vadd.f32 %v612_v23, %v608_v49  ;;  %v7772_v57 = vpop.f32.mrb[8].mxu1 }
 0x1f4   :  { %v599_v58 = vmul.f32 %v7772_v57, %v9396_v2  ;;  %v619_v59 = vmul.f32 %v7772_v57, %v7772_v57  ;;  %v567_v60 = vpop.f32.mrb[9].mxu1 }
 0x1f5   :  { %v598_v61 = vmul.f32 %v567_v60, %v9405_v5  ;;  %v618_v7 = vmul.f32 %v567_v60, %v567_v60 }
 0x1f6   :  { %v9506_v8 = vadd.f32 %v599_v58, %v595_v31  ;;  %v623_v36 = vadd.f32 %v619_v59, %v615_v32 }
 0x1f7   :  { %v9508_v39 = vadd.f32 %v598_v61, %v594_v34  ;;  %v622_v10 = vadd.f32 %v618_v7, %v614_v35  ;;  %v7775_v62 = vpop.f32.mrb[10].mxu1  ;;  %v687_v34 = vmul.f32 0.2, %v9390_v63 }
 0x1f8   :  { %v627_v44 = vadd.f32 1e-06, %v623_v36  ;;  %v601_v47 = vmul.f32 %v7775_v62, %v9418_v1  ;;  %v621_v51 = vmul.f32 %v7775_v62, %v7775_v62  ;;  %v577_v55 = vpop.f32.mrb[11].mxu1  ;;  %vm663_vm11 = vcmp.ge.f32.partialorder %v9506_v8, 0.0 }
 0x1f9   :  { %v626_v6 = vadd.f32 1e-06, %v622_v10  ;;  %v600_v9 = vmul.f32 %v577_v55, %v9427_v13  ;;  %v620_v19 = vmul.f32 %v577_v55, %v577_v55  ;;  %vm662_vm12 = vcmp.ge.f32.partialorder %v9508_v39, 0.0 }
 0x1fa   :  { %9020 = vrcp.f32 %v627_v44  ;;  %v9512_v20 = vadd.f32 %v601_v47, %v597_v52  ;;  %v625_v21 = vadd.f32 %v621_v51, %v617_v53 }
 0x1fb   :  { %9022 = vrcp.f32 %v626_v6  ;;  %v9514_v22 = vadd.f32 %v600_v9, %v596_v54  ;;  %v624_v26 = vadd.f32 %v620_v19, %v616_v56  ;;  %v688_v19 = vmul.f32 0.2, %v9421_v11 }
 0x1fc   :  { %v629_v27 = vadd.f32 1e-06, %v625_v21  ;;  %vm665_vm13 = vcmp.ge.f32.partialorder %v9512_v20, 0.0 }
 0x1fd   :  { %v628_v29 = vadd.f32 1e-06, %v624_v26  ;;  %vm664_vm14 = vcmp.ge.f32.partialorder %v9514_v22, 0.0 }
 0x1fe   :  { %9024 = vrcp.f32 %v629_v27 }
 0x1ff   :  { %9026 = vrcp.f32 %v628_v29 }
 0x204   :  { %v9021_v30 = vpop.eup %9020 }
 0x205   :  { %v9023_v31 = vpop.eup %9022  ;;  %v635_v32 = vmul.f32 %v9021_v30, %v9506_v8 }
 0x206   :  { %v634_v35 = vmul.f32 %v9023_v31, %v9508_v39 }
 0x207   :  { %v639_v40 = vmul.f32 %v9461_v14, %v635_v32  ;;  %v643_v41 = vmul.f32 %v7766_v18, %v635_v32  ;;  %v647_v43 = vmul.f32 %v7772_v57, %v635_v32 }
 0x208   :  { %v9025_v48 = vpop.eup %9024  ;;  %v638_v49 = vmul.f32 %v634_v35, %v9463_v15  ;;  %v642_v50 = vmul.f32 %v634_v35, %v9474_v25  ;;  %v646_v23 = vmul.f32 %v634_v35, %v567_v60 }
 0x209   :  { %v9027_v52 = vpop.eup %9026  ;;  %v651_v53 = vsub.f32 %v9390_v63, %v639_v40  ;;  %v637_v54 = vmul.f32 %v9025_v48, %v9512_v20  ;;  %v655_v14 = vsub.f32 %v9393_v0, %v643_v41  ;;  %v659_v36 = vsub.f32 %v9396_v2, %v647_v43 }
 0x20a   :  { %v650_v18 = vsub.f32 %v9399_v3, %v638_v49  ;;  %v654_v56 = vsub.f32 %v9402_v4, %v642_v50  ;;  %v636_v15 = vmul.f32 %v9027_v52, %v9514_v22  ;;  %v689_v41 = vmul.f32 0.2, %v9412_v37 }
 0x20b   :  { %v675_v25 = vsel %vm663_vm11, %v9390_v63, %v651_v53  ;;  %v641_v57 = vmul.f32 %v9465_v16, %v637_v54  ;;  %v645_v58 = vmul.f32 %v9484_v38, %v637_v54  ;;  %v649_v59 = vmul.f32 %v7775_v62, %v637_v54 }
 0x20c   :  { %v640_v60 = vmul.f32 %v636_v15, %v9467_v17  ;;  %v644_v61 = vmul.f32 %v636_v15, %v9494_v46  ;;  %v648_v7 = vmul.f32 %v636_v15, %v577_v55  ;;  %v674_v63 = vsel %vm662_vm12, %v9399_v3, %v650_v18 }
 0x20d   :  { %v653_v10 = vsub.f32 %v9412_v37, %v641_v57  ;;  %v657_v44 = vsub.f32 %v9415_v42, %v645_v58  ;;  %v699_v16 = vmul.f32 0.8, %v675_v25  ;;  %v658_v38 = vsub.f32 %v9405_v5, %v646_v23 }
 0x20e   :  { %v652_v17 = vsub.f32 %v9421_v11, %v640_v60  ;;  %v656_v46 = vsub.f32 %v9424_v12, %v644_v61  ;;  %v698_v62 = vmul.f32 0.8, %v674_v63  ;;  %v678_v51 = vsel %vm662_vm12, %v9402_v4, %v654_v56  ;;  %v7057_v61 = vld.sshfl [vmem:[%s11605_s5 + $0x4] sm:$0x13 pattern:$0x75316420] }
 0x20f   :  { %v677_v47 = vsel %vm665_vm13, %v9412_v37, %v653_v10  ;;  %v679_v3 = vsel %vm663_vm11, %v9393_v0, %v655_v14  ;;  %v661_v55 = vsub.f32 %v9418_v1, %v649_v59  ;;  %v660_v6 = vsub.f32 %v9427_v13, %v648_v7  ;;  %v6980_v59 = vld [vmem:[%s11604_s4 + $0x58] sm:$0xff] }
 0x210   :  { %v676_v9 = vsel %vm664_vm14, %v9421_v11, %v652_v17  ;;  %v710_v21 = vadd.f32 %v698_v62, %v686_v45  ;;  %v680_v27 = vsel %vm664_vm14, %v9424_v12, %v656_v46  ;;  %v681_v29 = vsel %vm665_vm13, %v9415_v42, %v657_v44 }
 0x211   :  { %v700_v26 = vmul.f32 0.8, %v676_v9  ;;  %v711_v30 = vadd.f32 %v699_v16, %v687_v34  ;;  %v701_v31 = vmul.f32 0.8, %v677_v47  ;;  %v702_v35 = vmul.f32 0.8, %v678_v51 }
 0x212   :  { %7784 = vmatprep.mubr.msk.f32.mxu0 %vm424_vm10, %v710_v21  ;;  %v682_v11 = vsel %vm662_vm12, %v9405_v5, %v658_v38  ;;  %v683_v40 = vsel %vm663_vm11, %v9396_v2, %v659_v36  ;;  %v684_v34 = vsel %vm664_vm14, %v9427_v13, %v660_v6  ;;  %v690_v43 = vmul.f32 0.2, %v9402_v4 }
 0x213   :  { %v712_v32 = vadd.f32 %v700_v26, %v688_v19  ;;  %7785 = vmatmul.mubr.msk.f32.vlgmr.msra.gmra.mrb[12].mxu0 %vm424_vm10, %v711_v30  ;;  %v685_v39 = vsel %vm665_vm13, %v9418_v1, %v661_v55  ;;  %v713_v45 = vadd.f32 %v701_v31, %v689_v41  ;;  %v703_v48 = vmul.f32 0.8, %v679_v3 }
 0x214   :  { %v714_v8 = vadd.f32 %v702_v35, %v690_v43  ;;  %v704_v49 = vmul.f32 0.8, %v680_v27  ;;  %v691_v37 = vmul.f32 0.2, %v9393_v0  ;;  %v692_v22 = vmul.f32 0.2, %v9424_v12 }
 0x215   :  { %7787 = vmatprep.mubr.msk.f32.mxu0 %vm424_vm10, %v712_v32  ;;  %v705_v23 = vmul.f32 0.8, %v681_v29  ;;  %v706_v4 = vmul.f32 0.8, %v682_v11  ;;  %v693_v20 = vmul.f32 0.2, %v9415_v42  ;;  %v891_v7 = vcombine.high %v7057_v61, %v7057_v61 }
 0x216   :  { %v715_v50 = vadd.f32 %v703_v48, %v691_v37  ;;  %v716_v52 = vadd.f32 %v704_v49, %v692_v22  ;;  %v694_v53 = vmul.f32 0.2, %v9405_v5  ;;  %v707_v14 = vmul.f32 0.8, %v683_v40 }
 0x217   :  { %7788 = vmatmul.mubr.msk.f32.gmra.mrb[14].mxu0 %vm424_vm10, %v713_v45  ;;  %v717_v54 = vadd.f32 %v705_v23, %v693_v20  ;;  %v708_v0 = vmul.f32 0.8, %v684_v34  ;;  %v695_v12 = vmul.f32 0.2, %v9396_v2  ;;  %v696_v56 = vmul.f32 0.2, %v9427_v13 }
 0x218   :  { %7790 = vmatprep.mubr.msk.f32.mxu0 %vm424_vm10, %v714_v8  ;;  %v718_v18 = vadd.f32 %v706_v4, %v694_v53  ;;  %v709_v25 = vmul.f32 0.8, %v685_v39  ;;  %v697_v42 = vmul.f32 0.2, %v9418_v1  ;;  %v6977_v2 = vld [vmem:[%s11604_s4 + $0x40] sm:$0xff]  ;;  %v6978_v13 = vld [vmem:[%s11604_s4 + $0x48] sm:$0xff]  ;;  %v898_v36 = vrot.slane %v7057_v61, %v9320_v24 }
 0x219   :  { %v719_v15 = vadd.f32 %v707_v14, %v695_v12  ;;  %v720_v57 = vadd.f32 %v708_v0, %v696_v56  ;;  %v8419_v58 = vpack.c.bf16 %v6978_v13, %v6977_v2  ;;  %v6979_v1 = vld [vmem:[%s11604_s4 + $0x50] sm:$0xff]  ;;  %v905_v63 = vrot.slane %v891_v7, %v9320_v24 }
 0x21a   :  { %v721_v5 = vadd.f32 %v709_v25, %v697_v42  ;;  %v8423_v60 = vpack.c.bf16 %v6980_v59, %v6979_v1  ;;  %v910_v16 = vrot.slane %v898_v36, %v9327_v28  ;;  %v906_v6 = vcombine.high %v898_v36, %v898_v36  ;;  %v7016_v59 = vld [vmem:[%s11606_s6 + $0x2] sm:$0x3] }
 0x21b   :  { %7791 = vmatmul.mubr.msk.f32.gmra.mrb[16].mxu0 %vm424_vm10, %v715_v50  ;;  %8420 = vmatprep.subr.bf16.mxu1 %v8419_v58  ;;  %v914_v46 = vrot.slane %v905_v63, %v9327_v28  ;;  %vm1887_vm12 = vcmask 64512   ;;  %vm4852_vm14 = vcmask 130048  }
 0x21c   :  { %7793 = vmatprep.mubr.msk.f32.mxu0 %vm424_vm10, %v716_v52  ;;  %8422 = vmatpush3.bf16.msra.mxu1 %v8419_v58  ;;  %v918_v40 = vrot.slane %v906_v6, %v9327_v28  ;;  %vm10024_vm13 = vmpackc.low %vm1887_vm12, %vm1887_vm12 }
 0x21d   :  { %8424 = vmatprep.subr.bf16.mxu1 %v8423_v60 }
 0x21f   :  { %7794 = vmatmul.mubr.msk.f32.gmra.mrb[18].mxu0 %vm424_vm10, %v717_v54 }
 0x220   :  { %7796 = vmatprep.mubr.msk.f32.mxu0 %vm424_vm10, %v718_v18  ;;  %8426 = vmatpush3.bf16.msra.mxu1 %v8423_v60 }
 0x223   :  { %7797 = vmatmul.mubr.msk.f32.gmra.mrb[20].mxu0 %vm424_vm10, %v719_v15 }
 0x224   :  { %7799 = vmatprep.mubr.msk.f32.mxu0 %vm424_vm10, %v720_v57 }
 0x227   :  { %7800 = vmatmul.mubr.msk.f32.gmra.mrb[22].mxu0 %vm424_vm10, %v721_v5 }
 0x2e6   :  { %v7786_v10 = vpop.f32.mrb[12].mxu0 }
 0x2e7   :  { %v824_v44 = vpop.f32.mrb[13].mxu0  ;;  %v9622_v62 = vadd.f32 %v7786_v10, %v910_v16 }
 0x2e8   :  { %v9624_v47 = vadd.f32 %v910_v16, %v824_v44 }
 0x2e9   :  { %v935_v19 = vmul.f32 %v9622_v62, %v9622_v62 }
 0x2ea   :  { %v7789_v38 = vpop.f32.mrb[14].mxu0  ;;  %v934_v27 = vmul.f32 %v9624_v47, %v9624_v47 }
 0x2eb   :  { %v834_v17 = vpop.f32.mrb[15].mxu0  ;;  %v9632_v21 = vadd.f32 %v7789_v38, %v910_v16 }
 0x2ec   :  { %v9638_v29 = vadd.f32 %v910_v16, %v834_v17  ;;  %v989_v16 = vrot.slane %v7016_v59, %v9327_v28 }
 0x2ed   :  { %v937_v43 = vmul.f32 %v9632_v21, %v9632_v21 }
 0x2ee   :  { %v7792_v51 = vpop.f32.mrb[16].mxu0  ;;  %v936_v45 = vmul.f32 %v9638_v29, %v9638_v29 }
 0x2ef   :  { %v9626_v3 = vadd.f32 %v7792_v51, %v914_v46  ;;  %v844_v55 = vpop.f32.mrb[17].mxu0 }
 0x2f0   :  { %v9628_v9 = vadd.f32 %v914_v46, %v844_v55 }
 0x2f1   :  { %v939_v26 = vmul.f32 %v9626_v3, %v9626_v3 }
 0x2f2   :  { %v938_v30 = vmul.f32 %v9628_v9, %v9628_v9  ;;  %v7795_v31 = vpop.f32.mrb[18].mxu0 }
 0x2f3   :  { %v943_v32 = vadd.f32 %v939_v26, %v935_v19  ;;  %v9642_v35 = vadd.f32 %v7795_v31, %v914_v46  ;;  %v854_v11 = vpop.f32.mrb[19].mxu0  ;;  %v997_v31 = vrot.slane %v7016_v59, %v9386_v33  ;;  %v6990_v59 = vld [vmem:[%s11604_s4 + $0xa8] sm:$0xff] }
 0x2f4   :  { %v942_v41 = vadd.f32 %v938_v30, %v934_v27  ;;  %v9645_v34 = vadd.f32 %v914_v46, %v854_v11 }
 0x2f5   :  { %v941_v39 = vmul.f32 %v9642_v35, %v9642_v35 }
 0x2f6   :  { %v940_v48 = vmul.f32 %v9645_v34, %v9645_v34  ;;  %v7798_v8 = vpop.f32.mrb[20].mxu0 }
 0x2f7   :  { %v945_v49 = vadd.f32 %v941_v39, %v937_v43  ;;  %v9655_v37 = vadd.f32 %v7798_v8, %v918_v40  ;;  %v864_v22 = vpop.f32.mrb[21].mxu0 }
 0x2f8   :  { %v944_v50 = vadd.f32 %v940_v48, %v936_v45  ;;  %v9657_v23 = vadd.f32 %v918_v40, %v864_v22 }
 0x2f9   :  { %v947_v52 = vmul.f32 %v9655_v37, %v9655_v37 }
 0x2fa   :  { %v946_v4 = vmul.f32 %v9657_v23, %v9657_v23  ;;  %v7801_v20 = vpop.f32.mrb[22].mxu0 }
 0x2fb   :  { %v951_v53 = vadd.f32 %v947_v52, %v943_v32  ;;  %v9663_v54 = vadd.f32 %v7801_v20, %v918_v40  ;;  %v874_v14 = vpop.f32.mrb[23].mxu0 }
 0x2fc   :  { %v950_v18 = vadd.f32 %v946_v4, %v942_v41  ;;  %v9665_v0 = vadd.f32 %v918_v40, %v874_v14 }
 0x2fd   :  { %9028 = vrsqrt.f32 %v951_v53  ;;  %v949_v12 = vmul.f32 %v9663_v54, %v9663_v54  ;;  %vm963_vm15 = vcmp.eq.f32.partialorder %v951_v53, inf  ;;  %v966_v2 = vand.u32 2147483648, %v951_v53 }
 0x2fe   :  { %9030 = vrsqrt.f32 %v950_v18  ;;  %v948_v56 = vmul.f32 %v9665_v0, %v9665_v0  ;;  %vm965_vm0 = vcmp.eq.f32.partialorder %v951_v53, 0.0  ;;  %vm956_vm1 = vcmp.eq.f32.partialorder %v950_v18, inf }
 0x2ff   :  { %v953_v15 = vadd.f32 %v949_v12, %v945_v49  ;;  %v959_v1 = vand.u32 2147483648, %v950_v18  ;;  %vm958_vm2 = vcmp.eq.f32.partialorder %v950_v18, 0.0 }
 0x300   :  { %v952_v25 = vadd.f32 %v948_v56, %v944_v50 }
 0x301   :  { %9032 = vrsqrt.f32 %v953_v15  ;;  %vm977_vm3 = vcmp.eq.f32.partialorder %v953_v15, inf  ;;  %v980_v17 = vand.u32 2147483648, %v953_v15  ;;  %vm979_vm4 = vcmp.eq.f32.partialorder %v953_v15, 0.0 }
 0x302   :  { %9034 = vrsqrt.f32 %v952_v25  ;;  %vm970_vm5 = vcmp.eq.f32.partialorder %v952_v25, inf  ;;  %v973_v55 = vand.u32 2147483648, %v952_v25  ;;  %vm972_vm6 = vcmp.eq.f32.partialorder %v952_v25, 0.0 }
 0x307   :  { %v9029_v57 = vpop.eup %9028 }
 0x308   :  { %v9031_v42 = vpop.eup %9030  ;;  %v962_v5 = vmul.f32 %v9029_v57, %v951_v53  ;;  %v6983_v57 = vld [vmem:[%s11604_s4 + $0x70] sm:$0xff] }
 0x309   :  { %v955_v13 = vmul.f32 %v9031_v42, %v950_v18  ;;  %v6984_v42 = vld [vmem:[%s11604_s4 + $0x78] sm:$0xff] }
 0x30a   :  { %v964_v58 = vsel %vm963_vm15, %v951_v53, %v962_v5  ;;  %v6987_v5 = vld [vmem:[%s11604_s4 + $0x90] sm:$0xff]  ;;  %vm4865_vm15 = vcmask 195584  }
 0x30b   :  { %v967_v60 = vsel %vm965_vm0, %v966_v2, %v964_v58  ;;  %v957_v61 = vsel %vm956_vm1, %v950_v18, %v955_v13  ;;  %v9033_v10 = vpop.eup %9032  ;;  %v8431_v2 = vpack.c.bf16 %v6984_v42, %v6983_v57  ;;  %v6988_v13 = vld [vmem:[%s11604_s4 + $0x98] sm:$0xff] }
 0x30c   :  { %v983_v7 = vadd.f32 1e-06, %v967_v60  ;;  %v960_v36 = vsel %vm958_vm2, %v959_v1, %v957_v61  ;;  %v9035_v63 = vpop.eup %9034  ;;  %v976_v38 = vmul.f32 %v9033_v10, %v953_v15  ;;  %v8439_v58 = vpack.c.bf16 %v6988_v13, %v6987_v5  ;;  %v6989_v1 = vld [vmem:[%s11604_s4 + $0xa0] sm:$0xff] }
 0x30d   :  { %v982_v44 = vadd.f32 1e-06, %v960_v36  ;;  %v969_v46 = vmul.f32 %v9035_v63, %v952_v25  ;;  %v9766_v60 = vpack.c.bf16 %v6990_v59, %v6989_v1 }
 0x30e   :  { %9036 = vrcp.f32 %v983_v7  ;;  %v978_v51 = vsel %vm977_vm3, %v953_v15, %v976_v38  ;;  %v991_v30 = vmul.f32 %v989_v16, %v983_v7 }
 0x30f   :  { %9038 = vrcp.f32 %v982_v44  ;;  %v981_v6 = vsel %vm979_vm4, %v980_v17, %v978_v51  ;;  %v971_v19 = vsel %vm970_vm5, %v952_v25, %v969_v46  ;;  %v990_v11 = vmul.f32 %v989_v16, %v982_v44 }
 0x310   :  { %v985_v26 = vadd.f32 1e-06, %v981_v6  ;;  %v974_v27 = vsel %vm972_vm6, %v973_v55, %v971_v19  ;;  %v999_v40 = vadd.f32 %v997_v31, %v991_v30 }
 0x311   :  { %v984_v32 = vadd.f32 1e-06, %v974_v27  ;;  %v998_v43 = vadd.f32 %v997_v31, %v990_v11 }
 0x312   :  { %9040 = vrcp.f32 %v985_v26  ;;  %v993_v48 = vmul.f32 %v989_v16, %v985_v26 }
 0x313   :  { %9042 = vrcp.f32 %v984_v32  ;;  %v992_v49 = vmul.f32 %v989_v16, %v984_v32 }
 0x314   :  { %v1001_v14 = vadd.f32 %v997_v31, %v993_v48 }
 0x315   :  { %v1000_v12 = vadd.f32 %v997_v31, %v992_v49 }
 0x318   :  { %v9037_v41 = vpop.eup %9036 }
 0x319   :  { %v9039_v39 = vpop.eup %9038  ;;  %v1007_v45 = vmul.f32 %v9037_v41, %v999_v40 }
 0x31a   :  { %v1006_v8 = vmul.f32 %v9039_v39, %v998_v43 }
 0x31b   :  { %v9677_v22 = vmul.f32 %v1007_v45, %v9622_v62  ;;  %v9680_v50 = vmul.f32 %v1007_v45, %v9626_v3  ;;  %v9683_v52 = vmul.f32 %v1007_v45, %v9655_v37 }
 0x31c   :  { %v9686_v4 = vmul.f32 %v1006_v8, %v9624_v47  ;;  %v9689_v20 = vmul.f32 %v1006_v8, %v9628_v9  ;;  %v9692_v53 = vmul.f32 %v1006_v8, %v9657_v23  ;;  %v9041_v18 = vpop.eup %9040 }
 0x31d   :  { %v9043_v62 = vpop.eup %9042  ;;  %v1009_v3 = vmul.f32 %v9041_v18, %v1001_v14 }
 0x31e   :  { %7810 = vmatprep.mubr.msk.f32.mxu1 %vm424_vm10, %v9686_v4  ;;  %v1008_v37 = vmul.f32 %v9043_v62, %v1000_v12 }
 0x31f   :  { %7811 = vmatmul.mubr.msk.f32.vlgmr.msra.gmra.mrb[12].mxu1 %vm424_vm10, %v9677_v22  ;;  %v9699_v47 = vmul.f32 %v1009_v3, %v9632_v21  ;;  %v9702_v9 = vmul.f32 %v1009_v3, %v9642_v35  ;;  %v9705_v23 = vmul.f32 %v1009_v3, %v9663_v54  ;;  %v6985_v21 = vld [vmem:[%s11604_s4 + $0x80] sm:$0xff]  ;;  %v6982_v54 = vld [vmem:[%s11604_s4 + $0x68] sm:$0xff] }
 0x320   :  { %v9708_v56 = vmul.f32 %v1008_v37, %v9638_v29  ;;  %v9711_v15 = vmul.f32 %v1008_v37, %v9645_v34  ;;  %v9714_v25 = vmul.f32 %v1008_v37, %v9665_v0  ;;  %v6986_v29 = vld [vmem:[%s11604_s4 + $0x88] sm:$0xff]  ;;  %v6981_v35 = vld [vmem:[%s11604_s4 + $0x60] sm:$0xff] }
 0x321   :  { %v8435_v34 = vpack.c.bf16 %v6986_v29, %v6985_v21  ;;  %v8427_v0 = vpack.c.bf16 %v6982_v54, %v6981_v35 }
 0x322   :  { %7813 = vmatprep.mubr.msk.f32.mxu1 %vm424_vm10, %v9708_v56 }
 0x323   :  { %7814 = vmatmul.mubr.msk.f32.gmra.mrb[14].mxu1 %vm424_vm10, %v9699_v47  ;;  %8436 = vmatprep.subr.bf16.mxu1 %v8435_v34 }
 0x324   :  { %7816 = vmatprep.mubr.msk.f32.mxu1 %vm424_vm10, %v9689_v20  ;;  %8438 = vmatpush3.bf16.msra.mxu1 %v8435_v34 }
 0x325   :  { %8428 = vmatprep.subr.bf16.mxu0 %v8427_v0  ;;  %8440 = vmatprep.subr.bf16.mxu1 %v8439_v58 }
 0x326   :  { %8430 = vmatpush3.bf16.msra.mxu0 %v8427_v0 }
 0x327   :  { %7817 = vmatmul.mubr.msk.f32.gmra.mrb[16].mxu1 %vm424_vm10, %v9680_v50  ;;  %8432 = vmatprep.subr.bf16.mxu0 %v8431_v2 }
 0x328   :  { %7819 = vmatprep.mubr.msk.f32.mxu1 %vm424_vm10, %v9711_v15  ;;  %8442 = vmatpush3.bf16.msra.mxu1 %v8439_v58 }
 0x32a   :  { %8434 = vmatpush3.bf16.msra.mxu0 %v8431_v2 }
 0x32b   :  { %7820 = vmatmul.mubr.msk.f32.gmra.mrb[18].mxu1 %vm424_vm10, %v9702_v9  ;;  %8444 = vmatprep.subr.bf16.mxu0 %v9766_v60 }
 0x32c   :  { %7822 = vmatprep.mubr.msk.f32.mxu1 %vm424_vm10, %v9692_v53 }
 0x32f   :  { %7823 = vmatmul.mubr.msk.f32.gmra.mrb[20].mxu1 %vm424_vm10, %v9683_v52 }
 0x330   :  { %7825 = vmatprep.mubr.msk.f32.mxu1 %vm424_vm10, %v9714_v25 }
 0x333   :  { %7826 = vmatmul.mubr.msk.f32.gmra.mrb[22].mxu1 %vm424_vm10, %v9705_v23 }
 0x3f2   :  { %v9769_v61 = vpop.f32.mrb[12].mxu1 }
 0x3f3   :  { %v9771_v7 = vpop.f32.mrb[13].mxu1  ;;  %v1184_v63 = vmul.f32 %v9769_v61, %v9677_v22  ;;  %v1204_v16 = vmul.f32 %v9769_v61, %v9769_v61 }
 0x3f4   :  { %v1183_v51 = vmul.f32 %v9771_v7, %v9686_v4  ;;  %v1203_v55 = vmul.f32 %v9771_v7, %v9771_v7 }
 0x3f6   :  { %v9773_v36 = vpop.f32.mrb[14].mxu1 }
 0x3f7   :  { %v9775_v10 = vpop.f32.mrb[15].mxu1  ;;  %v1186_v11 = vmul.f32 %v9773_v36, %v9699_v47  ;;  %v1206_v40 = vmul.f32 %v9773_v36, %v9773_v36 }
 0x3f8   :  { %v1185_v45 = vmul.f32 %v9775_v10, %v9708_v56  ;;  %v1205_v48 = vmul.f32 %v9775_v10, %v9775_v10 }
 0x3fa   :  { %v7818_v44 = vpop.f32.mrb[16].mxu1 }
 0x3fb   :  { %v1188_v38 = vmul.f32 %v7818_v44, %v9680_v50  ;;  %v1208_v17 = vmul.f32 %v7818_v44, %v7818_v44  ;;  %v9782_v46 = vpop.f32.mrb[17].mxu1 }
 0x3fc   :  { %v1187_v6 = vmul.f32 %v9782_v46, %v9689_v20  ;;  %v1207_v19 = vmul.f32 %v9782_v46, %v9782_v46 }
 0x3fd   :  { %v1192_v26 = vadd.f32 %v1188_v38, %v1184_v63  ;;  %v1212_v27 = vadd.f32 %v1208_v17, %v1204_v16 }
 0x3fe   :  { %v1191_v30 = vadd.f32 %v1187_v6, %v1183_v51  ;;  %v1211_v31 = vadd.f32 %v1207_v19, %v1203_v55  ;;  %v9792_v32 = vpop.f32.mrb[18].mxu1 }
 0x3ff   :  { %v1190_v41 = vmul.f32 %v9792_v32, %v9702_v9  ;;  %v1210_v43 = vmul.f32 %v9792_v32, %v9792_v32  ;;  %v9802_v39 = vpop.f32.mrb[19].mxu1 }
 0x400   :  { %v1189_v8 = vmul.f32 %v9802_v39, %v9711_v15  ;;  %v1209_v49 = vmul.f32 %v9802_v39, %v9802_v39 }
 0x401   :  { %v1194_v14 = vadd.f32 %v1190_v41, %v1186_v11  ;;  %v1214_v18 = vadd.f32 %v1210_v43, %v1206_v40 }
 0x402   :  { %v1193_v12 = vadd.f32 %v1189_v8, %v1185_v45  ;;  %v1213_v62 = vadd.f32 %v1209_v49, %v1205_v48  ;;  %v7824_v3 = vpop.f32.mrb[20].mxu1  ;;  %v1283_v45 = vmul.f32 0.2, %v9686_v4 }
 0x403   :  { %v1196_v37 = vmul.f32 %v7824_v3, %v9683_v52  ;;  %v1216_v21 = vmul.f32 %v7824_v3, %v7824_v3  ;;  %v1164_v29 = vpop.f32.mrb[21].mxu1 }
 0x404   :  { %v1195_v35 = vmul.f32 %v1164_v29, %v9692_v53  ;;  %v1215_v34 = vmul.f32 %v1164_v29, %v1164_v29 }
 0x405   :  { %v9814_v54 = vadd.f32 %v1196_v37, %v1192_v26  ;;  %v1220_v0 = vadd.f32 %v1216_v21, %v1212_v27 }
 0x406   :  { %v9816_v57 = vadd.f32 %v1195_v35, %v1191_v30  ;;  %v1219_v42 = vadd.f32 %v1215_v34, %v1211_v31  ;;  %v7827_v5 = vpop.f32.mrb[22].mxu1  ;;  %v1284_v31 = vmul.f32 0.2, %v9677_v22 }
 0x407   :  { %v1224_v2 = vadd.f32 1e-06, %v1220_v0  ;;  %v1198_v13 = vmul.f32 %v7827_v5, %v9705_v23  ;;  %v1218_v58 = vmul.f32 %v7827_v5, %v7827_v5  ;;  %v1174_v1 = vpop.f32.mrb[23].mxu1  ;;  %vm1260_vm7 = vcmp.ge.f32.partialorder %v9814_v54, 0.0 }
 0x408   :  { %v1223_v59 = vadd.f32 1e-06, %v1219_v42  ;;  %v1197_v63 = vmul.f32 %v1174_v1, %v9714_v25  ;;  %v1217_v16 = vmul.f32 %v1174_v1, %v1174_v1  ;;  %vm1259_vm8 = vcmp.ge.f32.partialorder %v9816_v57, 0.0 }
 0x409   :  { %9044 = vrcp.f32 %v1224_v2  ;;  %v9820_v38 = vadd.f32 %v1198_v13, %v1194_v14  ;;  %v1222_v17 = vadd.f32 %v1218_v58, %v1214_v18 }
 0x40a   :  { %9046 = vrcp.f32 %v1223_v59  ;;  %v9822_v51 = vadd.f32 %v1197_v63, %v1193_v12  ;;  %v1221_v55 = vadd.f32 %v1217_v16, %v1213_v62  ;;  %v6991_v59 = vld [vmem:[%s11604_s4 + $0xb0] sm:$0xff]  ;;  %v6992_v63 = vld [vmem:[%s11604_s4 + $0xb8] sm:$0xff] }
 0x40b   :  { %v1226_v6 = vadd.f32 1e-06, %v1222_v17  ;;  %vm1262_vm9 = vcmp.ge.f32.partialorder %v9820_v38, 0.0 }
 0x40c   :  { %v1225_v19 = vadd.f32 1e-06, %v1221_v55  ;;  %vm1261_vm11 = vcmp.ge.f32.partialorder %v9822_v51, 0.0 }
 0x40d   :  { %9048 = vrcp.f32 %v1226_v6  ;;  %v1285_v6 = vmul.f32 0.2, %v9708_v56 }
 0x40e   :  { %9050 = vrcp.f32 %v1225_v19 }
 0x413   :  { %v9045_v26 = vpop.eup %9044 }
 0x414   :  { %v9047_v27 = vpop.eup %9046  ;;  %v1232_v30 = vmul.f32 %v9045_v26, %v9814_v54  ;;  %v1287_v54 = vmul.f32 0.2, %v9689_v20 }
 0x415   :  { %v1231_v11 = vmul.f32 %v9047_v27, %v9816_v57 }
 0x416   :  { %v1236_v40 = vmul.f32 %v9769_v61, %v1232_v30  ;;  %v1240_v41 = vmul.f32 %v7818_v44, %v1232_v30  ;;  %v1244_v43 = vmul.f32 %v7824_v3, %v1232_v30 }
 0x417   :  { %v9049_v48 = vpop.eup %9048  ;;  %v1235_v8 = vmul.f32 %v1231_v11, %v9771_v7  ;;  %v1239_v49 = vmul.f32 %v1231_v11, %v9782_v46  ;;  %v1243_v14 = vmul.f32 %v1231_v11, %v1164_v29 }
 0x418   :  { %v9051_v18 = vpop.eup %9050  ;;  %v1248_v12 = vsub.f32 %v9677_v22, %v1236_v40  ;;  %v1234_v62 = vmul.f32 %v9049_v48, %v9820_v38  ;;  %v1252_v61 = vsub.f32 %v9680_v50, %v1240_v41  ;;  %v1256_v42 = vsub.f32 %v9683_v52, %v1244_v43 }
 0x419   :  { %v1247_v44 = vsub.f32 %v9686_v4, %v1235_v8  ;;  %v1251_v3 = vsub.f32 %v9689_v20, %v1239_v49  ;;  %v1233_v7 = vmul.f32 %v9051_v18, %v9822_v51  ;;  %v8447_v41 = vpack.c.bf16 %v6992_v63, %v6991_v59 }
 0x41a   :  { %v1272_v46 = vsel %vm1260_vm7, %v9677_v22, %v1248_v12  ;;  %v1238_v37 = vmul.f32 %v9773_v36, %v1234_v62  ;;  %v1242_v21 = vmul.f32 %v9792_v32, %v1234_v62  ;;  %v1246_v29 = vmul.f32 %v7827_v5, %v1234_v62 }
 0x41b   :  { %v1237_v35 = vmul.f32 %v1233_v7, %v9775_v10  ;;  %v1241_v34 = vmul.f32 %v1233_v7, %v9802_v39  ;;  %v1245_v0 = vmul.f32 %v1233_v7, %v1174_v1  ;;  %v1271_v22 = vsel %vm1259_vm8, %v9686_v4, %v1247_v44 }
 0x41c   :  { %v1250_v2 = vsub.f32 %v9699_v47, %v1238_v37  ;;  %v1254_v13 = vsub.f32 %v9702_v9, %v1242_v21  ;;  %v1296_v36 = vmul.f32 0.8, %v1272_v46  ;;  %v1255_v32 = vsub.f32 %v9692_v53, %v1243_v14 }
 0x41d   :  { %v1249_v10 = vsub.f32 %v9708_v56, %v1237_v35  ;;  %v1253_v39 = vsub.f32 %v9711_v15, %v1241_v34  ;;  %v1295_v5 = vmul.f32 0.8, %v1271_v22  ;;  %v1275_v1 = vsel %vm1259_vm8, %v9689_v20, %v1251_v3 }
 0x41e   :  { %v1274_v58 = vsel %vm1262_vm9, %v9699_v47, %v1250_v2  ;;  %v1276_v4 = vsel %vm1260_vm7, %v9680_v50, %v1252_v61  ;;  %v1258_v16 = vsub.f32 %v9705_v23, %v1246_v29  ;;  %v1257_v17 = vsub.f32 %v9714_v25, %v1245_v0  ;;  %v7082_v29 = vld.sshfl [vmem:[%s11605_s5 + $0x8] sm:$0x13 pattern:$0x75316420] }
 0x41f   :  { %v1273_v55 = vsel %vm1261_vm11, %v9708_v56, %v1249_v10  ;;  %v9878_v19 = vadd.f32 %v1295_v5, %v1283_v45  ;;  %v1277_v27 = vsel %vm1261_vm11, %v9711_v15, %v1253_v39  ;;  %v1278_v30 = vsel %vm1262_vm9, %v9702_v9, %v1254_v13 }
 0x420   :  { %v1297_v26 = vmul.f32 0.8, %v1273_v55  ;;  %v9886_v11 = vadd.f32 %v1296_v36, %v1284_v31  ;;  %v1298_v40 = vmul.f32 0.8, %v1274_v58  ;;  %v1299_v43 = vmul.f32 0.8, %v1275_v1 }
 0x421   :  { %11634 = vst [vmem:[#allocation5_spill] sm:$0xff] %v9878_v19  ;;  %7836 = vmatprep.mubr.msk.f32.mxu0 %vm424_vm10, %v9878_v19  ;;  %7862 = vmatprep.mubr.msk.f32.mxu1 %vm424_vm10, %v9878_v19  ;;  %v1279_v45 = vsel %vm1259_vm8, %v9692_v53, %v1255_v32  ;;  %v1280_v31 = vsel %vm1260_vm7, %v9683_v52, %v1256_v42  ;;  %v1286_v48 = vmul.f32 0.2, %v9699_v47  ;;  %v1300_v14 = vmul.f32 0.8, %v1276_v4 }
 0x422   :  { %11635 = vst [vmem:[#allocation6_spill] sm:$0xff] %v9886_v11  ;;  %v9892_v56 = vadd.f32 %v1297_v26, %v1285_v6  ;;  %7837 = vmatmul.mubr.msk.f32.vlgmr.msra.gmra.mrb[24].mxu0 %vm424_vm10, %v9886_v11  ;;  %7863 = vmatmul.mubr.msk.f32.vlgmr.msra.gmra.mrb[24].mxu1 %vm424_vm10, %v9886_v11  ;;  %v1281_v8 = vsel %vm1261_vm11, %v9714_v25, %v1257_v17  ;;  %v1301_v51 = vmul.f32 0.8, %v1277_v27  ;;  %v1288_v20 = vmul.f32 0.2, %v9680_v50 }
 0x423   :  { %v1282_v57 = vsel %vm1262_vm9, %v9705_v23, %v1258_v16  ;;  %v9916_v49 = vadd.f32 %v1298_v40, %v1286_v48  ;;  %8446 = vmatpush3.bf16.msra.mxu0 %v9766_v60  ;;  %v9919_v47 = vadd.f32 %v1299_v43, %v1287_v54  ;;  %v1289_v60 = vmul.f32 0.2, %v9711_v15 }
 0x424   :  { %11636 = vst [vmem:[#allocation7_spill] sm:$0xff] %v9892_v56  ;;  %7839 = vmatprep.mubr.msk.f32.mxu0 %vm424_vm10, %v9892_v56  ;;  %7865 = vmatprep.mubr.msk.f32.mxu1 %vm424_vm10, %v9892_v56  ;;  %v9931_v38 = vadd.f32 %v1300_v14, %v1288_v20  ;;  %v1302_v18 = vmul.f32 0.8, %v1278_v30  ;;  %v1303_v62 = vmul.f32 0.8, %v1279_v45  ;;  %v10010_v34 = vrot.slane %v7082_v29, %v9320_v24 }
 0x425   :  { %11637 = vst [vmem:[#allocation8_spill] sm:$0xff] %v9916_v49  ;;  %11638 = vst [vmem:[#allocation9_spill] sm:$0xff] %v9919_v47  ;;  %8448 = vmatprep.subr.bf16.mxu0 %v8447_v41  ;;  %v9933_v12 = vadd.f32 %v1301_v51, %v1289_v60  ;;  %v1290_v50 = vmul.f32 0.2, %v9702_v9  ;;  %v1291_v15 = vmul.f32 0.2, %v9692_v53  ;;  %v1488_v13 = vcombine.high %v7082_v29, %v7082_v29 }
 0x426   :  { %7840 = vmatmul.mubr.msk.f32.gmra.mrb[26].mxu0 %vm424_vm10, %v9916_v49  ;;  %7866 = vmatmul.mubr.msk.f32.gmra.mrb[26].mxu1 %vm424_vm10, %v9916_v49  ;;  %11639 = vst [vmem:[#allocation10_spill] sm:$0xff] %v9931_v38  ;;  %v1304_v44 = vmul.f32 0.8, %v1280_v31  ;;  %v1305_v7 = vmul.f32 0.8, %v1281_v8  ;;  %v10015_v2 = vrot.slane %v10010_v34, %v9327_v28 }
 0x427   :  { %7842 = vmatprep.mubr.msk.f32.mxu0 %vm424_vm10, %v9919_v47  ;;  %7868 = vmatprep.mubr.msk.f32.mxu1 %vm424_vm10, %v9919_v47  ;;  %11640 = vst [vmem:[#allocation11_spill] sm:$0xff] %v9933_v12  ;;  %v9945_v61 = vadd.f32 %v1302_v18, %v1290_v50  ;;  %v9947_v3 = vadd.f32 %v1303_v62, %v1291_v15  ;;  %v1292_v9 = vmul.f32 0.2, %v9683_v52  ;;  %v1293_v53 = vmul.f32 0.2, %v9714_v25 }
 0x428   :  { %8450 = vmatpush3.bf16.msra.mxu0 %v8447_v41  ;;  %v1306_v37 = vmul.f32 0.8, %v1282_v57  ;;  %v1294_v52 = vmul.f32 0.2, %v9705_v23  ;;  %v1502_v4 = vrot.slane %v1488_v13, %v9320_v24 }
 0x429   :  { %11641 = vst [vmem:[#allocation12_spill] sm:$0xff] %v9945_v61  ;;  %11642 = vst [vmem:[#allocation13_spill] sm:$0xff] %v9947_v3  ;;  %v9959_v46 = vadd.f32 %v1304_v44, %v1292_v9  ;;  %v9961_v21 = vadd.f32 %v1305_v7, %v1293_v53  ;;  %v7095_v23 = vld.sshfl [vmem:[%s11605_s5 + $0xc] sm:$0x13 pattern:$0x75316420] }
 0x42a   :  { %7843 = vmatmul.mubr.msk.f32.gmra.mrb[28].mxu0 %vm424_vm10, %v9931_v38  ;;  %7869 = vmatmul.mubr.msk.f32.gmra.mrb[28].mxu1 %vm424_vm10, %v9931_v38  ;;  %v9972_v25 = vadd.f32 %v1306_v37, %v1294_v52  ;;  %v1671_v35 = vrot.slane %v7095_v23, %v9320_v24  ;;  %v1664_v42 = vcombine.high %v7095_v23, %v7095_v23  ;;  %v7108_v52 = vld.sshfl [vmem:[%s11605_s5 + $0x10] sm:$0x13 pattern:$0x75316420] }
 0x42b   :  { %7845 = vmatprep.mubr.msk.f32.mxu0 %vm424_vm10, %v9933_v12  ;;  %7871 = vmatprep.mubr.msk.f32.mxu1 %vm424_vm10, %v9933_v12  ;;  %11643 = vst [vmem:[#allocation14_spill] sm:$0xff] %v9959_v46  ;;  %11644 = vst [vmem:[#allocation15_spill] sm:$0xff] %v9961_v21  ;;  %v10040_v41 = vrot.slane %v1502_v4, %v9327_v28 }
 0x42c   :  { %11645 = vst [vmem:[#allocation16_spill] sm:$0xff] %v9972_v25  ;;  %v1683_v0 = vrot.slane %v1671_v35, %v9327_v28  ;;  %v1678_v5 = vrot.slane %v1664_v42, %v9320_v24  ;;  %v1679_v14 = vcombine.high %v1671_v35, %v1671_v35 }
 0x42e   :  { %7846 = vmatmul.mubr.msk.f32.gmra.mrb[30].mxu0 %vm424_vm10, %v9945_v61  ;;  %7872 = vmatmul.mubr.msk.f32.gmra.mrb[30].mxu1 %vm424_vm10, %v9945_v61  ;;  %v1687_v30 = vrot.slane %v1678_v5, %v9327_v28  ;;  %v1691_v53 = vrot.slane %v1679_v14, %v9327_v28 }
 0x42f   :  { %7848 = vmatprep.mubr.msk.f32.mxu0 %vm424_vm10, %v9947_v3  ;;  %7874 = vmatprep.mubr.msk.f32.mxu1 %vm424_vm10, %v9947_v3 }
 0x432   :  { %7849 = vmatmul.mubr.msk.f32.gmra.mrb[32].mxu0 %vm424_vm10, %v9959_v46  ;;  %7875 = vmatmul.mubr.msk.f32.gmra.mrb[32].mxu1 %vm424_vm10, %v9959_v46 }
 0x433   :  { %7851 = vmatprep.mubr.msk.f32.mxu0 %vm424_vm10, %v9961_v21  ;;  %7877 = vmatprep.mubr.msk.f32.mxu1 %vm424_vm10, %v9961_v21 }
 0x436   :  { %7852 = vmatmul.mubr.msk.f32.gmra.mrb[34].mxu0 %vm424_vm10, %v9972_v25  ;;  %7878 = vmatmul.mubr.msk.f32.gmra.mrb[34].mxu1 %vm424_vm10, %v9972_v25 }
 0x437   :  { %7888 = vmatprep.mubr.msk.f32.mxu0 %vm424_vm10, %v9878_v19 }
 0x43a   :  { %7889 = vmatmul.mubr.msk.f32.vlgmr.msra.gmra.mrb[36].mxu0 %vm424_vm10, %v9886_v11 }
 0x43b   :  { %7891 = vmatprep.mubr.msk.f32.mxu0 %vm424_vm10, %v9892_v56 }
 0x43e   :  { %7892 = vmatmul.mubr.msk.f32.gmra.mrb[38].mxu0 %vm424_vm10, %v9916_v49 }
 0x43f   :  { %7894 = vmatprep.mubr.msk.f32.mxu0 %vm424_vm10, %v9919_v47 }
 0x442   :  { %7895 = vmatmul.mubr.msk.f32.gmra.mrb[40].mxu0 %vm424_vm10, %v9931_v38 }
 0x443   :  { %7897 = vmatprep.mubr.msk.f32.mxu0 %vm424_vm10, %v9933_v12 }
 0x446   :  { %7898 = vmatmul.mubr.msk.f32.gmra.mrb[42].mxu0 %vm424_vm10, %v9945_v61 }
 0x447   :  { %7900 = vmatprep.mubr.msk.f32.mxu0 %vm424_vm10, %v9947_v3 }
 0x44a   :  { %7901 = vmatmul.mubr.msk.f32.gmra.mrb[44].mxu0 %vm424_vm10, %v9959_v46 }
 0x44b   :  { %7903 = vmatprep.mubr.msk.f32.mxu0 %vm424_vm10, %v9961_v21 }
 0x44e   :  { %7904 = vmatmul.mubr.msk.f32.gmra.mrb[46].mxu0 %vm424_vm10, %v9972_v25 }
 0x4f5   :  { %v7838_v22 = vpop.f32.mrb[24].mxu0  ;;  %v7864_v36 = vpop.f32.mrb[24].mxu1 }
 0x4f6   :  { %v1696_v32 = vadd.f32 %v7864_v36, %v1683_v0  ;;  %v1421_v10 = vpop.f32.mrb[25].mxu0  ;;  %v1597_v39 = vpop.f32.mrb[25].mxu1  ;;  %v10054_v60 = vadd.f32 %v7838_v22, %v10015_v2 }
 0x4f7   :  { %v10019_v58 = vadd.f32 %v10015_v2, %v1421_v10  ;;  %v1695_v1 = vadd.f32 %v1683_v0, %v1597_v39 }
 0x4f9   :  { %v10028_v63 = vpop.f32.mrb[26].mxu0  ;;  %v7867_v16 = vpop.f32.mrb[26].mxu1  ;;  %7914 = vmatprep.mubr.msk.f32.mxu0 %vm1887_vm12, %v10019_v58  ;;  %v10032_v17 = vpack.i.bf16 %v1696_v32, %v1695_v1  ;;  %v8451_v55 = vpack.c.bf16 %v1696_v32, %v1695_v1  ;;  %v10084_v32 = vrot.slane %v7108_v52, %v9320_v24 }
 0x4fa   :  { %v1698_v6 = vadd.f32 %v7867_v16, %v1683_v0  ;;  %v1431_v26 = vpop.f32.mrb[27].mxu0  ;;  %v1607_v27 = vpop.f32.mrb[27].mxu1 }
 0x4fb   :  { %v1697_v40 = vadd.f32 %v1683_v0, %v1607_v27  ;;  %8785 = vrot.lane.b32.xlu0 %v10032_v17, %s9185_s12  ;;  %8453 = vmatprep.subr.msk.bf16.mxu0 %vm10024_vm13, %v8451_v55  ;;  %v10081_v42 = vadd.f32 %v10015_v2, %v1431_v26  ;;  %v1859_v26 = vrot.slane %v10084_v32, %v9327_v28 }
 0x4fc   :  { %8456 = vmatpush3.bf16.xpose.msk.msra.mxu0 %vm10024_vm13, %v8451_v55  ;;  %v1840_v27 = vcombine.high %v7108_v52, %v7108_v52 }
 0x4fd   :  { %v7844_v43 = vpop.f32.mrb[28].mxu0  ;;  %v7870_v45 = vpop.f32.mrb[28].mxu1  ;;  %v10044_v31 = vpack.i.bf16 %v1698_v6, %v1697_v40  ;;  %v8457_v48 = vpack.c.bf16 %v1698_v6, %v1697_v40  ;;  %v10104_v40 = vadd.f32 %v10028_v63, %v10015_v2  ;;  %v1503_v2 = vcombine.high %v10010_v34, %v10010_v34 }
 0x4fe   :  { %v1700_v8 = vadd.f32 %v7870_v45, %v1687_v30  ;;  %v1441_v54 = vpop.f32.mrb[29].mxu0  ;;  %v1617_v57 = vpop.f32.mrb[29].mxu1  ;;  %v1854_v14 = vrot.slane %v1840_v27, %v9320_v24 }
 0x4ff   :  { %v10047_v51 = vadd.f32 %v10040_v41, %v1441_v54  ;;  %v1699_v20 = vadd.f32 %v1687_v30, %v1617_v57  ;;  %8790 = vrot.lane.b32.xlu0 %v10044_v31, %s9185_s12  ;;  %8459 = vmatprep.subr.msk.bf16.mxu0 %vm10024_vm13, %v8457_v48  ;;  %v10115_v54 = vadd.f32 %v7844_v43, %v10040_v41 }
 0x501   :  { %v10056_v18 = vpop.f32.mrb[30].mxu0  ;;  %v7873_v62 = vpop.f32.mrb[30].mxu1  ;;  %7928 = vmatprep.mubr.msk.f32.mxu1 %vm1887_vm12, %v10047_v51  ;;  %v10060_v50 = vpack.i.bf16 %v1700_v8, %v1699_v20  ;;  %v8463_v15 = vpack.c.bf16 %v1700_v8, %v1699_v20 }
 0x502   :  { %v1702_v44 = vadd.f32 %v7873_v62, %v1687_v30  ;;  %v1451_v7 = vpop.f32.mrb[31].mxu0  ;;  %v1627_v9 = vpop.f32.mrb[31].mxu1 }
 0x503   :  { %v1701_v37 = vadd.f32 %v1687_v30, %v1627_v9  ;;  %2544 = vrot.lane.b32.xlu0 %v10054_v60, %s9185_s12  ;;  %8795 = vrot.lane.b32.xlu1 %v10060_v50, %s9185_s12 }
 0x504   :  { %8465 = vmatprep.subr.msk.bf16.mxu1 %vm10024_vm13, %v8463_v15  ;;  %8462 = vmatpush3.bf16.xpose.msk.msra.mxu0 %vm10024_vm13, %v8457_v48 }
 0x505   :  { %8468 = vmatpush3.bf16.xpose.msk.msra.mxu1 %vm10024_vm13, %v8463_v15  ;;  %v10076_v23 = vpop.f32.mrb[32].mxu0  ;;  %v7876_v29 = vpop.f32.mrb[32].mxu1  ;;  %v8469_v35 = vpack.c.bf16 %v1702_v44, %v1701_v37  ;;  %v10078_v0 = vpack.i.bf16 %v1702_v44, %v1701_v37  ;;  %v10131_v15 = vadd.f32 %v10040_v41, %v1451_v7  ;;  %v1515_v44 = vrot.slane %v1503_v2, %v9327_v28 }
 0x506   :  { %v1704_v13 = vadd.f32 %v7876_v29, %v1691_v53  ;;  %v1461_v22 = vpop.f32.mrb[33].mxu0  ;;  %v1637_v36 = vpop.f32.mrb[33].mxu1  ;;  %v1863_v37 = vrot.slane %v1854_v14, %v9327_v28  ;;  %v10139_v29 = vadd.f32 %v10056_v18, %v10040_v41  ;;  %v1855_v7 = vcombine.high %v10084_v32, %v10084_v32 }
 0x507   :  { %v1703_v10 = vadd.f32 %v1691_v53, %v1637_v36  ;;  %2542 = vrot.lane.b32.xlu1 %v10019_v58, %s9185_s12  ;;  %8471 = vmatprep.subr.msk.bf16.mxu1 %vm10024_vm13, %v8469_v35  ;;  %v10153_v41 = vadd.f32 %v1515_v44, %v1461_v22 }
 0x508   :  { %2546 = vrot.lane.b32.xlu0 %v10081_v42, %s9185_s12  ;;  %v1867_v27 = vrot.slane %v1855_v7, %v9327_v28 }
 0x509   :  { %v10092_v39 = vpop.f32.mrb[34].mxu0  ;;  %v7879_v5 = vpop.f32.mrb[34].mxu1  ;;  %v10094_v1 = vpack.i.bf16 %v1704_v13, %v1703_v10  ;;  %v8475_v4 = vpack.c.bf16 %v1704_v13, %v1703_v10 }
 0x50a   :  { %v1706_v16 = vadd.f32 %v7879_v5, %v1691_v53  ;;  %v1471_v55 = vpop.f32.mrb[35].mxu0  ;;  %v1647_v6 = vpop.f32.mrb[35].mxu1 }
 0x50b   :  { %v1705_v30 = vadd.f32 %v1691_v53, %v1647_v6  ;;  %8800 = vrot.lane.b32.xlu1 %v10078_v0, %s9185_s12  ;;  %7915 = vmatmul.mubr.msk.f32.vlgmr.msra.gmra.mrb[48].mxu0 %vm1887_vm12, %v10054_v60 }
 0x50c   :  { %8805 = vrot.lane.b32.xlu0 %v10094_v1, %s9185_s12  ;;  %7917 = vmatprep.mubr.msk.f32.mxu0 %vm1887_vm12, %v10081_v42 }
 0x50d   :  { %8474 = vmatpush3.bf16.xpose.msk.msra.mxu1 %vm10024_vm13, %v8469_v35  ;;  %v7890_v45 = vpop.f32.mrb[36].mxu0  ;;  %v8481_v48 = vpack.c.bf16 %v1706_v16, %v1705_v30  ;;  %v10112_v8 = vpack.i.bf16 %v1706_v16, %v1705_v30  ;;  %v10169_v16 = vadd.f32 %v1515_v44, %v1471_v55 }
 0x50e   :  { %v1872_v63 = vadd.f32 %v7890_v45, %v1859_v26  ;;  %8477 = vmatprep.subr.msk.bf16.mxu1 %vm10024_vm13, %v8475_v4  ;;  %v1773_v57 = vpop.f32.mrb[37].mxu0  ;;  %v10176_v45 = vadd.f32 %v10076_v23, %v1515_v44  ;;  %v10189_v23 = vadd.f32 %v10092_v39, %v1515_v44 }
 0x50f   :  { %v1871_v20 = vadd.f32 %v1859_v26, %v1773_v57  ;;  %2548 = vrot.lane.b32.xlu1 %v10104_v40, %s9185_s12  ;;  %7918 = vmatmul.mubr.msk.f32.gmra.mrb[50].mxu0 %vm1887_vm12, %v10104_v40 }
 0x510   :  { %2661 = vrot.lane.b32.xlu0 %v10115_v54, %s9185_s12 }
 0x511   :  { %v7893_v43 = vpop.f32.mrb[38].mxu0  ;;  %v8487_v62 = vpack.c.bf16 %v1872_v63, %v1871_v20  ;;  %v10128_v34 = vpack.i.bf16 %v1872_v63, %v1871_v20 }
 0x512   :  { %v1874_v9 = vadd.f32 %v7893_v43, %v1859_v26  ;;  %v1783_v53 = vpop.f32.mrb[39].mxu0 }
 0x513   :  { %v1873_v52 = vadd.f32 %v1859_v26, %v1783_v53  ;;  %2659 = vrot.lane.b32.xlu1 %v10047_v51, %s9185_s12  ;;  %8488 = vmatprep.subr.bf16.mxu0 %v8487_v62 }
 0x514   :  { %7929 = vmatmul.mubr.msk.f32.vlgmr.msra.gmra.mrb[36].mxu1 %vm1887_vm12, %v10115_v54  ;;  %2663 = vrot.lane.b32.xlu0 %v10131_v15, %s9185_s12 }
 0x515   :  { %7931 = vmatprep.mubr.msk.f32.mxu1 %vm1887_vm12, %v10131_v15  ;;  %8480 = vmatpush3.bf16.xpose.msk.msra.mxu1 %vm10024_vm13, %v8475_v4  ;;  %v7896_v35 = vpop.f32.mrb[40].mxu0  ;;  %v8491_v13 = vpack.c.bf16 %v1874_v9, %v1873_v52  ;;  %v10151_v36 = vpack.i.bf16 %v1874_v9, %v1873_v52 }
 0x516   :  { %8490 = vmatpush3.bf16.msra.mxu0 %v8487_v62  ;;  %v1876_v18 = vadd.f32 %v7896_v35, %v1863_v37  ;;  %8483 = vmatprep.subr.msk.bf16.mxu1 %vm10024_vm13, %v8481_v48  ;;  %v1793_v10 = vpop.f32.mrb[41].mxu0 }
 0x517   :  { %v1875_v5 = vadd.f32 %v1863_v37, %v1793_v10  ;;  %8810 = vrot.lane.b32.xlu1 %v10112_v8, %s9185_s12  ;;  %8492 = vmatprep.subr.bf16.mxu0 %v8491_v13 }
 0x518   :  { %7932 = vmatmul.mubr.msk.f32.gmra.mrb[38].mxu1 %vm1887_vm12, %v10139_v29  ;;  %2776 = vrot.lane.b32.xlu0 %v10153_v41, %s9185_s12 }
 0x519   :  { %7942 = vmatprep.mubr.msk.f32.mxu1 %vm1887_vm12, %v10153_v41  ;;  %v7899_v22 = vpop.f32.mrb[42].mxu0  ;;  %v10165_v32 = vpack.c.bf16 %v1876_v18, %v1875_v5  ;;  %v10167_v4 = vpack.i.bf16 %v1876_v18, %v1875_v5 }
 0x51a   :  { %8494 = vmatpush3.bf16.msra.mxu0 %v8491_v13  ;;  %v1878_v6 = vadd.f32 %v7899_v22, %v1863_v37  ;;  %v1803_v26 = vpop.f32.mrb[43].mxu0 }
 0x51b   :  { %v1877_v30 = vadd.f32 %v1863_v37, %v1803_v26  ;;  %2665 = vrot.lane.b32.xlu1 %v10139_v29, %s9185_s12  ;;  %8496 = vmatprep.subr.bf16.mxu0 %v10165_v32 }
 0x51c   :  { %2780 = vrot.lane.b32.xlu0 %v10169_v16, %s9185_s12 }
 0x51d   :  { %8486 = vmatpush3.bf16.xpose.msk.msra.mxu1 %vm10024_vm13, %v8481_v48  ;;  %v7902_v55 = vpop.f32.mrb[44].mxu0  ;;  %v10182_v2 = vpack.i.bf16 %v1878_v6, %v1877_v30  ;;  %v10184_v63 = vpack.c.bf16 %v1878_v6, %v1877_v30 }
 0x51e   :  { %v1880_v57 = vadd.f32 %v7902_v55, %v1867_v27  ;;  %v1813_v14 = vpop.f32.mrb[45].mxu0 }
 0x51f   :  { %v1879_v20 = vadd.f32 %v1867_v27, %v1813_v14  ;;  %2778 = vrot.lane.b32.xlu1 %v10176_v45, %s9185_s12 }
 0x521   :  { %v7905_v43 = vpop.f32.mrb[46].mxu0  ;;  %v10191_v62 = vpack.i.bf16 %v1880_v57, %v1879_v20  ;;  %v10193_v9 = vpack.c.bf16 %v1880_v57, %v1879_v20 }
 0x522   :  { %v1882_v48 = vadd.f32 %v7905_v43, %v1867_v27  ;;  %v1823_v53 = vpop.f32.mrb[47].mxu0 }
 0x523   :  { %v1881_v37 = vadd.f32 %v1867_v27, %v1823_v53  ;;  %2782 = vrot.lane.b32.xlu1 %v10189_v23, %s9185_s12 }
 0x524   :  { %7943 = vmatmul.mubr.msk.f32.vlgmr.msra.gmra.mrb[36].mxu1 %vm1887_vm12, %v10176_v45 }
 0x525   :  { %7945 = vmatprep.mubr.msk.f32.mxu1 %vm1887_vm12, %v10169_v16  ;;  %v10201_v52 = vpack.i.bf16 %v1882_v48, %v1881_v37  ;;  %v10203_v39 = vpack.c.bf16 %v1882_v48, %v1881_v37 }
 0x528   :  { %7946 = vmatmul.mubr.msk.f32.gmra.mrb[38].mxu1 %vm1887_vm12, %v10189_v23 }
 0x56d   :  { %v8786_v44 = vpop.permute.xlu0 %8785 }
 0x56e   :  { %v8788_v7 = vunpack.i.h.bf16 %v8786_v44  ;;  %v8787_v35 = vunpack.i.l.bf16 %v8786_v44 }
 0x570   :  { %v8511_v13 = vpack.c.bf16 %v8788_v7, %v8787_v35 }
 0x571   :  { %v8791_v18 = vpop.permute.xlu0 %8790 }
 0x572   :  { %v8793_v10 = vunpack.i.h.bf16 %v8791_v18  ;;  %v8792_v5 = vunpack.i.l.bf16 %v8791_v18  ;;  %8513 = vmatprep.subr.msk.bf16.mxu1 %vm10024_vm13, %v8511_v13 }
 0x573   :  { %8516 = vmatpush3.bf16.xpose.msk.msra.mxu1 %vm10024_vm13, %v8511_v13 }
 0x574   :  { %v8517_v22 = vpack.c.bf16 %v8793_v10, %v8792_v5 }
 0x575   :  { %v8796_v6 = vpop.permute.xlu1 %8795  ;;  %v2545_v30 = vpop.permute.xlu0 %2544 }
 0x576   :  { %v8798_v26 = vunpack.i.h.bf16 %v8796_v6  ;;  %v8797_v27 = vunpack.i.l.bf16 %v8796_v6  ;;  %8519 = vmatprep.subr.msk.bf16.mxu1 %vm10024_vm13, %v8517_v22 }
 0x578   :  { %v8523_v57 = vpack.c.bf16 %v8798_v26, %v8797_v27 }
 0x579   :  { %v2543_v55 = vpop.permute.xlu1 %2542 }
 0x57a   :  { %7998 = vmatprep.mubr.msk.f32.mxu1 %vm1887_vm12, %v2543_v55  ;;  %v2547_v14 = vpop.permute.xlu0 %2546 }
 0x57b   :  { %8522 = vmatpush3.bf16.xpose.msk.msra.mxu1 %vm10024_vm13, %v8517_v22 }
 0x57c   :  { %8525 = vmatprep.subr.msk.bf16.mxu1 %vm10024_vm13, %v8523_v57 }
 0x57d   :  { %v8801_v20 = vpop.permute.xlu1 %8800 }
 0x57e   :  { %v8803_v43 = vunpack.i.h.bf16 %v8801_v20  ;;  %v8802_v48 = vunpack.i.l.bf16 %v8801_v20  ;;  %v8806_v44 = vpop.permute.xlu0 %8805 }
 0x57f   :  { %v8808_v35 = vunpack.i.h.bf16 %v8806_v44  ;;  %v8807_v13 = vunpack.i.l.bf16 %v8806_v44 }
 0x580   :  { %v8529_v37 = vpack.c.bf16 %v8803_v43, %v8802_v48 }
 0x581   :  { %v2549_v53 = vpop.permute.xlu1 %2548  ;;  %v8535_v18 = vpack.c.bf16 %v8808_v35, %v8807_v13 }
 0x582   :  { %7999 = vmatmul.mubr.msk.f32.vlgmr.msra.gmra.mrb[40].mxu1 %vm1887_vm12, %v2545_v30  ;;  %v2662_v10 = vpop.permute.xlu0 %2661 }
 0x583   :  { %8001 = vmatprep.mubr.msk.f32.mxu1 %vm1887_vm12, %v2547_v14  ;;  %8528 = vmatpush3.bf16.xpose.msk.msra.mxu1 %vm10024_vm13, %v8523_v57 }
 0x584   :  { %8531 = vmatprep.subr.msk.bf16.mxu1 %vm10024_vm13, %v8529_v37 }
 0x585   :  { %v2660_v7 = vpop.permute.xlu1 %2659 }
 0x586   :  { %8002 = vmatmul.mubr.msk.f32.gmra.mrb[42].mxu1 %vm1887_vm12, %v2549_v53  ;;  %v2664_v26 = vpop.permute.xlu0 %2663 }
 0x587   :  { %8012 = vmatprep.mubr.msk.f32.mxu1 %vm1887_vm12, %v2660_v7 }
 0x589   :  { %v8811_v5 = vpop.permute.xlu1 %8810 }
 0x58a   :  { %v8813_v22 = vunpack.i.h.bf16 %v8811_v5  ;;  %v8812_v6 = vunpack.i.l.bf16 %v8811_v5  ;;  %v2777_v55 = vpop.permute.xlu0 %2776  ;;  %v10251_v5 = vld [vmem:[%s11607_s1] sm:$0xff] }
 0x58b   :  { %8534 = vmatpush3.bf16.xpose.msk.msra.mxu1 %vm10024_vm13, %v8529_v37 }
 0x58c   :  { %8537 = vmatprep.subr.msk.bf16.mxu1 %vm10024_vm13, %v8535_v18  ;;  %v8541_v27 = vpack.c.bf16 %v8813_v22, %v8812_v6 }
 0x58d   :  { %v2666_v30 = vpop.permute.xlu1 %2665 }
 0x58e   :  { %v2781_v14 = vpop.permute.xlu0 %2780 }
 0x591   :  { %v2779_v57 = vpop.permute.xlu1 %2778 }
 0x592   :  { %8013 = vmatmul.mubr.msk.f32.vlgmr.msra.gmra.mrb[40].mxu1 %vm1887_vm12, %v2662_v10 }
 0x593   :  { %8015 = vmatprep.mubr.msk.f32.mxu1 %vm1887_vm12, %v2664_v26  ;;  %8540 = vmatpush3.bf16.xpose.msk.msra.mxu1 %vm10024_vm13, %v8535_v18  ;;  %v10246_v18 = vld [vmem:[%s11607_s1 + $0x8] sm:$0xff] }
 0x594   :  { %8543 = vmatprep.subr.msk.bf16.mxu1 %vm10024_vm13, %v8541_v27 }
 0x595   :  { %v2783_v20 = vpop.permute.xlu1 %2782 }
 0x596   :  { %8016 = vmatmul.mubr.msk.f32.gmra.mrb[42].mxu1 %vm1887_vm12, %v2666_v30 }
 0x597   :  { %8026 = vmatprep.mubr.msk.f32.mxu1 %vm1887_vm12, %v2777_v55 }
 0x59b   :  { %8546 = vmatpush3.bf16.xpose.msk.msra.mxu1 %vm10024_vm13, %v8541_v27 }
 0x5a2   :  { %8027 = vmatmul.mubr.msk.f32.vlgmr.msra.gmra.mrb[40].mxu1 %vm1887_vm12, %v2779_v57 }
 0x5a3   :  { %8029 = vmatprep.mubr.msk.f32.mxu1 %vm1887_vm12, %v2781_v14 }
 0x5a6   :  { %8030 = vmatmul.mubr.msk.f32.gmra.mrb[42].mxu1 %vm1887_vm12, %v2783_v20  ;;  %v10259_v20 = vld [vmem:[%s11607_s1 + $0x10] sm:$0xff] }
 0x5de   :  { %v7916_v43 = vpop.f32.mrb[48].mxu0 }
 0x5df   :  { %v1978_v48 = vpop.f32.mrb[49].mxu0 }
 0x5e2   :  { %v7919_v53 = vpop.f32.mrb[50].mxu0 }
 0x5e3   :  { %v1988_v37 = vpop.f32.mrb[51].mxu0 }
 0x5f7   :  { %v7944_v44 = vpop.f32.mrb[36].mxu1 }
 0x5f8   :  { %v8737_v7 = vadd.f32 %v7944_v44, %v7916_v43  ;;  %v2196_v35 = vpop.f32.mrb[37].mxu1 }
 0x5f9   :  { %v8738_v13 = vadd.f32 %v2196_v35, %v1978_v48 }
 0x5fa   :  { %v2224_v10 = vmul.f32 0.20412415, %v8737_v7 }
 0x5fb   :  { %v2223_v22 = vmul.f32 0.20412415, %v8738_v13  ;;  %v7947_v6 = vpop.f32.mrb[38].mxu1 }
 0x5fc   :  { %v8739_v26 = vadd.f32 %v7947_v6, %v7919_v53  ;;  %v2206_v27 = vpop.f32.mrb[39].mxu1  ;;  %v2228_v30 = vadd.f32 %v2224_v10, %v10246_v18  ;;  %v10265_v53 = vld [vmem:[%s11607_s1 + $0x18] sm:$0xff] }
 0x5fd   :  { %v8740_v55 = vadd.f32 %v2206_v27, %v1988_v37  ;;  %v2227_v57 = vadd.f32 %v2223_v22, %v10251_v5 }
 0x5fe   :  { %v2234_v14 = vsel %vm424_vm10, %v2228_v30, -inf  ;;  %v2226_v43 = vmul.f32 0.20412415, %v8739_v26 }
 0x5ff   :  { %v2225_v48 = vmul.f32 0.20412415, %v8740_v55  ;;  %2235 = vmax.xlane.f32.xlu1 %v2234_v14  ;;  %v2231_v44 = vsel %vm424_vm10, %v2227_v57, -inf }
 0x600   :  { %2232 = vmax.xlane.f32.xlu0 %v2231_v44  ;;  %v2230_v35 = vadd.f32 %v2226_v43, %v10265_v53 }
 0x601   :  { %v2229_v37 = vadd.f32 %v2225_v48, %v10259_v20 }
 0x602   :  { %v2240_v13 = vsel %vm424_vm10, %v2230_v35, -inf }
 0x603   :  { %v2237_v7 = vsel %vm424_vm10, %v2229_v37, -inf }
 0x604   :  { %2238 = vmax.xlane.f32.xlu0 %v2237_v7 }
 0x608   :  { %2241 = vmax.xlane.f32.xlu0 %v2240_v13 }
 0x675   :  { %v8028_v10 = vpop.f32.mrb[40].mxu1 }
 0x676   :  { %v2902_v22 = vmul.f32 0.20412415, %v8028_v10  ;;  %v2874_v6 = vpop.f32.mrb[41].mxu1 }
 0x677   :  { %v2901_v26 = vmul.f32 0.20412415, %v2874_v6 }
 0x678   :  { %v2906_v27 = vadd.f32 %v2902_v22, %v10246_v18 }
 0x679   :  { %v8031_v55 = vpop.f32.mrb[42].mxu1  ;;  %v2905_v14 = vadd.f32 %v2901_v26, %v10251_v5 }
 0x67a   :  { %v2904_v44 = vmul.f32 0.20412415, %v8031_v55  ;;  %v2884_v33 = vpop.f32.mrb[43].mxu1  ;;  %v2912_v48 = vsel %vm424_vm10, %v2906_v27, -inf }
 0x67b   :  { %2913 = vmax.xlane.f32.xlu0 %v2912_v48  ;;  %v2909_v43 = vsel %vm424_vm10, %v2905_v14, -inf }
 0x67c   :  { %2910 = vmax.xlane.f32.xlu1 %v2909_v43  ;;  %v2908_v7 = vadd.f32 %v2904_v44, %v10265_v53 }
 0x67e   :  { %v2918_v13 = vsel %vm424_vm10, %v2908_v7, -inf }
 0x67f   :  { %2919 = vmax.xlane.f32.xlu0 %v2918_v13 }
 0x68c   :  { %v2236_v10 = vpop.xlane.xlu1 %2235 }
 0x68d   :  { %v2244_v6 = vsub.f32 %v2228_v30, %v2236_v10  ;;  %v2233_v21 = vpop.xlane.xlu0 %2232  ;;  %8815 = vrot.lane.b32.xlu1 %v10128_v34, %s9185_s12 }
 0x68e   :  { %v2243_v43 = vsub.f32 %v2227_v57, %v2233_v21 }
 0x68f   :  { %v2249_v22 = vmul.f32 1.442695, %v2244_v6  ;;  %v2903_v6 = vmul.f32 0.20412415, %v2884_v33 }
 0x690   :  { %v2247_v13 = vmul.f32 1.442695, %v2243_v43 }
 0x691   :  { %9052 = vpow2.f32 %v2249_v22  ;;  %v2239_v26 = vpop.xlane.xlu0 %2238 }
 0x692   :  { %v2245_v21 = vsub.f32 %v2229_v37, %v2239_v26 }
 0x694   :  { %v2251_v57 = vmul.f32 1.442695, %v2245_v21 }
 0x695   :  { %v2242_v55 = vpop.xlane.xlu0 %2241 }
 0x696   :  { %v2246_v25 = vsub.f32 %v2230_v35, %v2242_v55  ;;  %v2907_v35 = vadd.f32 %v2903_v6, %v10259_v20 }
 0x698   :  { %v2253_v48 = vmul.f32 1.442695, %v2246_v25  ;;  %v2915_v25 = vsel %vm424_vm10, %v2907_v35, -inf }
 0x69a   :  { %9054 = vpow2.f32 %v2253_v48 }
 0x69b   :  { %v10279_v3 = vpop.eup %9052  ;;  %9056 = vpow2.f32 %v2247_v13 }
 0x69c   :  { %v2258_v44 = vsel %vm424_vm10, %v10279_v3, 0.0  ;;  %9058 = vpow2.f32 %v2251_v57 }
 0x69d   :  { %2259 = vadd.xlane.f32.xlu0 %v2258_v44 }
 0x6a4   :  { %v10283_v30 = vpop.eup %9054 }
 0x6a5   :  { %v2264_v10 = vsel %vm424_vm10, %v10283_v30, 0.0  ;;  %v9057_v22 = vpop.eup %9056 }
 0x6a6   :  { %2265 = vadd.xlane.f32.xlu0 %v2264_v10  ;;  %v2255_v55 = vsel %vm424_vm10, %v9057_v22, 0.0  ;;  %v10294_v48 = vpop.eup %9058 }
 0x6a7   :  { %v2261_v33 = vsel %vm424_vm10, %v10294_v48, 0.0 }
 0x6b1   :  { %2916 = vmax.xlane.f32.xlu1 %v2915_v25 }
 0x6b5   :  { %2256 = vadd.xlane.f32.xlu1 %v2255_v55 }
 0x6bc   :  { %8820 = vrot.lane.b32.xlu0 %v10151_v36, %s9185_s12 }
 0x6c6   :  { %8825 = vrot.lane.b32.xlu1 %v10167_v4, %s9185_s12 }
 0x6ea   :  { %2262 = vadd.xlane.f32.xlu1 %v2261_v33 }
 0x6fb   :  { %8830 = vrot.lane.b32.xlu1 %v10182_v2, %s9185_s12 }
 0x708   :  { %v2914_v44 = vpop.xlane.xlu0 %2913 }
 0x709   :  { %v2922_v43 = vsub.f32 %v2906_v27, %v2914_v44  ;;  %v2911_v13 = vpop.xlane.xlu1 %2910 }
 0x70a   :  { %v2921_v10 = vsub.f32 %v2905_v14, %v2911_v13 }
 0x70b   :  { %v2927_v6 = vmul.f32 1.442695, %v2922_v43 }
 0x70c   :  { %v2925_v25 = vmul.f32 1.442695, %v2921_v10  ;;  %v2920_v55 = vpop.xlane.xlu0 %2919 }
 0x70d   :  { %9060 = vpow2.f32 %v2927_v6  ;;  %v2924_v37 = vsub.f32 %v2908_v7, %v2920_v55  ;;  %v10316_v7 = vpop.permute.xlu1 %8815 }
 0x70e   :  { %9062 = vpow2.f32 %v2925_v25 }
 0x70f   :  { %v2931_v26 = vmul.f32 1.442695, %v2924_v37 }
 0x711   :  { %9064 = vpow2.f32 %v2931_v26 }
 0x717   :  { %v10300_v21 = vpop.eup %9060 }
 0x718   :  { %v2936_v57 = vsel %vm424_vm10, %v10300_v21, 0.0  ;;  %v10304_v33 = vpop.eup %9062 }
 0x719   :  { %2937 = vadd.xlane.f32.xlu0 %v2936_v57  ;;  %v2933_v14 = vsel %vm424_vm10, %v10304_v33, 0.0 }
 0x71b   :  { %v10306_v56 = vpop.eup %9064 }
 0x71c   :  { %v2942_v27 = vsel %vm424_vm10, %v10306_v56, 0.0 }
 0x71d   :  { %2943 = vadd.xlane.f32.xlu0 %v2942_v27 }
 0x71f   :  { %2934 = vadd.xlane.f32.xlu1 %v2933_v14 }
 0x72a   :  { %v2260_v43 = vpop.xlane.xlu0 %2259 }
 0x72b   :  { %9066 = vrcp.f32 %v2260_v43  ;;  %v8818_v43 = vunpack.i.h.bf16 %v10316_v7 }
 0x733   :  { %8835 = vrot.lane.b32.xlu0 %v10191_v62, %s9185_s12 }
 0x735   :  { %v9067_v25 = vpop.eup %9066 }
 0x736   :  { %v2272_v57 = vmul.f32 %v9067_v25, %v10279_v3 }
 0x737   :  { %8845 = vrot.lane.b32.xlu0 %v10032_v17, %s9186_s22 }
 0x73b   :  { %8855 = vrot.lane.b32.xlu0 %v10060_v50, %s9186_s22 }
 0x73e   :  { %v2917_v44 = vpop.xlane.xlu1 %2916 }
 0x73f   :  { %v2923_v13 = vsub.f32 %v2907_v35, %v2917_v44  ;;  %3270 = vrot.lane.b32.xlu0 %v10054_v60, %s9186_s22 }
 0x741   :  { %v2929_v10 = vmul.f32 1.442695, %v2923_v13  ;;  %v8817_v13 = vunpack.i.l.bf16 %v10316_v7 }
 0x742   :  { %v2257_v6 = vpop.xlane.xlu1 %2256 }
 0x743   :  { %9068 = vpow2.f32 %v2929_v10  ;;  %3272 = vrot.lane.b32.xlu0 %v10081_v42, %s9186_s22 }
 0x744   :  { %9070 = vrcp.f32 %v2257_v6  ;;  %v8547_v6 = vpack.c.bf16 %v8818_v43, %v8817_v13 }
 0x746   :  { %v8826_v3 = vpop.permute.xlu1 %8825 }
 0x747   :  { %8865 = vrot.lane.b32.xlu0 %v10094_v1, %s9186_s22  ;;  %v8828_v7 = vunpack.i.h.bf16 %v8826_v3  ;;  %v8827_v25 = vunpack.i.l.bf16 %v8826_v3 }
 0x74b   :  { %3387 = vrot.lane.b32.xlu0 %v10115_v54, %s9186_s22 }
 0x74d   :  { %v10328_v55 = vpop.eup %9068 }
 0x74e   :  { %v9071_v35 = vpop.eup %9070  ;;  %v2939_v37 = vsel %vm424_vm10, %v10328_v55, 0.0 }
 0x74f   :  { %2940 = vadd.xlane.f32.xlu1 %v2939_v37  ;;  %3389 = vrot.lane.b32.xlu0 %v10131_v15, %s9186_s22  ;;  %v2271_v26 = vmul.f32 %v9071_v35, %v9057_v22 }
 0x751   :  { %7956 = vmatprep.mubr.msk.f32.mxu0 %vm424_vm10, %v2271_v26 }
 0x752   :  { %7957 = vmatmul.mubr.msk.f32.vlgmr.msra.gmra.mrb[52].mxu0 %vm424_vm10, %v2272_v57 }
 0x753   :  { %8498 = vmatpush3.bf16.msra.mxu0 %v10165_v32  ;;  %3502 = vrot.lane.b32.xlu0 %v10153_v41, %s9186_s22  ;;  %v2266_v32 = vpop.xlane.xlu0 %2265 }
 0x754   :  { %8500 = vmatprep.subr.bf16.mxu0 %v10184_v63  ;;  %9072 = vrcp.f32 %v2266_v32 }
 0x757   :  { %8502 = vmatpush3.bf16.msra.mxu0 %v10184_v63  ;;  %3506 = vrot.lane.b32.xlu0 %v10169_v16, %s9186_s22  ;;  %v8821_v10 = vpop.permute.xlu0 %8820 }
 0x758   :  { %8504 = vmatprep.subr.bf16.mxu0 %v10193_v9 }
 0x75e   :  { %v9073_v22 = vpop.eup %9072 }
 0x75f   :  { %v2274_v44 = vmul.f32 %v9073_v22, %v10283_v30  ;;  %v8823_v30 = vunpack.i.h.bf16 %v8821_v10 }
 0x760   :  { %8840 = vrot.lane.b32.xlu1 %v10201_v52, %s9185_s12 }
 0x764   :  { %8850 = vrot.lane.b32.xlu1 %v10044_v31, %s9186_s22 }
 0x768   :  { %3268 = vrot.lane.b32.xlu1 %v10019_v58, %s9186_s22 }
 0x76c   :  { %8860 = vrot.lane.b32.xlu1 %v10078_v0, %s9186_s22 }
 0x770   :  { %3274 = vrot.lane.b32.xlu1 %v10104_v40, %s9186_s22 }
 0x774   :  { %3385 = vrot.lane.b32.xlu1 %v10047_v51, %s9186_s22 }
 0x777   :  { %v2263_v63 = vpop.xlane.xlu1 %2262 }
 0x778   :  { %9074 = vrcp.f32 %v2263_v63  ;;  %8870 = vrot.lane.b32.xlu1 %v10112_v8, %s9186_s22 }
 0x77b   :  { %v8831_v37 = vpop.permute.xlu1 %8830 }
 0x77c   :  { %3391 = vrot.lane.b32.xlu1 %v10139_v29, %s9186_s22  ;;  %v8833_v22 = vunpack.i.h.bf16 %v8831_v37 }
 0x780   :  { %3504 = vrot.lane.b32.xlu1 %v10176_v45, %s9186_s22 }
 0x782   :  { %v9075_v27 = vpop.eup %9074 }
 0x783   :  { %v2273_v14 = vmul.f32 %v9075_v27, %v10294_v48  ;;  %v8822_v48 = vunpack.i.l.bf16 %v8821_v10 }
 0x784   :  { %3508 = vrot.lane.b32.xlu1 %v10189_v23, %s9186_s22 }
 0x785   :  { %7959 = vmatprep.mubr.msk.f32.mxu0 %vm424_vm10, %v2273_v14  ;;  %v8551_v35 = vpack.c.bf16 %v8823_v30, %v8822_v48 }
 0x786   :  { %7960 = vmatmul.mubr.msk.f32.gmra.mrb[54].mxu0 %vm424_vm10, %v2274_v44 }
 0x787   :  { %7970 = vmatprep.mubr.msk.f32.mxu0 %vm424_vm10, %v2271_v26 }
 0x78a   :  { %7971 = vmatmul.mubr.msk.f32.vlgmr.msra.gmra.mrb[56].mxu0 %vm424_vm10, %v2272_v57 }
 0x78b   :  { %8506 = vmatpush3.bf16.msra.mxu0 %v10193_v9  ;;  %7973 = vmatprep.mubr.msk.f32.mxu0 %vm424_vm10, %v2273_v14  ;;  %v8555_v9 = vpack.c.bf16 %v8828_v7, %v8827_v25 }
 0x78c   :  { %8508 = vmatprep.subr.bf16.mxu0 %v10203_v39 }
 0x78e   :  { %7974 = vmatmul.mubr.msk.f32.gmra.mrb[58].mxu0 %vm424_vm10, %v2274_v44 }
 0x78f   :  { %8510 = vmatpush3.bf16.msra.mxu0 %v10203_v39  ;;  %7984 = vmatprep.mubr.msk.f32.mxu0 %vm424_vm10, %v2271_v26 }
 0x790   :  { %8548 = vmatprep.subr.bf16.mxu0 %v8547_v6 }
 0x792   :  { %7985 = vmatmul.mubr.msk.f32.vlgmr.msra.gmra.mrb[60].mxu0 %vm424_vm10, %v2272_v57  ;;  %v8832_v57 = vunpack.i.l.bf16 %v8831_v37 }
 0x793   :  { %8550 = vmatpush3.bf16.msra.mxu0 %v8547_v6  ;;  %7987 = vmatprep.mubr.msk.f32.mxu0 %vm424_vm10, %v2273_v14 }
 0x794   :  { %8552 = vmatprep.subr.bf16.mxu0 %v8551_v35  ;;  %v8559_v10 = vpack.c.bf16 %v8833_v22, %v8832_v57 }
 0x796   :  { %7988 = vmatmul.mubr.msk.f32.gmra.mrb[62].mxu0 %vm424_vm10, %v2274_v44 }
 0x797   :  { %8554 = vmatpush3.bf16.msra.mxu0 %v8551_v35 }
 0x798   :  { %8556 = vmatprep.subr.bf16.mxu0 %v8555_v9 }
 0x7a6   :  { %v2938_v32 = vpop.xlane.xlu0 %2937 }
 0x7a7   :  { %9076 = vrcp.f32 %v2938_v32 }
 0x7aa   :  { %v2944_v26 = vpop.xlane.xlu0 %2943 }
 0x7ac   :  { %v2935_v39 = vpop.xlane.xlu1 %2934 }
 0x7ad   :  { %9078 = vrcp.f32 %v2935_v39 }
 0x7ae   :  { %v8836_v27 = vpop.permute.xlu0 %8835  ;;  %9080 = vrcp.f32 %v2944_v26 }
 0x7af   :  { %v8838_v44 = vunpack.i.h.bf16 %v8836_v27  ;;  %v8837_v13 = vunpack.i.l.bf16 %v8836_v27 }
 0x7b1   :  { %v9077_v63 = vpop.eup %9076  ;;  %v8563_v30 = vpack.c.bf16 %v8838_v44, %v8837_v13 }
 0x7b2   :  { %v2950_v14 = vmul.f32 %v9077_v63, %v10300_v21 }
 0x7b7   :  { %v9079_v3 = vpop.eup %9078 }
 0x7b8   :  { %v2949_v43 = vmul.f32 %v9079_v3, %v10304_v33  ;;  %v9081_v6 = vpop.eup %9080 }
 0x7b9   :  { %v2952_v25 = vmul.f32 %v9081_v6, %v10306_v56 }
 0x7ba   :  { %8040 = vmatprep.mubr.msk.f32.mxu0 %vm424_vm10, %v2949_v43 }
 0x7bb   :  { %8041 = vmatmul.mubr.msk.f32.vlgmr.msra.gmra.mrb[64].mxu0 %vm424_vm10, %v2950_v14 }
 0x7bc   :  { %8558 = vmatpush3.bf16.msra.mxu0 %v8555_v9  ;;  %v8846_v9 = vpop.permute.xlu0 %8845 }
 0x7bd   :  { %8560 = vmatprep.subr.bf16.mxu0 %v8559_v10  ;;  %v8848_v32 = vunpack.i.h.bf16 %v8846_v9  ;;  %v8847_v39 = vunpack.i.l.bf16 %v8846_v9 }
 0x7c0   :  { %8562 = vmatpush3.bf16.msra.mxu0 %v8559_v10  ;;  %v8856_v22 = vpop.permute.xlu0 %8855 }
 0x7c1   :  { %8564 = vmatprep.subr.bf16.mxu0 %v8563_v30  ;;  %v8857_v44 = vunpack.i.l.bf16 %v8856_v22 }
 0x7dc   :  { %v2941_v48 = vpop.xlane.xlu1 %2940 }
 0x7dd   :  { %9082 = vrcp.f32 %v2941_v48 }
 0x7e0   :  { %v8841_v33 = vpop.permute.xlu1 %8840 }
 0x7e1   :  { %v8843_v35 = vunpack.i.h.bf16 %v8841_v33  ;;  %v8842_v37 = vunpack.i.l.bf16 %v8841_v33 }
 0x7e3   :  { %v8567_v26 = vpack.c.bf16 %v8843_v35, %v8842_v37 }
 0x7e4   :  { %v8851_v56 = vpop.permute.xlu1 %8850 }
 0x7e5   :  { %v8853_v63 = vunpack.i.h.bf16 %v8851_v56  ;;  %v8852_v3 = vunpack.i.l.bf16 %v8851_v56 }
 0x7e7   :  { %v9083_v7 = vpop.eup %9082  ;;  %v8577_v27 = vpack.c.bf16 %v8853_v63, %v8852_v3 }
 0x7e8   :  { %v2951_v21 = vmul.f32 %v9083_v7, %v10328_v55  ;;  %v8571_v55 = vpack.c.bf16 %v8848_v32, %v8847_v39  ;;  %v3269_v57 = vpop.permute.xlu1 %3268 }
 0x7ea   :  { %8043 = vmatprep.mubr.msk.f32.mxu0 %vm424_vm10, %v2951_v21 }
 0x7eb   :  { %8044 = vmatmul.mubr.msk.f32.gmra.mrb[66].mxu0 %vm424_vm10, %v2952_v25 }
 0x7ec   :  { %8054 = vmatprep.mubr.msk.f32.mxu0 %vm424_vm10, %v2949_v43  ;;  %v8861_v13 = vpop.permute.xlu1 %8860 }
 0x7ed   :  { %v8863_v48 = vunpack.i.h.bf16 %v8861_v13  ;;  %v8862_v6 = vunpack.i.l.bf16 %v8861_v13 }
 0x7ef   :  { %8055 = vmatmul.mubr.msk.f32.vlgmr.msra.gmra.mrb[68].mxu0 %vm424_vm10, %v2950_v14  ;;  %v8589_v33 = vpack.c.bf16 %v8863_v48, %v8862_v6 }
 0x7f0   :  { %8566 = vmatpush3.bf16.msra.mxu0 %v8563_v30  ;;  %8057 = vmatprep.mubr.msk.f32.mxu0 %vm424_vm10, %v2951_v21  ;;  %v3275_v7 = vpop.permute.xlu1 %3274 }
 0x7f1   :  { %8568 = vmatprep.subr.bf16.mxu0 %v8567_v26 }
 0x7f3   :  { %8058 = vmatmul.mubr.msk.f32.gmra.mrb[70].mxu0 %vm424_vm10, %v2952_v25 }
 0x7f4   :  { %8570 = vmatpush3.bf16.msra.mxu0 %v8567_v26  ;;  %8068 = vmatprep.mubr.msk.f32.mxu0 %vm424_vm10, %v2949_v43  ;;  %v8858_v43 = vunpack.i.h.bf16 %v8856_v22 }
 0x7f5   :  { %8573 = vmatprep.subr.msk.bf16.mxu0 %vm10024_vm13, %v8571_v55 }
 0x7f6   :  { %v8583_v10 = vpack.c.bf16 %v8858_v43, %v8857_v44 }
 0x7f7   :  { %8069 = vmatmul.mubr.msk.f32.vlgmr.msra.gmra.mrb[72].mxu0 %vm424_vm10, %v2950_v14  ;;  %v3271_v14 = vpop.permute.xlu0 %3270 }
 0x7f8   :  { %8071 = vmatprep.mubr.msk.f32.mxu0 %vm424_vm10, %v2951_v21 }
 0x7fb   :  { %8072 = vmatmul.mubr.msk.f32.gmra.mrb[74].mxu0 %vm424_vm10, %v2952_v25  ;;  %v3273_v30 = vpop.permute.xlu0 %3272  ;;  %v3386_v25 = vpop.permute.xlu1 %3385 }
 0x7fc   :  { %8082 = vmatprep.mubr.msk.f32.mxu0 %vm1887_vm12, %v3269_v57 }
 0x7fd   :  { %8576 = vmatpush3.bf16.xpose.msk.msra.mxu0 %vm10024_vm13, %v8571_v55 }
 0x7fe   :  { %8579 = vmatprep.subr.msk.bf16.mxu0 %vm10024_vm13, %v8577_v27 }
 0x7ff   :  { %v8866_v21 = vpop.permute.xlu0 %8865  ;;  %v8871_v39 = vpop.permute.xlu1 %8870 }
 0x800   :  { %v8868_v35 = vunpack.i.h.bf16 %v8866_v21  ;;  %v8867_v37 = vunpack.i.l.bf16 %v8866_v21  ;;  %v8873_v26 = vunpack.i.h.bf16 %v8871_v39  ;;  %v8872_v55 = vunpack.i.l.bf16 %v8871_v39 }
 0x802   :  { %v8595_v9 = vpack.c.bf16 %v8868_v35, %v8867_v37  ;;  %v8601_v63 = vpack.c.bf16 %v8873_v26, %v8872_v55 }
 0x803   :  { %v3388_v32 = vpop.permute.xlu0 %3387  ;;  %v3392_v3 = vpop.permute.xlu1 %3391 }
 0x805   :  { %8582 = vmatpush3.bf16.xpose.msk.msra.mxu0 %vm10024_vm13, %v8577_v27 }
 0x806   :  { %8585 = vmatprep.subr.msk.bf16.mxu0 %vm10024_vm13, %v8583_v10 }
 0x807   :  { %v3390_v56 = vpop.permute.xlu0 %3389  ;;  %v3505_v43 = vpop.permute.xlu1 %3504 }
 0x80b   :  { %v3503_v22 = vpop.permute.xlu0 %3502 }
 0x80c   :  { %8083 = vmatmul.mubr.msk.f32.vlgmr.msra.gmra.mrb[76].mxu0 %vm1887_vm12, %v3271_v14  ;;  %v3509_v14 = vpop.permute.xlu1 %3508 }
 0x80d   :  { %8085 = vmatprep.mubr.msk.f32.mxu0 %vm1887_vm12, %v3273_v30  ;;  %8588 = vmatpush3.bf16.xpose.msk.msra.mxu0 %vm10024_vm13, %v8583_v10 }
 0x80e   :  { %8591 = vmatprep.subr.msk.bf16.mxu0 %vm10024_vm13, %v8589_v33 }
 0x80f   :  { %v3507_v44 = vpop.permute.xlu0 %3506 }
 0x810   :  { %8086 = vmatmul.mubr.msk.f32.gmra.mrb[78].mxu0 %vm1887_vm12, %v3275_v7 }
 0x811   :  { %8096 = vmatprep.mubr.msk.f32.mxu0 %vm1887_vm12, %v3386_v25 }
 0x815   :  { %8594 = vmatpush3.bf16.xpose.msk.msra.mxu0 %vm10024_vm13, %v8589_v33 }
 0x816   :  { %8597 = vmatprep.subr.msk.bf16.mxu0 %vm10024_vm13, %v8595_v9 }
 0x81c   :  { %8097 = vmatmul.mubr.msk.f32.vlgmr.msra.gmra.mrb[76].mxu0 %vm1887_vm12, %v3388_v32 }
 0x81d   :  { %8099 = vmatprep.mubr.msk.f32.mxu0 %vm1887_vm12, %v3390_v56  ;;  %8600 = vmatpush3.bf16.xpose.msk.msra.mxu0 %vm10024_vm13, %v8595_v9 }
 0x81e   :  { %8603 = vmatprep.subr.msk.bf16.mxu0 %vm10024_vm13, %v8601_v63 }
 0x820   :  { %8100 = vmatmul.mubr.msk.f32.gmra.mrb[78].mxu0 %vm1887_vm12, %v3392_v3 }
 0x821   :  { %8110 = vmatprep.mubr.msk.f32.mxu0 %vm1887_vm12, %v3503_v22 }
 0x825   :  { %v10429_v57 = vpop.f32.mrb[52].mxu0  ;;  %8606 = vmatpush3.bf16.xpose.msk.msra.mxu0 %vm10024_vm13, %v8601_v63 }
 0x826   :  { %v10433_v27 = vpop.f32.mrb[53].mxu0 }
 0x82c   :  { %8111 = vmatmul.mubr.msk.f32.vlgmr.msra.gmra.mrb[76].mxu0 %vm1887_vm12, %v3505_v43 }
 0x82d   :  { %8113 = vmatprep.mubr.msk.f32.mxu0 %vm1887_vm12, %v3507_v44 }
 0x830   :  { %8114 = vmatmul.mubr.msk.f32.gmra.mrb[78].mxu0 %vm1887_vm12, %v3509_v14 }
 0x859   :  { %v10438_v13 = vpop.f32.mrb[54].mxu0 }
 0x85a   :  { %v10440_v10 = vpop.f32.mrb[55].mxu0 }
 0x85d   :  { %v10442_v30 = vpop.f32.mrb[56].mxu0 }
 0x85e   :  { %v10444_v48 = vpop.f32.mrb[57].mxu0 }
 0x861   :  { %v10446_v6 = vpop.f32.mrb[58].mxu0 }
 0x862   :  { %11648 = vst [vmem:[#allocation17_spill] sm:$0xff] %v10446_v6  ;;  %v10448_v7 = vpop.f32.mrb[59].mxu0 }
 0x865   :  { %v10450_v33 = vpop.f32.mrb[60].mxu0 }
 0x866   :  { %11649 = vst [vmem:[#allocation18_spill] sm:$0xff] %v10450_v33  ;;  %v10452_v21 = vpop.f32.mrb[61].mxu0 }
 0x867   :  { %11650 = vst [vmem:[#allocation19_spill] sm:$0xff] %v10452_v21 }
 0x869   :  { %v10454_v25 = vpop.f32.mrb[62].mxu0 }
 0x86a   :  { %11651 = vst [vmem:[#allocation20_spill] sm:$0xff] %v10454_v25  ;;  %v10456_v35 = vpop.f32.mrb[63].mxu0 }
 0x86b   :  { %11652 = vst [vmem:[#allocation21_spill] sm:$0xff] %v10456_v35 }
 0x88e   :  { %v10458_v37 = vpop.f32.mrb[64].mxu0 }
 0x88f   :  { %v10460_v9 = vpop.f32.mrb[65].mxu0 }
 0x8be   :  { %v10462_v32 = vpop.f32.mrb[66].mxu0 }
 0x8bf   :  { %v10464_v39 = vpop.f32.mrb[67].mxu0 }
 0x8c2   :  { %v10466_v26 = vpop.f32.mrb[68].mxu0 }
 0x8c3   :  { %v10468_v55 = vpop.f32.mrb[69].mxu0 }
 0x8c6   :  { %v10470_v56 = vpop.f32.mrb[70].mxu0 }
 0x8c7   :  { %v10472_v63 = vpop.f32.mrb[71].mxu0 }
 0x8ca   :  { %v10474_v3 = vpop.f32.mrb[72].mxu0 }
 0x8cb   :  { %v10476_v22 = vpop.f32.mrb[73].mxu0 }
 0x8ce   :  { %v10478_v43 = vpop.f32.mrb[74].mxu0 }
 0x8cf   :  { %v10480_v44 = vpop.f32.mrb[75].mxu0 }
 0x8ff   :  { %v8112_v14 = vpop.f32.mrb[76].mxu0 }
 0x900   :  { %v3628_v46 = vmul.f32 0.20412415, %v8112_v14  ;;  %v3600_v49 = vpop.f32.mrb[77].mxu0 }
 0x901   :  { %v3627_v12 = vmul.f32 0.20412415, %v3600_v49 }
 0x902   :  { %v3632_v61 = vadd.f32 %v3628_v46, %v10246_v18 }
 0x903   :  { %v8115_v19 = vpop.f32.mrb[78].mxu0  ;;  %v3631_v11 = vadd.f32 %v3627_v12, %v10251_v5 }
 0x904   :  { %v3610_v47 = vpop.f32.mrb[79].mxu0  ;;  %v3638_v38 = vsel %vm424_vm10, %v3632_v61, -inf  ;;  %v3630_v28 = vmul.f32 0.20412415, %v8115_v19 }
 0x905   :  { %v3629_v24 = vmul.f32 0.20412415, %v3610_v47  ;;  %3639 = vmax.xlane.f32.xlu1 %v3638_v38  ;;  %v3635_v25 = vsel %vm424_vm10, %v3631_v11, -inf }
 0x906   :  { %3636 = vmax.xlane.f32.xlu0 %v3635_v25  ;;  %v3634_v49 = vadd.f32 %v3630_v28, %v10265_v53 }
 0x907   :  { %v3633_v35 = vadd.f32 %v3629_v24, %v10259_v20 }
 0x908   :  { %v3644_v46 = vsel %vm424_vm10, %v3634_v49, -inf }
 0x909   :  { %v3641_v14 = vsel %vm424_vm10, %v3633_v35, -inf }
 0x90a   :  { %3642 = vmax.xlane.f32.xlu0 %v3641_v14 }
 0x90e   :  { %3645 = vmax.xlane.f32.xlu0 %v3644_v46 }
 0x916   :  { %8875 = vrot.lane.b32.xlu1 %v10128_v34, %s9186_s22 }
 0x91a   :  { %8885 = vrot.lane.b32.xlu1 %v10167_v4, %s9186_s22 }
 0x91e   :  { %8890 = vrot.lane.b32.xlu1 %v10182_v2, %s9186_s22 }
 0x924   :  { %8880 = vrot.lane.b32.xlu0 %v10151_v36, %s9186_s22 }
 0x992   :  { %v3640_v24 = vpop.xlane.xlu1 %3639 }
 0x993   :  { %v3648_v19 = vsub.f32 %v3632_v61, %v3640_v24  ;;  %v3637_v47 = vpop.xlane.xlu0 %3636 }
 0x994   :  { %v3647_v28 = vsub.f32 %v3631_v11, %v3637_v47 }
 0x995   :  { %v3653_v38 = vmul.f32 1.442695, %v3648_v19 }
 0x996   :  { %v3651_v12 = vmul.f32 1.442695, %v3647_v28  ;;  %v8876_v18 = vpop.permute.xlu1 %8875 }
 0x997   :  { %9084 = vpow2.f32 %v3653_v38  ;;  %v8878_v5 = vunpack.i.h.bf16 %v8876_v18  ;;  %v8877_v20 = vunpack.i.l.bf16 %v8876_v18  ;;  %v3643_v53 = vpop.xlane.xlu0 %3642 }
 0x998   :  { %9086 = vpow2.f32 %v3651_v12  ;;  %v3649_v25 = vsub.f32 %v3633_v35, %v3643_v53 }
 0x999   :  { %v8607_v14 = vpack.c.bf16 %v8878_v5, %v8877_v20 }
 0x99a   :  { %v3655_v46 = vmul.f32 1.442695, %v3649_v25  ;;  %v8886_v21 = vpop.permute.xlu1 %8885 }
 0x99b   :  { %8608 = vmatprep.subr.bf16.mxu1 %v8607_v14  ;;  %v3646_v33 = vpop.xlane.xlu0 %3645  ;;  %v8888_v24 = vunpack.i.h.bf16 %v8886_v21  ;;  %v8887_v19 = vunpack.i.l.bf16 %v8886_v21 }
 0x99c   :  { %9088 = vpow2.f32 %v3655_v46  ;;  %v3650_v6 = vsub.f32 %v3634_v49, %v3646_v33  ;;  %8610 = vmatpush3.bf16.msra.mxu1 %v8607_v14 }
 0x99d   :  { %v8615_v20 = vpack.c.bf16 %v8888_v24, %v8887_v19 }
 0x99e   :  { %v3657_v61 = vmul.f32 1.442695, %v3650_v6 }
 0x99f   :  { %v8881_v11 = vpop.permute.xlu0 %8880 }
 0x9a0   :  { %9090 = vpow2.f32 %v3657_v61  ;;  %v8883_v47 = vunpack.i.h.bf16 %v8881_v11  ;;  %v8882_v28 = vunpack.i.l.bf16 %v8881_v11 }
 0x9a1   :  { %v9085_v38 = vpop.eup %9084 }
 0x9a2   :  { %v9087_v18 = vpop.eup %9086  ;;  %v3662_v12 = vsel %vm424_vm10, %v9085_v38, 0.0  ;;  %v8611_v35 = vpack.c.bf16 %v8883_v47, %v8882_v28 }
 0x9a3   :  { %3663 = vadd.xlane.f32.xlu0 %v3662_v12  ;;  %v3659_v5 = vsel %vm424_vm10, %v9087_v18, 0.0 }
 0x9a4   :  { %3660 = vadd.xlane.f32.xlu1 %v3659_v5  ;;  %8612 = vmatprep.subr.bf16.mxu1 %v8611_v35 }
 0x9a5   :  { %8614 = vmatpush3.bf16.msra.mxu1 %v8611_v35 }
 0x9a6   :  { %v9089_v33 = vpop.eup %9088  ;;  %8616 = vmatprep.subr.bf16.mxu1 %v8615_v20 }
 0x9a7   :  { %v3665_v6 = vsel %vm424_vm10, %v9089_v33, 0.0 }
 0x9a8   :  { %3666 = vadd.xlane.f32.xlu1 %v3665_v6 }
 0x9aa   :  { %v9091_v21 = vpop.eup %9090 }
 0x9ab   :  { %v3668_v49 = vsel %vm424_vm10, %v9091_v21, 0.0 }
 0x9ac   :  { %3669 = vadd.xlane.f32.xlu0 %v3668_v49 }
 0x9b9   :  { %8900 = vrot.lane.b32.xlu1 %v10201_v52, %s9186_s22 }
 0x9bd   :  { %8910 = vrot.lane.b32.xlu1 %v10044_v31, %s9187_s23 }
 0x9c1   :  { %3982 = vrot.lane.b32.xlu1 %v10019_v58, %s9187_s23  ;;  %v8891_v58 = vpop.permute.xlu1 %8890 }
 0x9c2   :  { %8895 = vrot.lane.b32.xlu0 %v10191_v62, %s9186_s22 }
 0x9c5   :  { %8920 = vrot.lane.b32.xlu1 %v10078_v0, %s9187_s23 }
 0x9c6   :  { %8905 = vrot.lane.b32.xlu0 %v10032_v17, %s9187_s23 }
 0x9c9   :  { %3988 = vrot.lane.b32.xlu1 %v10104_v40, %s9187_s23 }
 0x9ca   :  { %8915 = vrot.lane.b32.xlu0 %v10060_v50, %s9187_s23 }
 0x9cd   :  { %4099 = vrot.lane.b32.xlu1 %v10047_v51, %s9187_s23 }
 0x9ce   :  { %3984 = vrot.lane.b32.xlu0 %v10054_v60, %s9187_s23 }
 0x9d1   :  { %8930 = vrot.lane.b32.xlu1 %v10112_v8, %s9187_s23 }
 0x9d2   :  { %3986 = vrot.lane.b32.xlu0 %v10081_v42, %s9187_s23  ;;  %v8893_v42 = vunpack.i.h.bf16 %v8891_v58 }
 0x9d5   :  { %4105 = vrot.lane.b32.xlu1 %v10139_v29, %s9187_s23 }
 0x9d6   :  { %8925 = vrot.lane.b32.xlu0 %v10094_v1, %s9187_s23  ;;  %v8892_v1 = vunpack.i.l.bf16 %v8891_v58 }
 0x9d9   :  { %4218 = vrot.lane.b32.xlu1 %v10176_v45, %s9187_s23 }
 0x9da   :  { %4101 = vrot.lane.b32.xlu0 %v10115_v54, %s9187_s23 }
 0x9dd   :  { %4222 = vrot.lane.b32.xlu1 %v10189_v23, %s9187_s23 }
 0x9de   :  { %4103 = vrot.lane.b32.xlu0 %v10131_v15, %s9187_s23 }
 0x9e2   :  { %4216 = vrot.lane.b32.xlu0 %v10153_v41, %s9187_s23 }
 0x9e6   :  { %4220 = vrot.lane.b32.xlu0 %v10169_v16, %s9187_s23  ;;  %v8619_v16 = vpack.c.bf16 %v8893_v42, %v8892_v1 }
 0xa30   :  { %v3664_v17 = vpop.xlane.xlu0 %3663 }
 0xa31   :  { %9092 = vrcp.f32 %v3664_v17  ;;  %v3661_v31 = vpop.xlane.xlu1 %3660 }
 0xa32   :  { %9094 = vrcp.f32 %v3661_v31 }
 0xa35   :  { %v3667_v51 = vpop.xlane.xlu1 %3666 }
 0xa36   :  { %9096 = vrcp.f32 %v3667_v51 }
 0xa39   :  { %v3670_v60 = vpop.xlane.xlu0 %3669  ;;  %v8901_v53 = vpop.permute.xlu1 %8900 }
 0xa3a   :  { %9098 = vrcp.f32 %v3670_v60  ;;  %v8903_v46 = vunpack.i.h.bf16 %v8901_v53  ;;  %v8902_v61 = vunpack.i.l.bf16 %v8901_v53 }
 0xa3b   :  { %v9093_v50 = vpop.eup %9092 }
 0xa3c   :  { %v9095_v0 = vpop.eup %9094  ;;  %v3676_v54 = vmul.f32 %v9093_v50, %v9085_v38  ;;  %v8627_v47 = vpack.c.bf16 %v8903_v46, %v8902_v61 }
 0xa3d   :  { %v8896_v40 = vpop.permute.xlu0 %8895  ;;  %v3675_v8 = vmul.f32 %v9095_v0, %v9087_v18  ;;  %v8911_v38 = vpop.permute.xlu1 %8910 }
 0xa3e   :  { %v8898_v29 = vunpack.i.h.bf16 %v8896_v40  ;;  %v8897_v41 = vunpack.i.l.bf16 %v8896_v40  ;;  %v8913_v18 = vunpack.i.h.bf16 %v8911_v38  ;;  %v8912_v12 = vunpack.i.l.bf16 %v8911_v38 }
 0xa3f   :  { %8124 = vmatprep.mubr.msk.f32.mxu1 %vm424_vm10, %v3675_v8 }
 0xa40   :  { %v9097_v15 = vpop.eup %9096  ;;  %8125 = vmatmul.mubr.msk.f32.vlgmr.msra.gmra.mrb[44].mxu1 %vm424_vm10, %v3676_v54  ;;  %v8623_v25 = vpack.c.bf16 %v8898_v29, %v8897_v41 }
 0xa41   :  { %8618 = vmatpush3.bf16.msra.mxu1 %v8615_v20  ;;  %v3677_v45 = vmul.f32 %v9097_v15, %v9089_v33  ;;  %v8906_v24 = vpop.permute.xlu0 %8905  ;;  %v3983_v35 = vpop.permute.xlu1 %3982  ;;  %v8637_v20 = vpack.c.bf16 %v8913_v18, %v8912_v12 }
 0xa42   :  { %8620 = vmatprep.subr.bf16.mxu1 %v8619_v16  ;;  %v8908_v11 = vunpack.i.h.bf16 %v8906_v24  ;;  %v8907_v19 = vunpack.i.l.bf16 %v8906_v24 }
 0xa43   :  { %8127 = vmatprep.mubr.msk.f32.mxu1 %vm424_vm10, %v3677_v45 }
 0xa44   :  { %v9099_v23 = vpop.eup %9098  ;;  %v8631_v28 = vpack.c.bf16 %v8908_v11, %v8907_v19 }
 0xa45   :  { %8622 = vmatpush3.bf16.msra.mxu1 %v8619_v16  ;;  %v3678_v14 = vmul.f32 %v9099_v23, %v9091_v21  ;;  %v8916_v5 = vpop.permute.xlu0 %8915  ;;  %v8921_v49 = vpop.permute.xlu1 %8920 }
 0xa46   :  { %8624 = vmatprep.subr.bf16.mxu1 %v8623_v25  ;;  %v8918_v33 = vunpack.i.h.bf16 %v8916_v5  ;;  %v8917_v6 = vunpack.i.l.bf16 %v8916_v5  ;;  %v8923_v31 = vunpack.i.h.bf16 %v8921_v49  ;;  %v8922_v51 = vunpack.i.l.bf16 %v8921_v49  ;;  %v9180_v49 = vld [vmem:[%s11607_s1 + $0x8] sm:$0xff] }
 0xa47   :  { %8128 = vmatmul.mubr.msk.f32.gmra.mrb[46].mxu1 %vm424_vm10, %v3678_v14 }
 0xa48   :  { %8138 = vmatprep.mubr.msk.f32.mxu1 %vm424_vm10, %v3675_v8  ;;  %v8643_v58 = vpack.c.bf16 %v8918_v33, %v8917_v6  ;;  %v8649_v50 = vpack.c.bf16 %v8923_v31, %v8922_v51  ;;  %v9181_v31 = vld [vmem:[%s11607_s1] sm:$0xff] }
 0xa49   :  { %v3985_v21 = vpop.permute.xlu0 %3984  ;;  %v3989_v60 = vpop.permute.xlu1 %3988 }
 0xa4b   :  { %8139 = vmatmul.mubr.msk.f32.vlgmr.msra.gmra.mrb[48].mxu1 %vm424_vm10, %v3676_v54 }
 0xa4c   :  { %8626 = vmatpush3.bf16.msra.mxu1 %v8623_v25  ;;  %8141 = vmatprep.mubr.msk.f32.mxu1 %vm424_vm10, %v3677_v45 }
 0xa4d   :  { %8628 = vmatprep.subr.bf16.mxu1 %v8627_v47  ;;  %v3987_v17 = vpop.permute.xlu0 %3986  ;;  %v4100_v42 = vpop.permute.xlu1 %4099 }
 0xa4f   :  { %8142 = vmatmul.mubr.msk.f32.gmra.mrb[50].mxu1 %vm424_vm10, %v3678_v14 }
 0xa50   :  { %8630 = vmatpush3.bf16.msra.mxu1 %v8627_v47  ;;  %8152 = vmatprep.mubr.msk.f32.mxu1 %vm424_vm10, %v3675_v8 }
 0xa51   :  { %8633 = vmatprep.subr.msk.bf16.mxu1 %vm10024_vm13, %v8631_v28  ;;  %v8926_v0 = vpop.permute.xlu0 %8925  ;;  %v8931_v15 = vpop.permute.xlu1 %8930 }
 0xa52   :  { %v8928_v1 = vunpack.i.h.bf16 %v8926_v0  ;;  %v8927_v40 = vunpack.i.l.bf16 %v8926_v0  ;;  %v8933_v29 = vunpack.i.h.bf16 %v8931_v15  ;;  %v8932_v41 = vunpack.i.l.bf16 %v8931_v15  ;;  %v9183_v15 = vld [vmem:[%s11607_s1 + $0x18] sm:$0xff] }
 0xa53   :  { %8153 = vmatmul.mubr.msk.f32.vlgmr.msra.gmra.mrb[52].mxu1 %vm424_vm10, %v3676_v54 }
 0xa54   :  { %8155 = vmatprep.mubr.msk.f32.mxu1 %vm424_vm10, %v3677_v45  ;;  %v8655_v8 = vpack.c.bf16 %v8928_v1, %v8927_v40  ;;  %v8661_v45 = vpack.c.bf16 %v8933_v29, %v8932_v41  ;;  %v9182_v40 = vld [vmem:[%s11607_s1 + $0x10] sm:$0xff]  ;;  %s9188_s1 = smov 8  }
 0xa55   :  { %v4102_v54 = vpop.permute.xlu0 %4101  ;;  %v4106_v23 = vpop.permute.xlu1 %4105 }
 0xa57   :  { %8156 = vmatmul.mubr.msk.f32.gmra.mrb[54].mxu1 %vm424_vm10, %v3678_v14 }
 0xa58   :  { %8166 = vmatprep.mubr.msk.f32.mxu1 %vm1887_vm12, %v3983_v35 }
 0xa59   :  { %8636 = vmatpush3.bf16.xpose.msk.msra.mxu1 %vm10024_vm13, %v8631_v28  ;;  %v4104_v16 = vpop.permute.xlu0 %4103  ;;  %v4219_v25 = vpop.permute.xlu1 %4218 }
 0xa5a   :  { %8639 = vmatprep.subr.msk.bf16.mxu1 %vm10024_vm13, %v8637_v20 }
 0xa5d   :  { %v4217_v53 = vpop.permute.xlu0 %4216  ;;  %v4223_v46 = vpop.permute.xlu1 %4222 }
 0xa61   :  { %8642 = vmatpush3.bf16.xpose.msk.msra.mxu1 %vm10024_vm13, %v8637_v20  ;;  %v4221_v14 = vpop.permute.xlu0 %4220 }
 0xa62   :  { %8645 = vmatprep.subr.msk.bf16.mxu1 %vm10024_vm13, %v8643_v58 }
 0xa68   :  { %8167 = vmatmul.mubr.msk.f32.vlgmr.msra.gmra.mrb[56].mxu1 %vm1887_vm12, %v3985_v21 }
 0xa69   :  { %8169 = vmatprep.mubr.msk.f32.mxu1 %vm1887_vm12, %v3987_v17  ;;  %8648 = vmatpush3.bf16.xpose.msk.msra.mxu1 %vm10024_vm13, %v8643_v58 }
 0xa6a   :  { %8651 = vmatprep.subr.msk.bf16.mxu1 %vm10024_vm13, %v8649_v50 }
 0xa6c   :  { %8170 = vmatmul.mubr.msk.f32.gmra.mrb[58].mxu1 %vm1887_vm12, %v3989_v60 }
 0xa6d   :  { %8180 = vmatprep.mubr.msk.f32.mxu1 %vm1887_vm12, %v4100_v42 }
 0xa71   :  { %8654 = vmatpush3.bf16.xpose.msk.msra.mxu1 %vm10024_vm13, %v8649_v50 }
 0xa72   :  { %8657 = vmatprep.subr.msk.bf16.mxu1 %vm10024_vm13, %v8655_v8 }
 0xa78   :  { %8181 = vmatmul.mubr.msk.f32.vlgmr.msra.gmra.mrb[56].mxu1 %vm1887_vm12, %v4102_v54 }
 0xa79   :  { %8183 = vmatprep.mubr.msk.f32.mxu1 %vm1887_vm12, %v4104_v16  ;;  %8660 = vmatpush3.bf16.xpose.msk.msra.mxu1 %vm10024_vm13, %v8655_v8 }
 0xa7a   :  { %8663 = vmatprep.subr.msk.bf16.mxu1 %vm10024_vm13, %v8661_v45 }
 0xa7c   :  { %8184 = vmatmul.mubr.msk.f32.gmra.mrb[58].mxu1 %vm1887_vm12, %v4106_v23 }
 0xa7d   :  { %8194 = vmatprep.mubr.msk.f32.mxu1 %vm1887_vm12, %v4217_v53 }
 0xa81   :  { %8666 = vmatpush3.bf16.xpose.msk.msra.mxu1 %vm10024_vm13, %v8661_v45 }
 0xa88   :  { %8195 = vmatmul.mubr.msk.f32.vlgmr.msra.gmra.mrb[56].mxu1 %vm1887_vm12, %v4219_v25 }
 0xa89   :  { %8197 = vmatprep.mubr.msk.f32.mxu1 %vm1887_vm12, %v4221_v14 }
 0xa8c   :  { %8198 = vmatmul.mubr.msk.f32.gmra.mrb[58].mxu1 %vm1887_vm12, %v4223_v46 }
 0xb13   :  { %v10590_v61 = vpop.f32.mrb[44].mxu1 }
 0xb14   :  { %v10592_v24 = vpop.f32.mrb[45].mxu1 }
 0xb1a   :  { %v10594_v11 = vpop.f32.mrb[46].mxu1 }
 0xb1b   :  { %v10596_v19 = vpop.f32.mrb[47].mxu1 }
 0xb1e   :  { %v10598_v47 = vpop.f32.mrb[48].mxu1 }
 0xb1f   :  { %v10600_v59 = vpop.f32.mrb[49].mxu1 }
 0xb22   :  { %v10602_v28 = vpop.f32.mrb[50].mxu1 }
 0xb23   :  { %v10604_v38 = vpop.f32.mrb[51].mxu1 }
 0xb26   :  { %v10606_v18 = vpop.f32.mrb[52].mxu1 }
 0xb27   :  { %v10608_v12 = vpop.f32.mrb[53].mxu1 }
 0xb2a   :  { %v10610_v35 = vpop.f32.mrb[54].mxu1 }
 0xb2b   :  { %v10612_v5 = vpop.f32.mrb[55].mxu1 }
 0xb5b   :  { %v8196_v20 = vpop.f32.mrb[56].mxu1 }
 0xb5c   :  { %v4342_v33 = vmul.f32 0.20412415, %v8196_v20  ;;  %v4314_v6 = vpop.f32.mrb[57].mxu1 }
 0xb5d   :  { %v4341_v21 = vmul.f32 0.20412415, %v4314_v6 }
 0xb5e   :  { %v4346_v58 = vadd.f32 %v9180_v49, %v4342_v33 }
 0xb5f   :  { %v8199_v17 = vpop.f32.mrb[58].mxu1  ;;  %v4345_v51 = vadd.f32 %v9181_v31, %v4341_v21 }
 0xb60   :  { %v4324_v60 = vpop.f32.mrb[59].mxu1  ;;  %v4352_v50 = vsel %vm424_vm10, %v4346_v58, -inf  ;;  %v4344_v0 = vmul.f32 0.20412415, %v8199_v17 }
 0xb61   :  { %v4343_v42 = vmul.f32 0.20412415, %v4324_v60  ;;  %4353 = vmax.xlane.f32.xlu1 %v4352_v50  ;;  %v4349_v1 = vsel %vm424_vm10, %v4345_v51, -inf }
 0xb62   :  { %4350 = vmax.xlane.f32.xlu0 %v4349_v1  ;;  %v4348_v29 = vadd.f32 %v9183_v15, %v4344_v0 }
 0xb63   :  { %v4347_v8 = vadd.f32 %v9182_v40, %v4343_v42 }
 0xb64   :  { %v4358_v41 = vsel %vm424_vm10, %v4348_v29, -inf }
 0xb65   :  { %v4355_v54 = vsel %vm424_vm10, %v4347_v8, -inf }
 0xb66   :  { %4356 = vmax.xlane.f32.xlu0 %v4355_v54 }
 0xb6a   :  { %4359 = vmax.xlane.f32.xlu0 %v4358_v41 }
 0xb72   :  { %8935 = vrot.lane.b32.xlu1 %v10128_v34, %s9187_s23 }
 0xb76   :  { %8945 = vrot.lane.b32.xlu1 %v10167_v4, %s9187_s23 }
 0xb7a   :  { %8950 = vrot.lane.b32.xlu1 %v10182_v2, %s9187_s23 }
 0xb80   :  { %8940 = vrot.lane.b32.xlu0 %v10151_v36, %s9187_s23 }
 0xbee   :  { %v4354_v16 = vpop.xlane.xlu1 %4353 }
 0xbef   :  { %v4362_v45 = vsub.f32 %v4346_v58, %v4354_v16  ;;  %v4351_v23 = vpop.xlane.xlu0 %4350 }
 0xbf0   :  { %v4361_v53 = vsub.f32 %v4345_v51, %v4351_v23 }
 0xbf1   :  { %v4367_v25 = vmul.f32 1.442695, %v4362_v45  ;;  %v6995_v45 = vld [vmem:[%s11604_s4 + $0xd0] sm:$0xff] }
 0xbf2   :  { %v4365_v14 = vmul.f32 1.442695, %v4361_v53  ;;  %v8936_v46 = vpop.permute.xlu1 %8935  ;;  %v6996_v53 = vld [vmem:[%s11604_s4 + $0xd8] sm:$0xff] }
 0xbf3   :  { %9100 = vpow2.f32 %v4367_v25  ;;  %v8938_v20 = vunpack.i.h.bf16 %v8936_v46  ;;  %v8937_v33 = vunpack.i.l.bf16 %v8936_v46  ;;  %v4357_v34 = vpop.xlane.xlu0 %4356  ;;  %v8695_v25 = vpack.c.bf16 %v6996_v53, %v6995_v45 }
 0xbf4   :  { %9102 = vpow2.f32 %v4365_v14  ;;  %v4363_v6 = vsub.f32 %v4347_v8, %v4357_v34 }
 0xbf5   :  { %v8667_v4 = vpack.c.bf16 %v8938_v20, %v8937_v33 }
 0xbf6   :  { %v4369_v21 = vmul.f32 1.442695, %v4363_v6  ;;  %v8946_v49 = vpop.permute.xlu1 %8945 }
 0xbf7   :  { %8668 = vmatprep.subr.bf16.mxu0 %v8667_v4  ;;  %v4360_v2 = vpop.xlane.xlu0 %4359  ;;  %v8948_v17 = vunpack.i.h.bf16 %v8946_v49  ;;  %v8947_v51 = vunpack.i.l.bf16 %v8946_v49 }
 0xbf8   :  { %9104 = vpow2.f32 %v4369_v21  ;;  %v4364_v36 = vsub.f32 %v4348_v29, %v4360_v2  ;;  %8670 = vmatpush3.bf16.msra.mxu0 %v8667_v4 }
 0xbf9   :  { %v8675_v54 = vpack.c.bf16 %v8948_v17, %v8947_v51 }
 0xbfa   :  { %v4371_v58 = vmul.f32 1.442695, %v4364_v36 }
 0xbfb   :  { %v8941_v31 = vpop.permute.xlu0 %8940 }
 0xbfc   :  { %9106 = vpow2.f32 %v4371_v58  ;;  %v8943_v60 = vunpack.i.h.bf16 %v8941_v31  ;;  %v8942_v50 = vunpack.i.l.bf16 %v8941_v31 }
 0xbfd   :  { %v9101_v0 = vpop.eup %9100 }
 0xbfe   :  { %v9103_v42 = vpop.eup %9102  ;;  %v8671_v1 = vpack.c.bf16 %v8943_v60, %v8942_v50  ;;  %v4376_v40 = vsel %vm424_vm10, %v9101_v0, 0.0 }
 0xbff   :  { %4377 = vadd.xlane.f32.xlu0 %v4376_v40  ;;  %v4373_v8 = vsel %vm424_vm10, %v9103_v42, 0.0 }
 0xc00   :  { %4374 = vadd.xlane.f32.xlu1 %v4373_v8  ;;  %8672 = vmatprep.subr.bf16.mxu0 %v8671_v1 }
 0xc01   :  { %8674 = vmatpush3.bf16.msra.mxu0 %v8671_v1 }
 0xc02   :  { %v9105_v15 = vpop.eup %9104  ;;  %8676 = vmatprep.subr.bf16.mxu0 %v8675_v54 }
 0xc03   :  { %v4379_v29 = vsel %vm424_vm10, %v9105_v15, 0.0 }
 0xc04   :  { %4380 = vadd.xlane.f32.xlu1 %v4379_v29 }
 0xc06   :  { %v9107_v41 = vpop.eup %9106 }
 0xc07   :  { %v4382_v16 = vsel %vm424_vm10, %v9107_v41, 0.0 }
 0xc08   :  { %4383 = vadd.xlane.f32.xlu0 %v4382_v16 }
 0xc15   :  { %8960 = vrot.lane.b32.xlu1 %v10201_v52, %s9187_s23 }
 0xc19   :  { %4710 = vrot.lane.b32.xlu1 %v10458_v37, %s9188_s1 }
 0xc1d   :  { %4758 = vrot.lane.b32.xlu1 %v10590_v61, %s9189_s11 }
 0xc1e   :  { %8955 = vrot.lane.b32.xlu0 %v10191_v62, %s9187_s23  ;;  %v8951_v62 = vpop.permute.xlu1 %8950 }
 0xc21   :  { %4714 = vrot.lane.b32.xlu1 %v10462_v32, %s9188_s1 }
 0xc22   :  { %4708 = vrot.lane.b32.xlu0 %v10460_v9, %s9188_s1 }
 0xc25   :  { %4762 = vrot.lane.b32.xlu1 %v10594_v11, %s9189_s11 }
 0xc26   :  { %4756 = vrot.lane.b32.xlu0 %v10592_v24, %s9189_s11 }
 0xc29   :  { %4718 = vrot.lane.b32.xlu1 %v10466_v26, %s9188_s1 }
 0xc2a   :  { %4712 = vrot.lane.b32.xlu0 %v10464_v39, %s9188_s1 }
 0xc2d   :  { %4766 = vrot.lane.b32.xlu1 %v10598_v47, %s9189_s11 }
 0xc2e   :  { %4760 = vrot.lane.b32.xlu0 %v10596_v19, %s9189_s11 }
 0xc31   :  { %4722 = vrot.lane.b32.xlu1 %v10470_v56, %s9188_s1  ;;  %v8952_v56 = vunpack.i.l.bf16 %v8951_v62 }
 0xc32   :  { %4716 = vrot.lane.b32.xlu0 %v10468_v55, %s9188_s1  ;;  %v8953_v55 = vunpack.i.h.bf16 %v8951_v62 }
 0xc34   :  { %v8679_v24 = vpack.c.bf16 %v8953_v55, %v8952_v56 }
 0xc35   :  { %4770 = vrot.lane.b32.xlu1 %v10602_v28, %s9189_s11 }
 0xc36   :  { %4764 = vrot.lane.b32.xlu0 %v10600_v59, %s9189_s11 }
 0xc39   :  { %4726 = vrot.lane.b32.xlu1 %v10474_v3, %s9188_s1 }
 0xc3a   :  { %4720 = vrot.lane.b32.xlu0 %v10472_v63, %s9188_s1 }
 0xc3d   :  { %4774 = vrot.lane.b32.xlu1 %v10606_v18, %s9189_s11 }
 0xc3e   :  { %4768 = vrot.lane.b32.xlu0 %v10604_v38, %s9189_s11 }
 0xc41   :  { %4730 = vrot.lane.b32.xlu1 %v10478_v43, %s9188_s1 }
 0xc42   :  { %4724 = vrot.lane.b32.xlu0 %v10476_v22, %s9188_s1 }
 0xc45   :  { %4778 = vrot.lane.b32.xlu1 %v10610_v35, %s9189_s11  ;;  %v6993_v35 = vld [vmem:[%s11604_s4 + $0xc0] sm:$0xff] }
 0xc46   :  { %4772 = vrot.lane.b32.xlu0 %v10608_v12, %s9189_s11 }
 0xc4a   :  { %4728 = vrot.lane.b32.xlu0 %v10480_v44, %s9188_s1 }
 0xc4e   :  { %4776 = vrot.lane.b32.xlu0 %v10612_v5, %s9189_s11  ;;  %v6994_v5 = vld [vmem:[%s11604_s4 + $0xc8] sm:$0xff] }
 0xc4f   :  { %v8691_v23 = vpack.c.bf16 %v6994_v5, %v6993_v35 }
 0xc8c   :  { %v4378_v52 = vpop.xlane.xlu0 %4377 }
 0xc8d   :  { %9108 = vrcp.f32 %v4378_v52  ;;  %v4375_v37 = vpop.xlane.xlu1 %4374 }
 0xc8e   :  { %9110 = vrcp.f32 %v4375_v37 }
 0xc91   :  { %v4381_v9 = vpop.xlane.xlu1 %4380 }
 0xc92   :  { %9112 = vrcp.f32 %v4381_v9 }
 0xc95   :  { %v4384_v32 = vpop.xlane.xlu0 %4383  ;;  %v8961_v47 = vpop.permute.xlu1 %8960 }
 0xc96   :  { %9114 = vrcp.f32 %v4384_v32  ;;  %v8963_v38 = vunpack.i.h.bf16 %v8961_v47  ;;  %v8962_v18 = vunpack.i.l.bf16 %v8961_v47 }
 0xc97   :  { %v9109_v39 = vpop.eup %9108 }
 0xc98   :  { %v9111_v26 = vpop.eup %9110  ;;  %v4390_v22 = vmul.f32 %v9109_v39, %v9101_v0  ;;  %v8687_v12 = vpack.c.bf16 %v8963_v38, %v8962_v18 }
 0xc99   :  { %v8956_v63 = vpop.permute.xlu0 %8955  ;;  %v4389_v3 = vmul.f32 %v9111_v26, %v9103_v42  ;;  %v4711_v17 = vpop.permute.xlu1 %4710 }
 0xc9a   :  { %v8958_v44 = vunpack.i.h.bf16 %v8956_v63  ;;  %v8957_v61 = vunpack.i.l.bf16 %v8956_v63 }
 0xc9b   :  { %8208 = vmatprep.mubr.msk.f32.mxu0 %vm424_vm10, %v4389_v3 }
 0xc9c   :  { %v9113_v43 = vpop.eup %9112  ;;  %8209 = vmatmul.mubr.msk.f32.vlgmr.msra.gmra.mrb[80].mxu0 %vm424_vm10, %v4390_v22  ;;  %v8683_v59 = vpack.c.bf16 %v8958_v44, %v8957_v61 }
 0xc9d   :  { %8678 = vmatpush3.bf16.msra.mxu0 %v8675_v54  ;;  %v4391_v11 = vmul.f32 %v9113_v43, %v9105_v15  ;;  %v4709_v31 = vpop.permute.xlu0 %4708  ;;  %v4759_v51 = vpop.permute.xlu1 %4758 }
 0xc9e   :  { %8680 = vmatprep.subr.bf16.mxu0 %v8679_v24  ;;  %v4840_v63 = vsel %vm1887_vm12, %v10433_v27, %v4709_v31 }
 0xc9f   :  { %8211 = vmatprep.mubr.msk.f32.mxu0 %vm424_vm10, %v4391_v11 }
 0xca0   :  { %v9115_v19 = vpop.eup %9114 }
 0xca1   :  { %8682 = vmatpush3.bf16.msra.mxu0 %v8679_v24  ;;  %v4392_v28 = vmul.f32 %v9115_v19, %v9107_v41  ;;  %v4757_v60 = vpop.permute.xlu0 %4756  ;;  %v4715_v50 = vpop.permute.xlu1 %4714 }
 0xca2   :  { %8684 = vmatprep.subr.bf16.mxu0 %v8683_v59  ;;  %v4853_v43 = vsel %vm4852_vm14, %v4840_v63, %v4757_v60  ;;  %v11656_v60 = vld [vmem:[#allocation21_spill] sm:$0xff] }
 0xca3   :  { %8212 = vmatmul.mubr.msk.f32.gmra.mrb[82].mxu0 %vm424_vm10, %v4392_v28 }
 0xca4   :  { %8222 = vmatprep.mubr.msk.f32.mxu0 %vm424_vm10, %v4389_v3 }
 0xca5   :  { %v4713_v0 = vpop.permute.xlu0 %4712  ;;  %v4763_v42 = vpop.permute.xlu1 %4762 }
 0xca6   :  { %v4842_v27 = vsel %vm1887_vm12, %v10440_v10, %v4713_v0 }
 0xca7   :  { %8223 = vmatmul.mubr.msk.f32.vlgmr.msra.gmra.mrb[84].mxu0 %vm424_vm10, %v4390_v22 }
 0xca8   :  { %8686 = vmatpush3.bf16.msra.mxu0 %v8683_v59  ;;  %8225 = vmatprep.mubr.msk.f32.mxu0 %vm424_vm10, %v4391_v11 }
 0xca9   :  { %8688 = vmatprep.subr.bf16.mxu0 %v8687_v12  ;;  %v4761_v1 = vpop.permute.xlu0 %4760  ;;  %v4719_v40 = vpop.permute.xlu1 %4718 }
 0xcaa   :  { %v4855_v47 = vsel %vm4852_vm14, %v4842_v27, %v4761_v1 }
 0xcab   :  { %8226 = vmatmul.mubr.msk.f32.gmra.mrb[86].mxu0 %vm424_vm10, %v4392_v28 }
 0xcac   :  { %8690 = vmatpush3.bf16.msra.mxu0 %v8687_v12  ;;  %8236 = vmatprep.mubr.msk.f32.mxu0 %vm424_vm10, %v4389_v3 }
 0xcad   :  { %8692 = vmatprep.subr.bf16.mxu0 %v8691_v23  ;;  %v4717_v8 = vpop.permute.xlu0 %4716  ;;  %v4767_v54 = vpop.permute.xlu1 %4766 }
 0xcae   :  { %v4844_v12 = vsel %vm1887_vm12, %v10444_v48, %v4717_v8 }
 0xcaf   :  { %8237 = vmatmul.mubr.msk.f32.vlgmr.msra.gmra.mrb[88].mxu0 %vm424_vm10, %v4390_v22  ;;  %v4841_v22 = vsel %vm1887_vm12, %v10429_v57, %v4711_v17  ;;  %v4843_v57 = vsel %vm1887_vm12, %v10438_v13, %v4715_v50  ;;  %v4845_v13 = vsel %vm1887_vm12, %v10442_v30, %v4719_v40 }
 0xcb0   :  { %8239 = vmatprep.mubr.msk.f32.mxu0 %vm424_vm10, %v4391_v11  ;;  %8694 = vmatpush3.bf16.msra.mxu0 %v8691_v23  ;;  %v4854_v61 = vsel %vm4852_vm14, %v4841_v22, %v4759_v51  ;;  %v4858_v45 = vsel %vm4852_vm14, %v4845_v13, %v4767_v54 }
 0xcb1   :  { %8696 = vmatprep.subr.bf16.mxu0 %v8695_v25  ;;  %v4765_v15 = vpop.permute.xlu0 %4764  ;;  %v4723_v29 = vpop.permute.xlu1 %4722 }
 0xcb2   :  { %v4857_v35 = vsel %vm4852_vm14, %v4844_v12, %v4765_v15 }
 0xcb3   :  { %8240 = vmatmul.mubr.msk.f32.gmra.mrb[90].mxu0 %vm424_vm10, %v4392_v28  ;;  %v4856_v28 = vsel %vm4852_vm14, %v4843_v57, %v4763_v42  ;;  %v11657_v42 = vld [vmem:[#allocation20_spill] sm:$0xff] }
 0xcb4   :  { %8698 = vmatpush3.bf16.msra.mxu0 %v8695_v25 }
 0xcb5   :  { %v4721_v41 = vpop.permute.xlu0 %4720  ;;  %v4771_v16 = vpop.permute.xlu1 %4770 }
 0xcb6   :  { %v4846_v48 = vsel %vm1887_vm12, %v10448_v7, %v4721_v41  ;;  %v7265_v41 = vld.sshfl [vmem:[%s11605_s5 + $0x14] sm:$0x13 pattern:$0x75316420] }
 0xcb9   :  { %v4769_v62 = vpop.permute.xlu0 %4768  ;;  %v4727_v52 = vpop.permute.xlu1 %4726 }
 0xcbd   :  { %v4725_v37 = vpop.permute.xlu0 %4724  ;;  %v4775_v9 = vpop.permute.xlu1 %4774 }
 0xcc1   :  { %v4773_v32 = vpop.permute.xlu0 %4772  ;;  %v4731_v39 = vpop.permute.xlu1 %4730 }
 0xcc2   :  { %v4851_v1 = vsel %vm1887_vm12, %v11657_v42, %v4731_v39 }
 0xcc5   :  { %v4729_v26 = vpop.permute.xlu0 %4728  ;;  %v4779_v55 = vpop.permute.xlu1 %4778 }
 0xcc6   :  { %v4850_v50 = vsel %vm1887_vm12, %v11656_v60, %v4729_v26  ;;  %v4864_v54 = vsel %vm4852_vm14, %v4851_v1, %v4779_v55  ;;  %v11659_v55 = vld [vmem:[#allocation3_spill] sm:$0xff] }
 0xcc9   :  { %v4777_v56 = vpop.permute.xlu0 %4776 }
 0xcca   :  { %v4863_v40 = vsel %vm4852_vm14, %v4850_v50, %v4777_v56 }
 0xd6f   :  { %v8210_v14 = vpop.f32.mrb[80].mxu0 }
 0xd70   :  { %4806 = vrot.lane.b32.xlu1 %v8210_v14, %s9190_s20  ;;  %v4483_v46 = vpop.f32.mrb[81].mxu0  ;;  %v11653_v14 = vld [vmem:[#allocation17_spill] sm:$0xff] }
 0xd71   :  { %4804 = vrot.lane.b32.xlu0 %v4483_v46, %s9190_s20  ;;  %v4847_v30 = vsel %vm1887_vm12, %v11653_v14, %v4723_v29  ;;  %v4859_v46 = vsel %vm4852_vm14, %v4846_v48, %v4769_v62  ;;  %v5047_v62 = vcombine.high %v7265_v41, %v7265_v41 }
 0xd76   :  { %v8213_v20 = vpop.f32.mrb[82].mxu0 }
 0xd77   :  { %4810 = vrot.lane.b32.xlu1 %v8213_v20, %s9190_s20  ;;  %v4493_v33 = vpop.f32.mrb[83].mxu0 }
 0xd78   :  { %4808 = vrot.lane.b32.xlu0 %v4493_v33, %s9190_s20  ;;  %v4860_v33 = vsel %vm4852_vm14, %v4847_v30, %v4771_v16 }
 0xd7a   :  { %v8224_v34 = vpop.f32.mrb[84].mxu0 }
 0xd7b   :  { %4814 = vrot.lane.b32.xlu1 %v8224_v34, %s9190_s20  ;;  %v4580_v6 = vpop.f32.mrb[85].mxu0 }
 0xd7c   :  { %4812 = vrot.lane.b32.xlu0 %v4580_v6, %s9190_s20 }
 0xd7e   :  { %v8227_v4 = vpop.f32.mrb[86].mxu0 }
 0xd7f   :  { %4818 = vrot.lane.b32.xlu1 %v8227_v4, %s9190_s20  ;;  %v4590_v21 = vpop.f32.mrb[87].mxu0  ;;  %v11654_v4 = vld [vmem:[#allocation19_spill] sm:$0xff] }
 0xd80   :  { %4816 = vrot.lane.b32.xlu0 %v4590_v21, %s9190_s20  ;;  %v4848_v7 = vsel %vm1887_vm12, %v11654_v4, %v4725_v37  ;;  %v11658_v37 = vld [vmem:[#allocation2_spill] sm:$0xff] }
 0xd82   :  { %v8238_v2 = vpop.f32.mrb[88].mxu0 }
 0xd83   :  { %4822 = vrot.lane.b32.xlu1 %v8238_v2, %s9190_s20  ;;  %v4677_v49 = vpop.f32.mrb[89].mxu0  ;;  %v11655_v2 = vld [vmem:[#allocation18_spill] sm:$0xff] }
 0xd84   :  { %4820 = vrot.lane.b32.xlu0 %v4677_v49, %s9190_s20  ;;  %v4849_v49 = vsel %vm1887_vm12, %v11655_v2, %v4727_v52  ;;  %v11667_v2 = vld [vmem:[#allocation14_spill] sm:$0xff] }
 0xd85   :  { %v4862_v17 = vsel %vm4852_vm14, %v4849_v49, %v4775_v9  ;;  %v5061_v9 = vrot.slane %v5047_v62, %v11658_v37  ;;  %v11670_v62 = vld [vmem:[#allocation16_spill] sm:$0xff] }
 0xd86   :  { %v8241_v36 = vpop.f32.mrb[90].mxu0 }
 0xd87   :  { %4826 = vrot.lane.b32.xlu1 %v8241_v36, %s9190_s20  ;;  %v4687_v58 = vpop.f32.mrb[91].mxu0  ;;  %v4861_v36 = vsel %vm4852_vm14, %v4848_v7, %v4773_v32  ;;  %v5054_v32 = vrot.slane %v7265_v41, %v11658_v37  ;;  %v5070_v56 = vrot.slane %v5061_v9, %v11659_v55  ;;  %v11666_v7 = vld [vmem:[#allocation8_spill] sm:$0xff] }
 0xd88   :  { %4824 = vrot.lane.b32.xlu0 %v4687_v58, %s9190_s20 }
 0xd89   :  { %v5066_v63 = vrot.slane %v5054_v32, %v11659_v55 }
 0xde2   :  { %v4807_v3 = vpop.permute.xlu1 %4806 }
 0xde3   :  { %v4805_v44 = vpop.permute.xlu0 %4804  ;;  %v4867_v11 = vsel %vm4865_vm15, %v4854_v61, %v4807_v3 }
 0xde4   :  { %v4866_v24 = vsel %vm4865_vm15, %v4853_v43, %v4805_v44  ;;  %v5062_v44 = vcombine.high %v5054_v32, %v5054_v32 }
 0xde5   :  { %8250 = vmatprep.mubr.msk.f32.mxu0 %vm424_vm10, %v4866_v24 }
 0xde6   :  { %8251 = vmatmul.mubr.msk.f32.vlgmr.msra.gmra.mrb[92].mxu0 %vm424_vm10, %v4867_v11 }
 0xde9   :  { %v4811_v19 = vpop.permute.xlu1 %4810 }
 0xdea   :  { %v4809_v59 = vpop.permute.xlu0 %4808  ;;  %v4869_v18 = vsel %vm4865_vm15, %v4856_v28, %v4811_v19  ;;  %v11660_v19 = vld [vmem:[#allocation10_spill] sm:$0xff]  ;;  %v5074_v28 = vrot.slane %v5062_v44, %v11659_v55 }
 0xdeb   :  { %v4868_v38 = vsel %vm4865_vm15, %v4855_v47, %v4809_v59 }
 0xdec   :  { %8253 = vmatprep.mubr.msk.f32.mxu0 %vm424_vm10, %v4868_v38  ;;  %v11661_v38 = vld [vmem:[#allocation9_spill] sm:$0xff] }
 0xded   :  { %8254 = vmatmul.mubr.msk.f32.gmra.mrb[94].mxu0 %vm424_vm10, %v4869_v18  ;;  %v4815_v10 = vpop.permute.xlu1 %4814 }
 0xdee   :  { %v4813_v5 = vpop.permute.xlu0 %4812  ;;  %v4871_v53 = vsel %vm4865_vm15, %v4858_v45, %v4815_v10  ;;  %v11662_v10 = vld [vmem:[#allocation6_spill] sm:$0xff] }
 0xdef   :  { %v4870_v23 = vsel %vm4865_vm15, %v4857_v35, %v4813_v5  ;;  %v11663_v5 = vld [vmem:[#allocation5_spill] sm:$0xff] }
 0xdf0   :  { %8256 = vmatprep.mubr.msk.f32.mxu0 %vm424_vm10, %v4870_v23 }
 0xdf1   :  { %8257 = vmatmul.mubr.msk.f32.gmra.mrb[96].mxu0 %vm424_vm10, %v4871_v53  ;;  %v4819_v25 = vpop.permute.xlu1 %4818 }
 0xdf2   :  { %v4817_v20 = vpop.permute.xlu0 %4816  ;;  %v4873_v6 = vsel %vm4865_vm15, %v4860_v33, %v4819_v25  ;;  %v11664_v25 = vld [vmem:[#allocation12_spill] sm:$0xff]  ;;  %v11665_v33 = vld [vmem:[#allocation11_spill] sm:$0xff] }
 0xdf3   :  { %v4872_v34 = vsel %vm4865_vm15, %v4859_v46, %v4817_v20 }
 0xdf4   :  { %8259 = vmatprep.mubr.msk.f32.mxu0 %vm424_vm10, %v4872_v34 }
 0xdf5   :  { %8260 = vmatmul.mubr.msk.f32.gmra.mrb[98].mxu0 %vm424_vm10, %v4873_v6  ;;  %v4823_v21 = vpop.permute.xlu1 %4822 }
 0xdf6   :  { %v4821_v58 = vpop.permute.xlu0 %4820  ;;  %v4875_v51 = vsel %vm4865_vm15, %v4862_v17, %v4823_v21 }
 0xdf7   :  { %v4874_v31 = vsel %vm4865_vm15, %v4861_v36, %v4821_v58  ;;  %v11668_v58 = vld [vmem:[#allocation7_spill] sm:$0xff] }
 0xdf8   :  { %8262 = vmatprep.mubr.msk.f32.mxu0 %vm424_vm10, %v4874_v31  ;;  %v11669_v31 = vld [vmem:[#allocation13_spill] sm:$0xff] }
 0xdf9   :  { %8263 = vmatmul.mubr.msk.f32.gmra.mrb[100].mxu0 %vm424_vm10, %v4875_v51  ;;  %v4827_v0 = vpop.permute.xlu1 %4826 }
 0xdfa   :  { %v4825_v8 = vpop.permute.xlu0 %4824  ;;  %v4877_v29 = vsel %vm4865_vm15, %v4864_v54, %v4827_v0 }
 0xdfb   :  { %v4876_v15 = vsel %vm4865_vm15, %v4863_v40, %v4825_v8 }
 0xdfc   :  { %8265 = vmatprep.mubr.msk.f32.mxu0 %vm424_vm10, %v4876_v15 }
 0xdfd   :  { %8266 = vmatmul.mubr.msk.f32.gmra.mrb[102].mxu0 %vm424_vm10, %v4877_v29 }
 0xeb9   :  { %v8252_v16 = vpop.f32.mrb[92].mxu0 }
 0xeba   :  { %v4980_v52 = vpop.f32.mrb[93].mxu0  ;;  %v5079_v24 = vadd.f32 %v8252_v16, %v5066_v63 }
 0xebb   :  { %v5078_v11 = vadd.f32 %v5066_v63, %v4980_v52 }
 0xebc   :  { %v10769_v13 = vadd.f32 %v5079_v24, %v11662_v10 }
 0xebd   :  { %v10772_v45 = vadd.f32 %v5078_v11, %v11663_v5 }
 0xebe   :  { %v5103_v4 = vmul.f32 %v10769_v13, %v10769_v13 }
 0xebf   :  { %v5102_v36 = vmul.f32 %v10772_v45, %v10772_v45 }
 0xec0   :  { %v8255_v39 = vpop.f32.mrb[94].mxu0 }
 0xec1   :  { %v4990_v26 = vpop.f32.mrb[95].mxu0  ;;  %v5081_v35 = vadd.f32 %v8255_v39, %v5066_v63  ;;  %v11671_v39 = vld [vmem:[#allocation15_spill] sm:$0xff] }
 0xec2   :  { %v5080_v23 = vadd.f32 %v5066_v63, %v4990_v26 }
 0xec3   :  { %v10787_v21 = vadd.f32 %v5081_v35, %v11666_v7 }
 0xec4   :  { %v8258_v3 = vpop.f32.mrb[96].mxu0  ;;  %v10795_v17 = vadd.f32 %v5080_v23, %v11668_v58 }
 0xec5   :  { %v5083_v22 = vadd.f32 %v8258_v3, %v5070_v56  ;;  %v5000_v43 = vpop.f32.mrb[97].mxu0  ;;  %v5105_v41 = vmul.f32 %v10787_v21, %v10787_v21 }
 0xec6   :  { %v5082_v61 = vadd.f32 %v5070_v56, %v5000_v43  ;;  %v5104_v9 = vmul.f32 %v10795_v17, %v10795_v17 }
 0xec7   :  { %v10762_v57 = vadd.f32 %v5083_v22, %v11660_v19 }
 0xec8   :  { %v8261_v27 = vpop.f32.mrb[98].mxu0  ;;  %v10766_v18 = vadd.f32 %v5082_v61, %v11661_v38 }
 0xec9   :  { %v5085_v47 = vadd.f32 %v8261_v27, %v5070_v56  ;;  %v5010_v59 = vpop.f32.mrb[99].mxu0  ;;  %v5107_v48 = vmul.f32 %v10762_v57, %v10762_v57 }
 0xeca   :  { %v5084_v12 = vadd.f32 %v5070_v56, %v5010_v59  ;;  %v5106_v20 = vmul.f32 %v10766_v18, %v10766_v18 }
 0xecb   :  { %v10777_v14 = vadd.f32 %v5085_v47, %v11664_v25  ;;  %v5111_v50 = vadd.f32 %v5107_v48, %v5103_v4 }
 0xecc   :  { %v8264_v53 = vpop.f32.mrb[100].mxu0  ;;  %v10782_v34 = vadd.f32 %v5084_v12, %v11665_v33  ;;  %v5110_v8 = vadd.f32 %v5106_v20, %v5102_v36 }
 0xecd   :  { %v5087_v30 = vadd.f32 %v8264_v53, %v5074_v28  ;;  %v5020_v46 = vpop.f32.mrb[101].mxu0  ;;  %v5109_v0 = vmul.f32 %v10777_v14, %v10777_v14 }
 0xece   :  { %v5086_v6 = vadd.f32 %v5074_v28, %v5020_v46  ;;  %v5108_v54 = vmul.f32 %v10782_v34, %v10782_v34 }
 0xecf   :  { %v10790_v49 = vadd.f32 %v5087_v30, %v11667_v2  ;;  %v5113_v56 = vadd.f32 %v5109_v0, %v5105_v41 }
 0xed0   :  { %v10798_v51 = vadd.f32 %v5086_v6, %v11669_v31  ;;  %v8267_v60 = vpop.f32.mrb[102].mxu0  ;;  %v5112_v3 = vadd.f32 %v5108_v54, %v5104_v9 }
 0xed1   :  { %v5115_v42 = vmul.f32 %v10790_v49, %v10790_v49  ;;  %v5089_v1 = vadd.f32 %v8267_v60, %v5074_v28  ;;  %v5030_v40 = vpop.f32.mrb[103].mxu0 }
 0xed2   :  { %v5114_v15 = vmul.f32 %v10798_v51, %v10798_v51  ;;  %v5088_v29 = vadd.f32 %v5074_v28, %v5030_v40 }
 0xed3   :  { %v5119_v16 = vadd.f32 %v5115_v42, %v5111_v50  ;;  %v10811_v52 = vadd.f32 %v5089_v1, %v11670_v62 }
 0xed4   :  { %v5118_v32 = vadd.f32 %v5114_v15, %v5110_v8  ;;  %v10816_v26 = vadd.f32 %v5088_v29, %v11671_v39 }
 0xed5   :  { %v5117_v63 = vmul.f32 %v10811_v52, %v10811_v52  ;;  %9116 = vrsqrt.f32 %v5119_v16  ;;  %vm5131_vm0 = vcmp.eq.f32.partialorder %v5119_v16, inf  ;;  %v5134_v27 = vand.u32 2147483648, %v5119_v16 }
 0xed6   :  { %v5116_v22 = vmul.f32 %v10816_v26, %v10816_v26  ;;  %9118 = vrsqrt.f32 %v5118_v32  ;;  %vm5133_vm1 = vcmp.eq.f32.partialorder %v5119_v16, 0.0  ;;  %vm5124_vm2 = vcmp.eq.f32.partialorder %v5118_v32, inf }
 0xed7   :  { %v5121_v43 = vadd.f32 %v5117_v63, %v5113_v56  ;;  %v5127_v59 = vand.u32 2147483648, %v5118_v32  ;;  %vm5126_vm3 = vcmp.eq.f32.partialorder %v5118_v32, 0.0 }
 0xed8   :  { %v5120_v44 = vadd.f32 %v5116_v22, %v5112_v3 }
 0xed9   :  { %9120 = vrsqrt.f32 %v5121_v43  ;;  %vm5145_vm4 = vcmp.eq.f32.partialorder %v5121_v43, inf  ;;  %v5148_v25 = vand.u32 2147483648, %v5121_v43  ;;  %vm5147_vm7 = vcmp.eq.f32.partialorder %v5121_v43, 0.0 }
 0xeda   :  { %9122 = vrsqrt.f32 %v5120_v44  ;;  %vm5138_vm5 = vcmp.eq.f32.partialorder %v5120_v44, inf  ;;  %v5141_v46 = vand.u32 2147483648, %v5120_v44  ;;  %vm5140_vm6 = vcmp.eq.f32.partialorder %v5120_v44, 0.0 }
 0xedf   :  { %v9117_v61 = vpop.eup %9116 }
 0xee0   :  { %v9119_v24 = vpop.eup %9118  ;;  %v5130_v11 = vmul.f32 %v9117_v61, %v5119_v16 }
 0xee1   :  { %v5123_v19 = vmul.f32 %v9119_v24, %v5118_v32  ;;  %v6999_v24 = vld [vmem:[%s11604_s4 + $0xf0] sm:$0xff] }
 0xee2   :  { %v5132_v47 = vsel %vm5131_vm0, %v5119_v16, %v5130_v11  ;;  %v7000_v11 = vld [vmem:[%s11604_s4 + $0xf8] sm:$0xff] }
 0xee3   :  { %v9121_v28 = vpop.eup %9120  ;;  %v5135_v38 = vsel %vm5133_vm1, %v5134_v27, %v5132_v47  ;;  %v5125_v12 = vsel %vm5124_vm2, %v5118_v32, %v5123_v19  ;;  %v8703_v27 = vpack.c.bf16 %v7000_v11, %v6999_v24  ;;  %v7001_v19 = vld [vmem:[%s11604_s4 + $0x100] sm:$0xff]  ;;  %v7002_v47 = vld [vmem:[%s11604_s4 + $0x108] sm:$0xff]  ;;  %v7278_v24 = vld.sshfl [vmem:[%s11605_s5 + $0x18] sm:$0x13 pattern:$0x75316420] }
 0xee4   :  { %v9123_v10 = vpop.eup %9122  ;;  %v10822_v35 = vadd.f32 1e-06, %v5135_v38  ;;  %v5128_v5 = vsel %vm5126_vm3, %v5127_v59, %v5125_v12  ;;  %v5144_v23 = vmul.f32 %v9121_v28, %v5121_v43  ;;  %v8707_v59 = vpack.c.bf16 %v7002_v47, %v7001_v19 }
 0xee5   :  { %v10824_v53 = vadd.f32 1e-06, %v5128_v5  ;;  %v5137_v48 = vmul.f32 %v9123_v10, %v5120_v44  ;;  %v5412_v47 = vcombine.high %v7278_v24, %v7278_v24 }
 0xee6   :  { %v5157_v30 = vsel %vm424_vm10, %v10822_v35, 0.0  ;;  %v5146_v20 = vsel %vm5145_vm4, %v5121_v43, %v5144_v23  ;;  %v6997_v43 = vld [vmem:[%s11604_s4 + $0xe0] sm:$0xff]  ;;  %8708 = vmatprep.subr.bf16.mxu0 %v8707_v59 }
 0xee7   :  { %5158 = vadd.xlane.f32.xlu1 %v5157_v30  ;;  %v5154_v33 = vsel %vm424_vm10, %v10824_v53, 0.0  ;;  %v5139_v6 = vsel %vm5138_vm5, %v5120_v44, %v5137_v48  ;;  %v5149_v7 = vsel %vm5147_vm7, %v5148_v25, %v5146_v20  ;;  %v6998_v44 = vld [vmem:[%s11604_s4 + $0xe8] sm:$0xff]  ;;  %8710 = vmatpush3.bf16.msra.mxu0 %v8707_v59  ;;  %vm6371_vm5 = vcmask 1042432  }
 0xee8   :  { %5155 = vadd.xlane.f32.xlu0 %v5154_v33  ;;  %v5142_v4 = vsel %vm5140_vm6, %v5141_v46, %v5139_v6  ;;  %v10834_v58 = vadd.f32 1e-06, %v5149_v7  ;;  %v8699_v61 = vpack.c.bf16 %v6998_v44, %v6997_v43  ;;  %v7017_v33 = vld [vmem:[%s11606_s6 + $0x4] sm:$0x3]  ;;  %vm6334_vm6 = vcmask 23552  }
 0xee9   :  { %v10830_v2 = vadd.f32 1e-06, %v5142_v4  ;;  %v5210_v4 = vrot.slane %v7017_v33, %v11659_v55 }
 0xeea   :  { %v5163_v31 = vsel %vm424_vm10, %v10834_v58, 0.0  ;;  %8700 = vmatprep.subr.bf16.mxu1 %v8699_v61 }
 0xeeb   :  { %v5160_v36 = vsel %vm424_vm10, %v10830_v2, 0.0  ;;  %8702 = vmatpush3.bf16.msra.mxu1 %v8699_v61 }
 0xeec   :  { %5161 = vadd.xlane.f32.xlu0 %v5160_v36  ;;  %8704 = vmatprep.subr.bf16.mxu1 %v8703_v27 }
 0xeef   :  { %8706 = vmatpush3.bf16.msra.mxu1 %v8703_v27 }
 0xef0   :  { %5164 = vadd.xlane.f32.xlu0 %v5163_v31  ;;  %v11672_v31 = vld [vmem:[#allocation4_spill] sm:$0xff] }
 0xf74   :  { %v5159_v60 = vpop.xlane.xlu1 %5158 }
 0xf75   :  { %v5168_v50 = vmul.f32 0.03125, %v5159_v60  ;;  %v5156_v0 = vpop.xlane.xlu0 %5155  ;;  %v5218_v60 = vrot.slane %v7017_v33, %v11672_v31 }
 0xf76   :  { %v5167_v42 = vmul.f32 0.03125, %v5156_v0 }
 0xf77   :  { %v5172_v1 = vsub.f32 %v10822_v35, %v5168_v50 }
 0xf78   :  { %v5171_v40 = vsub.f32 %v10824_v53, %v5167_v42 }
 0xf79   :  { %v5162_v8 = vpop.xlane.xlu0 %5161  ;;  %v5176_v54 = vmul.f32 %v5172_v1, %v5172_v1 }
 0xf7a   :  { %v5169_v15 = vmul.f32 0.03125, %v5162_v8  ;;  %v5175_v29 = vmul.f32 %v5171_v40, %v5171_v40 }
 0xf7b   :  { %v5182_v41 = vsel %vm424_vm10, %v5176_v54, 0.0 }
 0xf7c   :  { %v5173_v16 = vsub.f32 %v10830_v2, %v5169_v15  ;;  %5183 = vadd.xlane.f32.xlu0 %v5182_v41  ;;  %v5179_v62 = vsel %vm424_vm10, %v5175_v29, 0.0 }
 0xf7d   :  { %5180 = vadd.xlane.f32.xlu1 %v5179_v62  ;;  %v5165_v9 = vpop.xlane.xlu0 %5164 }
 0xf7e   :  { %v5170_v32 = vmul.f32 0.03125, %v5165_v9  ;;  %v5177_v39 = vmul.f32 %v5173_v16, %v5173_v16 }
 0xf80   :  { %v5174_v56 = vsub.f32 %v10834_v58, %v5170_v32  ;;  %v5185_v63 = vsel %vm424_vm10, %v5177_v39, 0.0 }
 0xf81   :  { %5186 = vadd.xlane.f32.xlu1 %v5185_v63 }
 0xf82   :  { %v5178_v3 = vmul.f32 %v5174_v56, %v5174_v56 }
 0xf84   :  { %v5188_v22 = vsel %vm424_vm10, %v5178_v3, 0.0 }
 0xf85   :  { %5189 = vadd.xlane.f32.xlu0 %v5188_v22 }
0x1009   :  { %v5184_v28 = vpop.xlane.xlu0 %5183 }
0x100a   :  { %v5192_v38 = vmul.f32 0.03125, %v5184_v28  ;;  %v5181_v12 = vpop.xlane.xlu1 %5180 }
0x100b   :  { %v5191_v10 = vmul.f32 0.03125, %v5181_v12 }
0x100c   :  { %v5196_v5 = vadd.f32 1e-05, %v5192_v38  ;;  %v5426_v38 = vrot.slane %v5412_v47, %v11658_v37 }
0x100d   :  { %v5195_v23 = vadd.f32 1e-05, %v5191_v10 }
0x100e   :  { %9124 = vrsqrt.f32 %v5196_v5  ;;  %v5187_v48 = vpop.xlane.xlu1 %5186 }
0x100f   :  { %9126 = vrsqrt.f32 %v5195_v23  ;;  %v5193_v25 = vmul.f32 0.03125, %v5187_v48  ;;  %v5435_v23 = vrot.slane %v5426_v38, %v11659_v55 }
0x1011   :  { %v5197_v30 = vadd.f32 1e-05, %v5193_v25 }
0x1012   :  { %v5190_v46 = vpop.xlane.xlu0 %5189 }
0x1013   :  { %9128 = vrsqrt.f32 %v5197_v30  ;;  %v5194_v20 = vmul.f32 0.03125, %v5190_v46 }
0x1014   :  { %9130 = vrcp.f32 %v10822_v35 }
0x1015   :  { %9132 = vrcp.f32 %v10824_v53  ;;  %v5198_v6 = vadd.f32 1e-05, %v5194_v20 }
0x1017   :  { %9134 = vrsqrt.f32 %v5198_v6 }
0x1018   :  { %v9125_v7 = vpop.eup %9124  ;;  %9136 = vrcp.f32 %v10830_v2 }
0x1019   :  { %v9127_v36 = vpop.eup %9126  ;;  %v5204_v50 = vmul.f32 %v9125_v7, %v5172_v1  ;;  %9138 = vrcp.f32 %v10834_v58 }
0x101a   :  { %v5203_v0 = vmul.f32 %v9127_v36, %v5171_v40 }
0x101b   :  { %v5212_v42 = vmul.f32 %v5210_v4, %v5204_v50 }
0x101c   :  { %v5211_v35 = vmul.f32 %v5210_v4, %v5203_v0 }
0x101d   :  { %v9129_v8 = vpop.eup %9128  ;;  %v5220_v54 = vadd.f32 %v5218_v60, %v5212_v42 }
0x101e   :  { %v9131_v15 = vpop.eup %9130  ;;  %v5205_v53 = vmul.f32 %v9129_v8, %v5173_v16  ;;  %v5219_v29 = vadd.f32 %v5218_v60, %v5211_v35 }
0x101f   :  { %v9133_v41 = vpop.eup %9132  ;;  %v5228_v62 = vmul.f32 %v9131_v15, %v5220_v54 }
0x1020   :  { %v5213_v9 = vmul.f32 %v5210_v4, %v5205_v53  ;;  %v5227_v32 = vmul.f32 %v9133_v41, %v5219_v29  ;;  %v7005_v29 = vld [vmem:[%s11604_s4 + $0x120] sm:$0xff]  ;;  %v7006_v41 = vld [vmem:[%s11604_s4 + $0x128] sm:$0xff] }
0x1021   :  { %v9135_v39 = vpop.eup %9134  ;;  %v10877_v3 = vmul.f32 %v5228_v62, %v10769_v13 }
0x1022   :  { %v5206_v63 = vmul.f32 %v9135_v39, %v5174_v56  ;;  %v10874_v2 = vmul.f32 %v5227_v32, %v10772_v45  ;;  %v5221_v1 = vadd.f32 %v5218_v60, %v5213_v9  ;;  %v9137_v40 = vpop.eup %9136  ;;  %v10892_v44 = vmul.f32 %v5227_v32, %v10766_v18  ;;  %v7007_v9 = vld [vmem:[%s11604_s4 + $0x130] sm:$0xff] }
0x1023   :  { %v9139_v43 = vpop.eup %9138 }
0x1024   :  { %v5214_v22 = vmul.f32 %v5210_v4, %v5206_v63  ;;  %8276 = vmatprep.mubr.msk.f32.mxu1 %vm424_vm10, %v10874_v2  ;;  %v5229_v58 = vmul.f32 %v9137_v40, %v5221_v1 }
0x1025   :  { %8277 = vmatmul.mubr.msk.f32.vlgmr.msra.gmra.mrb[60].mxu1 %vm424_vm10, %v10877_v3 }
0x1026   :  { %v10884_v16 = vmul.f32 %v5229_v58, %v10795_v17  ;;  %v5222_v56 = vadd.f32 %v5218_v60, %v5214_v22  ;;  %v10899_v17 = vmul.f32 %v5228_v62, %v10762_v57  ;;  %v10902_v61 = vmul.f32 %v5229_v58, %v10782_v34 }
0x1027   :  { %v10919_v57 = vmul.f32 %v5228_v62, %v10790_v49  ;;  %v10922_v34 = vmul.f32 %v5229_v58, %v10816_v26  ;;  %v7003_v49 = vld [vmem:[%s11604_s4 + $0x110] sm:$0xff]  ;;  %v8715_v62 = vpack.c.bf16 %v7006_v41, %v7005_v29 }
0x1028   :  { %8279 = vmatprep.mubr.msk.f32.mxu1 %vm424_vm10, %v10884_v16  ;;  %v5230_v45 = vmul.f32 %v9139_v43, %v5222_v56 }
0x1029   :  { %8716 = vmatprep.subr.bf16.mxu1 %v8715_v62 }
0x102a   :  { %v10889_v13 = vmul.f32 %v5230_v45, %v10787_v21  ;;  %v10909_v18 = vmul.f32 %v5230_v45, %v10777_v14  ;;  %v10912_v21 = vmul.f32 %v5227_v32, %v10798_v51  ;;  %v10929_v14 = vmul.f32 %v5230_v45, %v10811_v52  ;;  %v7004_v51 = vld [vmem:[%s11604_s4 + $0x118] sm:$0xff]  ;;  %8718 = vmatpush3.bf16.msra.mxu1 %v8715_v62 }
0x102b   :  { %v8711_v26 = vpack.c.bf16 %v7004_v51, %v7003_v49  ;;  %v5419_v52 = vrot.slane %v7278_v24, %v11658_v37  ;;  %v7008_v32 = vld [vmem:[%s11604_s4 + $0x138] sm:$0xff] }
0x102c   :  { %8280 = vmatmul.mubr.msk.f32.gmra.mrb[62].mxu1 %vm424_vm10, %v10889_v13  ;;  %v8719_v39 = vpack.c.bf16 %v7008_v32, %v7007_v9 }
0x102d   :  { %8282 = vmatprep.mubr.msk.f32.mxu1 %vm424_vm10, %v10892_v44  ;;  %8712 = vmatprep.subr.bf16.mxu0 %v8711_v26  ;;  %v5431_v11 = vrot.slane %v5419_v52, %v11659_v55  ;;  %v5427_v20 = vcombine.high %v5419_v52, %v5419_v52 }
0x102e   :  { %8714 = vmatpush3.bf16.msra.mxu0 %v8711_v26  ;;  %8720 = vmatprep.subr.bf16.mxu1 %v8719_v39 }
0x102f   :  { %v5439_v36 = vrot.slane %v5427_v20, %v11659_v55  ;;  %8722 = vmatpush3.bf16.msra.mxu1 %v8719_v39 }
0x1030   :  { %8283 = vmatmul.mubr.msk.f32.gmra.mrb[64].mxu1 %vm424_vm10, %v10899_v17 }
0x1031   :  { %8285 = vmatprep.mubr.msk.f32.mxu1 %vm424_vm10, %v10902_v61 }
0x1034   :  { %8286 = vmatmul.mubr.msk.f32.gmra.mrb[66].mxu1 %vm424_vm10, %v10909_v18 }
0x1035   :  { %8288 = vmatprep.mubr.msk.f32.mxu1 %vm424_vm10, %v10912_v21 }
0x1038   :  { %8289 = vmatmul.mubr.msk.f32.gmra.mrb[68].mxu1 %vm424_vm10, %v10919_v57 }
0x1039   :  { %8291 = vmatprep.mubr.msk.f32.mxu1 %vm424_vm10, %v10922_v34 }
0x103c   :  { %8292 = vmatmul.mubr.msk.f32.gmra.mrb[70].mxu1 %vm424_vm10, %v10929_v14 }
0x10f8   :  { %v8278_v27 = vpop.f32.mrb[60].mxu1 }
0x10f9   :  { %v5345_v19 = vpop.f32.mrb[61].mxu1  ;;  %v10946_v28 = vadd.f32 %v8278_v27, %v5431_v11 }
0x10fa   :  { %v10944_v59 = vadd.f32 %v5431_v11, %v5345_v19 }
0x10fc   :  { %8302 = vmatprep.mubr.msk.f32.mxu0 %vm424_vm10, %v10944_v59 }
0x10fd   :  { %8303 = vmatmul.mubr.msk.f32.vlgmr.msra.gmra.mrb[104].mxu0 %vm424_vm10, %v10946_v28 }
0x10ff   :  { %v8281_v12 = vpop.f32.mrb[62].mxu1 }
0x1100   :  { %v5355_v10 = vpop.f32.mrb[63].mxu1  ;;  %v10956_v48 = vadd.f32 %v8281_v12, %v5431_v11 }
0x1101   :  { %v10953_v5 = vadd.f32 %v5431_v11, %v5355_v10 }
0x1103   :  { %v8284_v25 = vpop.f32.mrb[64].mxu1  ;;  %8305 = vmatprep.mubr.msk.f32.mxu0 %vm424_vm10, %v10953_v5 }
0x1104   :  { %v5365_v30 = vpop.f32.mrb[65].mxu1  ;;  %8306 = vmatmul.mubr.msk.f32.gmra.mrb[106].mxu0 %vm424_vm10, %v10956_v48  ;;  %v10964_v33 = vadd.f32 %v8284_v25, %v5435_v23 }
0x1105   :  { %v10962_v46 = vadd.f32 %v5435_v23, %v5365_v30 }
0x1107   :  { %v8287_v6 = vpop.f32.mrb[66].mxu1  ;;  %8308 = vmatprep.mubr.msk.f32.mxu0 %vm424_vm10, %v10962_v46 }
0x1108   :  { %v5375_v4 = vpop.f32.mrb[67].mxu1  ;;  %8309 = vmatmul.mubr.msk.f32.gmra.mrb[108].mxu0 %vm424_vm10, %v10964_v33  ;;  %v10973_v60 = vadd.f32 %v8287_v6, %v5435_v23 }
0x1109   :  { %v10970_v7 = vadd.f32 %v5435_v23, %v5375_v4 }
0x110b   :  { %v8290_v50 = vpop.f32.mrb[68].mxu1  ;;  %8311 = vmatprep.mubr.msk.f32.mxu0 %vm424_vm10, %v10970_v7 }
0x110c   :  { %v5385_v0 = vpop.f32.mrb[69].mxu1  ;;  %8312 = vmatmul.mubr.msk.f32.gmra.mrb[110].mxu0 %vm424_vm10, %v10973_v60  ;;  %v10981_v35 = vadd.f32 %v8290_v50, %v5439_v36 }
0x110d   :  { %v10979_v42 = vadd.f32 %v5439_v36, %v5385_v0 }
0x110f   :  { %v8293_v8 = vpop.f32.mrb[70].mxu1  ;;  %8314 = vmatprep.mubr.msk.f32.mxu0 %vm424_vm10, %v10979_v42 }
0x1110   :  { %v5395_v54 = vpop.f32.mrb[71].mxu1  ;;  %8315 = vmatmul.mubr.msk.f32.gmra.mrb[112].mxu0 %vm424_vm10, %v10981_v35  ;;  %v10989_v53 = vadd.f32 %v8293_v8, %v5439_v36 }
0x1111   :  { %v10987_v15 = vadd.f32 %v5439_v36, %v5395_v54 }
0x1113   :  { %8317 = vmatprep.mubr.msk.f32.mxu0 %vm424_vm10, %v10987_v15 }
0x1114   :  { %8318 = vmatmul.mubr.msk.f32.gmra.mrb[114].mxu0 %vm424_vm10, %v10989_v53 }
0x11d0   :  { %v11007_v63 = vpop.f32.mrb[104].mxu0 }
0x11d1   :  { %v11009_v1 = vpop.f32.mrb[105].mxu0  ;;  %v5617_v56 = vmul.f32 %v11007_v63, %v10946_v28  ;;  %v5637_v43 = vmul.f32 %v11007_v63, %v11007_v63 }
0x11d2   :  { %v5616_v26 = vmul.f32 %v11009_v1, %v10944_v59  ;;  %v5636_v24 = vmul.f32 %v11009_v1, %v11009_v1 }
0x11d7   :  { %v11011_v40 = vpop.f32.mrb[106].mxu0 }
0x11d8   :  { %v11013_v22 = vpop.f32.mrb[107].mxu0  ;;  %v5619_v10 = vmul.f32 %v11011_v40, %v10956_v48  ;;  %v5639_v23 = vmul.f32 %v11011_v40, %v11011_v40 }
0x11d9   :  { %v5618_v6 = vmul.f32 %v11013_v22, %v10953_v5  ;;  %v5638_v4 = vmul.f32 %v11013_v22, %v11013_v22 }
0x11db   :  { %v8310_v58 = vpop.f32.mrb[108].mxu0 }
0x11dc   :  { %v5621_v45 = vmul.f32 %v8310_v58, %v10964_v33  ;;  %v5641_v49 = vmul.f32 %v8310_v58, %v8310_v58  ;;  %v11020_v51 = vpop.f32.mrb[109].mxu0 }
0x11dd   :  { %v5620_v52 = vmul.f32 %v11020_v51, %v10962_v46  ;;  %v5640_v11 = vmul.f32 %v11020_v51, %v11020_v51 }
0x11de   :  { %v5625_v27 = vadd.f32 %v5621_v45, %v5617_v56  ;;  %v5645_v19 = vadd.f32 %v5641_v49, %v5637_v43 }
0x11df   :  { %v5624_v47 = vadd.f32 %v5620_v52, %v5616_v26  ;;  %v5644_v38 = vadd.f32 %v5640_v11, %v5636_v24  ;;  %v11030_v12 = vpop.f32.mrb[110].mxu0 }
0x11e0   :  { %v5623_v25 = vmul.f32 %v11030_v12, %v10973_v60  ;;  %v5643_v30 = vmul.f32 %v11030_v12, %v11030_v12  ;;  %v11040_v20 = vpop.f32.mrb[111].mxu0 }
0x11e1   :  { %v5622_v36 = vmul.f32 %v11040_v20, %v10970_v7  ;;  %v5642_v50 = vmul.f32 %v11040_v20, %v11040_v20 }
0x11e2   :  { %v5627_v0 = vadd.f32 %v5623_v25, %v5619_v10  ;;  %v5647_v8 = vadd.f32 %v5643_v30, %v5639_v23 }
0x11e3   :  { %v5626_v54 = vadd.f32 %v5622_v36, %v5618_v6  ;;  %v5646_v29 = vadd.f32 %v5642_v50, %v5638_v4  ;;  %v8316_v41 = vpop.f32.mrb[112].mxu0 }
0x11e4   :  { %v5629_v62 = vmul.f32 %v8316_v41, %v10981_v35  ;;  %v5649_v9 = vmul.f32 %v8316_v41, %v8316_v41  ;;  %v5597_v32 = vpop.f32.mrb[113].mxu0 }
0x11e5   :  { %v5628_v39 = vmul.f32 %v5597_v32, %v10979_v42  ;;  %v5648_v56 = vmul.f32 %v5597_v32, %v5597_v32 }
0x11e6   :  { %v11052_v43 = vadd.f32 %v5629_v62, %v5625_v27  ;;  %v5653_v45 = vadd.f32 %v5649_v9, %v5645_v19 }
0x11e7   :  { %v11054_v49 = vadd.f32 %v5628_v39, %v5624_v47  ;;  %v5652_v26 = vadd.f32 %v5648_v56, %v5644_v38  ;;  %v8319_v24 = vpop.f32.mrb[114].mxu0  ;;  %v5717_v39 = vmul.f32 0.2, %v10946_v28 }
0x11e8   :  { %v5657_v52 = vadd.f32 1e-06, %v5653_v45  ;;  %v5631_v11 = vmul.f32 %v8319_v24, %v10989_v53  ;;  %v5651_v10 = vmul.f32 %v8319_v24, %v8319_v24  ;;  %v5607_v23 = vpop.f32.mrb[115].mxu0  ;;  %vm5693_vm8 = vcmp.ge.f32.partialorder %v11052_v43, 0.0 }
0x11e9   :  { %v5656_v25 = vadd.f32 1e-06, %v5652_v26  ;;  %v5630_v30 = vmul.f32 %v5607_v23, %v10987_v15  ;;  %v5650_v6 = vmul.f32 %v5607_v23, %v5607_v23  ;;  %vm5692_vm9 = vcmp.ge.f32.partialorder %v11054_v49, 0.0 }
0x11ea   :  { %9140 = vrcp.f32 %v5657_v52  ;;  %v11058_v4 = vadd.f32 %v5631_v11, %v5627_v0  ;;  %v5655_v36 = vadd.f32 %v5651_v10, %v5647_v8 }
0x11eb   :  { %9142 = vrcp.f32 %v5656_v25  ;;  %v11060_v27 = vadd.f32 %v5630_v30, %v5626_v54  ;;  %v5654_v19 = vadd.f32 %v5650_v6, %v5646_v29  ;;  %v5716_v54 = vmul.f32 0.2, %v10944_v59 }
0x11ec   :  { %v5659_v47 = vadd.f32 1e-06, %v5655_v36  ;;  %vm5695_vm11 = vcmp.ge.f32.partialorder %v11058_v4, 0.0 }
0x11ed   :  { %v5658_v38 = vadd.f32 1e-06, %v5654_v19  ;;  %vm5694_vm12 = vcmp.ge.f32.partialorder %v11060_v27, 0.0 }
0x11ee   :  { %9144 = vrcp.f32 %v5659_v47 }
0x11ef   :  { %9146 = vrcp.f32 %v5658_v38 }
0x11f4   :  { %v9141_v50 = vpop.eup %9140 }
0x11f5   :  { %v9143_v62 = vpop.eup %9142  ;;  %v5665_v9 = vmul.f32 %v9141_v50, %v11052_v43 }
0x11f6   :  { %v5664_v56 = vmul.f32 %v9143_v62, %v11054_v49 }
0x11f7   :  { %v5669_v0 = vmul.f32 %v11007_v63, %v5665_v9  ;;  %v5673_v45 = vmul.f32 %v8310_v58, %v5665_v9  ;;  %v5677_v8 = vmul.f32 %v8316_v41, %v5665_v9 }
0x11f8   :  { %v9145_v26 = vpop.eup %9144  ;;  %v5668_v29 = vmul.f32 %v5664_v56, %v11009_v1  ;;  %v5672_v52 = vmul.f32 %v5664_v56, %v11020_v51  ;;  %v5676_v11 = vmul.f32 %v5664_v56, %v5597_v32 }
0x11f9   :  { %v9147_v10 = vpop.eup %9146  ;;  %v5681_v25 = vsub.f32 %v10946_v28, %v5669_v0  ;;  %v5667_v30 = vmul.f32 %v9145_v26, %v11058_v4  ;;  %v5685_v63 = vsub.f32 %v10964_v33, %v5673_v45  ;;  %v5689_v50 = vsub.f32 %v10981_v35, %v5677_v8 }
0x11fa   :  { %v5680_v58 = vsub.f32 %v10944_v59, %v5668_v29  ;;  %v5684_v41 = vsub.f32 %v10962_v46, %v5672_v52  ;;  %v5666_v1 = vmul.f32 %v9147_v10, %v11060_v27  ;;  %v5718_v26 = vmul.f32 0.2, %v10953_v5 }
0x11fb   :  { %v5705_v51 = vsel %vm5693_vm8, %v10946_v28, %v5681_v25  ;;  %v5671_v32 = vmul.f32 %v11011_v40, %v5667_v30  ;;  %v5675_v6 = vmul.f32 %v11030_v12, %v5667_v30  ;;  %v5679_v36 = vmul.f32 %v8319_v24, %v5667_v30 }
0x11fc   :  { %v5670_v19 = vmul.f32 %v5666_v1, %v11013_v22  ;;  %v5674_v47 = vmul.f32 %v5666_v1, %v11040_v20  ;;  %v5678_v38 = vmul.f32 %v5666_v1, %v5607_v23  ;;  %v5704_v28 = vsel %vm5692_vm9, %v10944_v59, %v5680_v58 }
0x11fd   :  { %v5683_v62 = vsub.f32 %v10956_v48, %v5671_v32  ;;  %v5687_v9 = vsub.f32 %v10973_v60, %v5675_v6  ;;  %v5729_v40 = vmul.f32 0.8, %v5705_v51  ;;  %v5688_v12 = vsub.f32 %v10979_v42, %v5676_v11 }
0x11fe   :  { %v5682_v22 = vsub.f32 %v10953_v5, %v5670_v19  ;;  %v5686_v20 = vsub.f32 %v10970_v7, %v5674_v47  ;;  %v5728_v24 = vmul.f32 0.8, %v5704_v28  ;;  %v5708_v56 = vsel %vm5692_vm9, %v10962_v46, %v5684_v41 }
0x11ff   :  { %v5707_v23 = vsel %vm5695_vm11, %v10956_v48, %v5683_v62  ;;  %v5709_v59 = vsel %vm5693_vm8, %v10964_v33, %v5685_v63  ;;  %v5691_v0 = vsub.f32 %v10989_v53, %v5679_v36  ;;  %v5690_v45 = vsub.f32 %v10987_v15, %v5678_v38 }
0x1200   :  { %v5706_v8 = vsel %vm5694_vm12, %v10953_v5, %v5682_v22  ;;  %v5740_v29 = vadd.f32 %v5728_v24, %v5716_v54  ;;  %v5710_v11 = vsel %vm5694_vm12, %v10970_v7, %v5686_v20  ;;  %v5711_v10 = vsel %vm5695_vm11, %v10973_v60, %v5687_v9 }
0x1201   :  { %v5730_v52 = vmul.f32 0.8, %v5706_v8  ;;  %v5741_v25 = vadd.f32 %v5729_v40, %v5717_v39  ;;  %v5731_v30 = vmul.f32 0.8, %v5707_v23  ;;  %v5732_v58 = vmul.f32 0.8, %v5708_v56 }
0x1202   :  { %8328 = vmatprep.mubr.msk.f32.mxu1 %vm424_vm10, %v5740_v29  ;;  %v5712_v5 = vsel %vm5692_vm9, %v10979_v42, %v5688_v12  ;;  %v5713_v54 = vsel %vm5693_vm8, %v10981_v35, %v5689_v50  ;;  %v5719_v41 = vmul.f32 0.2, %v10956_v48  ;;  %v5714_v39 = vsel %vm5694_vm12, %v10987_v15, %v5690_v45 }
0x1203   :  { %v5742_v63 = vadd.f32 %v5730_v52, %v5718_v26  ;;  %8329 = vmatmul.mubr.msk.f32.vlgmr.msra.gmra.mrb[72].mxu1 %vm424_vm10, %v5741_v25  ;;  %v5720_v1 = vmul.f32 0.2, %v10962_v46  ;;  %v5715_v49 = vsel %vm5695_vm11, %v10989_v53, %v5691_v0  ;;  %v5733_v32 = vmul.f32 0.8, %v5709_v59 }
0x1204   :  { %v5743_v51 = vadd.f32 %v5731_v30, %v5719_v41  ;;  %v5734_v6 = vmul.f32 0.8, %v5710_v11  ;;  %v5721_v48 = vmul.f32 0.2, %v10964_v33  ;;  %v5722_v27 = vmul.f32 0.2, %v10970_v7 }
0x1205   :  { %8331 = vmatprep.mubr.msk.f32.mxu1 %vm424_vm10, %v5742_v63  ;;  %v5744_v43 = vadd.f32 %v5732_v58, %v5720_v1  ;;  %v5735_v19 = vmul.f32 0.8, %v5711_v10  ;;  %v5736_v46 = vmul.f32 0.8, %v5712_v5  ;;  %v5723_v4 = vmul.f32 0.2, %v10973_v60 }
0x1206   :  { %v5745_v36 = vadd.f32 %v5733_v32, %v5721_v48  ;;  %v5746_v47 = vadd.f32 %v5734_v6, %v5722_v27  ;;  %v5724_v38 = vmul.f32 0.2, %v10979_v42  ;;  %v5737_v62 = vmul.f32 0.8, %v5713_v54 }
0x1207   :  { %8332 = vmatmul.mubr.msk.f32.gmra.mrb[74].mxu1 %vm424_vm10, %v5743_v51  ;;  %v5747_v50 = vadd.f32 %v5735_v19, %v5723_v4  ;;  %v5738_v33 = vmul.f32 0.8, %v5714_v39  ;;  %v5725_v7 = vmul.f32 0.2, %v10981_v35  ;;  %v5726_v28 = vmul.f32 0.2, %v10987_v15 }
0x1208   :  { %8334 = vmatprep.mubr.msk.f32.mxu1 %vm424_vm10, %v5744_v43  ;;  %v5748_v9 = vadd.f32 %v5736_v46, %v5724_v38  ;;  %v5739_v12 = vmul.f32 0.8, %v5715_v49  ;;  %v5727_v60 = vmul.f32 0.2, %v10989_v53  ;;  %vm9197_vm12 = vmmov 0  }
0x1209   :  { %v5749_v40 = vadd.f32 %v5737_v62, %v5725_v7  ;;  %v5750_v22 = vadd.f32 %v5738_v33, %v5726_v28  ;;  %v7303_v35 = vld.sshfl [vmem:[%s11605_s5 + $0x1c] sm:$0x13 pattern:$0x75316420] }
0x120a   :  { %v5751_v42 = vadd.f32 %v5739_v12, %v5727_v60  ;;  %v5921_v20 = vcombine.high %v7303_v35, %v7303_v35  ;;  %v5928_v56 = vrot.slane %v7303_v35, %v11658_v37 }
0x120b   :  { %8335 = vmatmul.mubr.msk.f32.gmra.mrb[76].mxu1 %vm424_vm10, %v5745_v36 }
0x120c   :  { %8337 = vmatprep.mubr.msk.f32.mxu1 %vm424_vm10, %v5746_v47  ;;  %v5935_v15 = vrot.slane %v5921_v20, %v11658_v37  ;;  %v5940_v45 = vrot.slane %v5928_v56, %v11659_v55  ;;  %v5936_v52 = vcombine.high %v5928_v56, %v5928_v56 }
0x120e   :  { %v5944_v53 = vrot.slane %v5935_v15, %v11659_v55  ;;  %v5948_v54 = vrot.slane %v5936_v52, %v11659_v55 }
0x120f   :  { %8338 = vmatmul.mubr.msk.f32.gmra.mrb[78].mxu1 %vm424_vm10, %v5747_v50 }
0x1210   :  { %8340 = vmatprep.mubr.msk.f32.mxu1 %vm424_vm10, %v5748_v9 }
0x1213   :  { %8341 = vmatmul.mubr.msk.f32.gmra.mrb[80].mxu1 %vm424_vm10, %v5749_v40 }
0x1214   :  { %8343 = vmatprep.mubr.msk.f32.mxu1 %vm424_vm10, %v5750_v22 }
0x1217   :  { %8344 = vmatmul.mubr.msk.f32.gmra.mrb[82].mxu1 %vm424_vm10, %v5751_v42 }
0x12d6   :  { %v8330_v24 = vpop.f32.mrb[72].mxu1 }
0x12d7   :  { %v5854_v23 = vpop.f32.mrb[73].mxu1  ;;  %v5953_v10 = vadd.f32 %v8330_v24, %v5940_v45 }
0x12d8   :  { %v5952_v25 = vadd.f32 %v5940_v45, %v5854_v23 }
0x12d9   :  { %v11164_v1 = vadd.f32 %v5953_v10, %v10877_v3 }
0x12da   :  { %v8333_v59 = vpop.f32.mrb[74].mxu1  ;;  %v11167_v51 = vadd.f32 %v5952_v25, %v10874_v2 }
0x12db   :  { %v5864_v0 = vpop.f32.mrb[75].mxu1  ;;  %v5955_v49 = vadd.f32 %v8333_v59, %v5940_v45  ;;  %v5977_v2 = vmul.f32 %v11164_v1, %v11164_v1 }
0x12dc   :  { %v5954_v32 = vadd.f32 %v5940_v45, %v5864_v0 }
0x12dd   :  { %v11182_v19 = vadd.f32 %v5955_v49, %v10889_v13 }
0x12de   :  { %v8336_v8 = vpop.f32.mrb[76].mxu1  ;;  %v11190_v46 = vadd.f32 %v5954_v32, %v10884_v16 }
0x12df   :  { %v5957_v26 = vadd.f32 %v8336_v8, %v5944_v53  ;;  %v5874_v29 = vpop.f32.mrb[77].mxu1 }
0x12e0   :  { %v5956_v11 = vadd.f32 %v5944_v53, %v5874_v29  ;;  %v5978_v12 = vmul.f32 %v11190_v46, %v11190_v46 }
0x12e1   :  { %v11157_v63 = vadd.f32 %v5957_v26, %v10899_v17 }
0x12e2   :  { %v8339_v30 = vpop.f32.mrb[78].mxu1  ;;  %v11161_v41 = vadd.f32 %v5956_v11, %v10892_v44 }
0x12e3   :  { %v5959_v58 = vadd.f32 %v8339_v30, %v5944_v53  ;;  %v5884_v5 = vpop.f32.mrb[79].mxu1  ;;  %v5981_v17 = vmul.f32 %v11157_v63, %v11157_v63 }
0x12e4   :  { %v5958_v39 = vadd.f32 %v5944_v53, %v5884_v5  ;;  %v5980_v44 = vmul.f32 %v11161_v41, %v11161_v41 }
0x12e5   :  { %v11172_v6 = vadd.f32 %v5959_v58, %v10909_v18  ;;  %v5976_v18 = vmul.f32 %v11167_v51, %v11167_v51  ;;  %v5985_v38 = vadd.f32 %v5981_v17, %v5977_v2 }
0x12e6   :  { %v8342_v43 = vpop.f32.mrb[80].mxu1  ;;  %v11177_v3 = vadd.f32 %v5958_v39, %v10902_v61 }
0x12e7   :  { %v5961_v48 = vadd.f32 %v8342_v43, %v5948_v54  ;;  %v5894_v27 = vpop.f32.mrb[81].mxu1  ;;  %v5983_v50 = vmul.f32 %v11172_v6, %v11172_v6  ;;  %v5984_v9 = vadd.f32 %v5980_v44, %v5976_v18 }
0x12e8   :  { %v5960_v36 = vadd.f32 %v5948_v54, %v5894_v27  ;;  %v5982_v33 = vmul.f32 %v11177_v3, %v11177_v3 }
0x12e9   :  { %v11185_v47 = vadd.f32 %v5961_v48, %v10919_v57 }
0x12ea   :  { %v11193_v4 = vadd.f32 %v5960_v36, %v10912_v21  ;;  %v8345_v61 = vpop.f32.mrb[82].mxu1  ;;  %v5979_v21 = vmul.f32 %v11182_v19, %v11182_v19  ;;  %v5986_v20 = vadd.f32 %v5982_v33, %v5978_v12 }
0x12eb   :  { %v5989_v13 = vmul.f32 %v11185_v47, %v11185_v47  ;;  %v5963_v62 = vadd.f32 %v8345_v61, %v5948_v54  ;;  %v5904_v57 = vpop.f32.mrb[83].mxu1 }
0x12ec   :  { %v5988_v16 = vmul.f32 %v11193_v4, %v11193_v4  ;;  %v5962_v7 = vadd.f32 %v5948_v54, %v5904_v57  ;;  %v5987_v42 = vadd.f32 %v5983_v50, %v5979_v21 }
0x12ed   :  { %v5993_v28 = vadd.f32 %v5989_v13, %v5985_v38  ;;  %v11206_v40 = vadd.f32 %v5963_v62, %v10929_v14 }
0x12ee   :  { %v5992_v22 = vadd.f32 %v5988_v16, %v5984_v9  ;;  %v11211_v60 = vadd.f32 %v5962_v7, %v10922_v34 }
0x12ef   :  { %v5991_v35 = vmul.f32 %v11206_v40, %v11206_v40  ;;  %9148 = vrsqrt.f32 %v5993_v28  ;;  %vm6005_vm13 = vcmp.eq.f32.partialorder %v5993_v28, inf  ;;  %v6008_v34 = vand.u32 2147483648, %v5993_v28 }
0x12f0   :  { %v5990_v24 = vmul.f32 %v11211_v60, %v11211_v60  ;;  %9150 = vrsqrt.f32 %v5992_v22  ;;  %vm6007_vm14 = vcmp.eq.f32.partialorder %v5993_v28, 0.0  ;;  %vm5998_vm15 = vcmp.eq.f32.partialorder %v5992_v22, inf }
0x12f1   :  { %v5995_v23 = vadd.f32 %v5991_v35, %v5987_v42  ;;  %v6001_v45 = vand.u32 2147483648, %v5992_v22  ;;  %vm6000_vm0 = vcmp.eq.f32.partialorder %v5992_v22, 0.0 }
0x12f2   :  { %v5994_v14 = vadd.f32 %v5990_v24, %v5986_v20 }
0x12f3   :  { %9152 = vrsqrt.f32 %v5995_v23  ;;  %vm6019_vm1 = vcmp.eq.f32.partialorder %v5995_v23, inf  ;;  %vm6021_vm2 = vcmp.eq.f32.partialorder %v5995_v23, 0.0  ;;  %v6022_v58 = vand.u32 2147483648, %v5995_v23 }
0x12f4   :  { %9154 = vrsqrt.f32 %v5994_v14  ;;  %vm6012_vm3 = vcmp.eq.f32.partialorder %v5994_v14, inf  ;;  %v6015_v49 = vand.u32 2147483648, %v5994_v14  ;;  %vm6014_vm4 = vcmp.eq.f32.partialorder %v5994_v14, 0.0 }
0x12f9   :  { %v9149_v15 = vpop.eup %9148 }
0x12fa   :  { %v9151_v56 = vpop.eup %9150  ;;  %v6004_v59 = vmul.f32 %v9149_v15, %v5993_v28  ;;  %v6117_v15 = vld [vmem:[%s11608_s7 + $0x8] sm:$0xff] }
0x12fb   :  { %v5997_v0 = vmul.f32 %v9151_v56, %v5992_v22  ;;  %v6118_v56 = vld [vmem:[%s11608_s7 + $0x10] sm:$0xff] }
0x12fc   :  { %v6006_v53 = vsel %vm6005_vm13, %v5993_v28, %v6004_v59  ;;  %vm6888_vm13 = vcmask 523264  }
0x12fd   :  { %v9153_v8 = vpop.eup %9152  ;;  %v6009_v26 = vsel %vm6007_vm14, %v6008_v34, %v6006_v53  ;;  %v5999_v29 = vsel %vm5998_vm15, %v5992_v22, %v5997_v0  ;;  %v6119_v34 = vld [vmem:[%s11608_s7 + $0x18] sm:$0xff]  ;;  %v6333_v53 = vld [vmem:[%s11609_s9] sm:$0x7]  ;;  %vm6967_vm14 = vcmask 779264  }
0x12fe   :  { %v9155_v52 = vpop.eup %9154  ;;  %v11217_v11 = vadd.f32 1e-06, %v6009_v26  ;;  %v6002_v10 = vsel %vm6000_vm0, %v6001_v45, %v5999_v29  ;;  %v6018_v25 = vmul.f32 %v9153_v8, %v5995_v23  ;;  %v8727_v0 = vpack.c.bf16 %v6119_v34, %v6118_v56  ;;  %8372 = vmatprep.subr.msk.mxu1 %vm6371_vm5, %v6333_v53 }
0x12ff   :  { %v11219_v30 = vadd.f32 1e-06, %v6002_v10  ;;  %v6011_v5 = vmul.f32 %v9155_v52, %v5994_v14  ;;  %8373 = vmatpush3.msk.msra.mxu1 %vm6371_vm5, %v6333_v53 }
0x1300   :  { %v6031_v54 = vsel %vm424_vm10, %v11217_v11, 0.0  ;;  %v6020_v39 = vsel %vm6019_vm1, %v5995_v23, %v6018_v25 }
0x1301   :  { %6032 = vadd.xlane.f32.xlu0 %v6031_v54  ;;  %v6028_v32 = vsel %vm424_vm10, %v11219_v30, 0.0  ;;  %v6023_v43 = vsel %vm6021_vm2, %v6022_v58, %v6020_v39  ;;  %v6013_v17 = vsel %vm6012_vm3, %v5994_v14, %v6011_v5  ;;  %v6116_v14 = vld [vmem:[%s11608_s7] sm:$0xff] }
0x1302   :  { %6029 = vadd.xlane.f32.xlu1 %v6028_v32  ;;  %v11225_v48 = vadd.f32 1e-06, %v6023_v43  ;;  %v6016_v27 = vsel %vm6014_vm4, %v6015_v49, %v6013_v17  ;;  %v8723_v59 = vpack.c.bf16 %v6117_v15, %v6116_v14  ;;  %v7018_v32 = vld [vmem:[%s11606_s6 + $0x6] sm:$0x3] }
0x1303   :  { %v11227_v44 = vadd.f32 1e-06, %v6016_v27  ;;  %v6083_v43 = vrot.slane %v7018_v32, %v11659_v55 }
0x1304   :  { %v6037_v36 = vsel %vm424_vm10, %v11225_v48, 0.0  ;;  %8724 = vmatprep.subr.bf16.mxu0 %v8723_v59 }
0x1305   :  { %6038 = vadd.xlane.f32.xlu0 %v6037_v36  ;;  %v6034_v2 = vsel %vm424_vm10, %v11227_v44, 0.0  ;;  %8726 = vmatpush3.bf16.msra.mxu0 %v8723_v59  ;;  %v6091_v36 = vrot.slane %v7018_v32, %v11672_v31 }
0x1306   :  { %6035 = vadd.xlane.f32.xlu1 %v6034_v2  ;;  %8728 = vmatprep.subr.bf16.mxu0 %v8727_v0 }
0x1309   :  { %8730 = vmatpush3.bf16.msra.mxu0 %v8727_v0 }
0x138e   :  { %v6033_v18 = vpop.xlane.xlu0 %6032 }
0x138f   :  { %v6041_v61 = vmul.f32 0.03125, %v6033_v18  ;;  %v6030_v38 = vpop.xlane.xlu1 %6029 }
0x1390   :  { %v6040_v50 = vmul.f32 0.03125, %v6030_v38 }
0x1391   :  { %v6045_v13 = vsub.f32 %v11217_v11, %v6041_v61 }
0x1392   :  { %v6044_v62 = vsub.f32 %v11219_v30, %v6040_v50  ;;  %v6039_v57 = vpop.xlane.xlu0 %6038 }
0x1393   :  { %v6043_v9 = vmul.f32 0.03125, %v6039_v57  ;;  %v6036_v33 = vpop.xlane.xlu1 %6035  ;;  %v6049_v16 = vmul.f32 %v6045_v13, %v6045_v13 }
0x1394   :  { %v6042_v7 = vmul.f32 0.03125, %v6036_v33  ;;  %v6048_v21 = vmul.f32 %v6044_v62, %v6044_v62 }
0x1395   :  { %v6047_v28 = vsub.f32 %v11225_v48, %v6043_v9  ;;  %v6055_v12 = vsel %vm424_vm10, %v6049_v16, 0.0 }
0x1396   :  { %v6046_v22 = vsub.f32 %v11227_v44, %v6042_v7  ;;  %6056 = vadd.xlane.f32.xlu0 %v6055_v12  ;;  %v6052_v42 = vsel %vm424_vm10, %v6048_v21, 0.0 }
0x1397   :  { %6053 = vadd.xlane.f32.xlu1 %v6052_v42  ;;  %v6051_v35 = vmul.f32 %v6047_v28, %v6047_v28 }
0x1398   :  { %v6050_v20 = vmul.f32 %v6046_v22, %v6046_v22 }
0x1399   :  { %v6061_v24 = vsel %vm424_vm10, %v6051_v35, 0.0 }
0x139a   :  { %6062 = vadd.xlane.f32.xlu0 %v6061_v24  ;;  %v6058_v23 = vsel %vm424_vm10, %v6050_v20, 0.0 }
0x139b   :  { %6059 = vadd.xlane.f32.xlu1 %v6058_v23 }
0x1423   :  { %v6057_v45 = vpop.xlane.xlu0 %6056 }
0x1424   :  { %v6065_v8 = vmul.f32 0.03125, %v6057_v45  ;;  %v6054_v26 = vpop.xlane.xlu1 %6053 }
0x1425   :  { %v6064_v29 = vmul.f32 0.03125, %v6054_v26 }
0x1426   :  { %v6069_v52 = vadd.f32 1e-05, %v6065_v8 }
0x1427   :  { %v6068_v10 = vadd.f32 1e-05, %v6064_v29  ;;  %v6063_v25 = vpop.xlane.xlu0 %6062 }
0x1428   :  { %9156 = vrsqrt.f32 %v6069_v52  ;;  %v6067_v58 = vmul.f32 0.03125, %v6063_v25  ;;  %v6060_v5 = vpop.xlane.xlu1 %6059 }
0x1429   :  { %9158 = vrsqrt.f32 %v6068_v10  ;;  %v6066_v54 = vmul.f32 0.03125, %v6060_v5 }
0x142a   :  { %v6071_v39 = vadd.f32 1e-05, %v6067_v58 }
0x142b   :  { %v6070_v49 = vadd.f32 1e-05, %v6066_v54 }
0x142c   :  { %9160 = vrsqrt.f32 %v6071_v39 }
0x142d   :  { %9162 = vrsqrt.f32 %v6070_v49 }
0x142e   :  { %9164 = vrcp.f32 %v11217_v11 }
0x142f   :  { %9166 = vrcp.f32 %v11219_v30 }
0x1430   :  { %9168 = vrcp.f32 %v11225_v48 }
0x1431   :  { %9170 = vrcp.f32 %v11227_v44 }
0x1432   :  { %v9157_v17 = vpop.eup %9156 }
0x1433   :  { %v9159_v27 = vpop.eup %9158  ;;  %v6077_v2 = vmul.f32 %v9157_v17, %v6045_v13 }
0x1434   :  { %v6076_v18 = vmul.f32 %v9159_v27, %v6044_v62 }
0x1435   :  { %v6085_v61 = vmul.f32 %v6083_v43, %v6077_v2 }
0x1436   :  { %v9161_v11 = vpop.eup %9160  ;;  %v6084_v38 = vmul.f32 %v6083_v43, %v6076_v18 }
0x1437   :  { %v9163_v50 = vpop.eup %9162  ;;  %v6093_v57 = vadd.f32 %v6091_v36, %v6085_v61  ;;  %v6079_v9 = vmul.f32 %v9161_v11, %v6047_v28  ;;  %v9191_v61 = vmov 1  }
0x1438   :  { %v9165_v33 = vpop.eup %9164  ;;  %v6078_v30 = vmul.f32 %v9163_v50, %v6046_v22  ;;  %v6092_v16 = vadd.f32 %v6091_v36, %v6084_v38  ;;  %8965 = vset.pattern.permute.xlu1 %v9191_v61  ;;  %8964 = vset.pattern.permute.xlu0 %v9191_v61 }
0x1439   :  { %v9167_v7 = vpop.eup %9166  ;;  %v6101_v21 = vmul.f32 %v9165_v33, %v6093_v57  ;;  %v6087_v12 = vmul.f32 %v6083_v43, %v6079_v9 }
0x143a   :  { %v6086_v48 = vmul.f32 %v6083_v43, %v6078_v30  ;;  %v6100_v42 = vmul.f32 %v9167_v7, %v6092_v16  ;;  %v9169_v44 = vpop.eup %9168 }
0x143b   :  { %v6095_v35 = vadd.f32 %v6091_v36, %v6087_v12  ;;  %v9171_v62 = vpop.eup %9170  ;;  %v11269_v20 = vmul.f32 %v6101_v21, %v11164_v1 }
0x143c   :  { %v11266_v31 = vmul.f32 %v6100_v42, %v11167_v51  ;;  %v6094_v13 = vadd.f32 %v6091_v36, %v6086_v48  ;;  %v11284_v1 = vmul.f32 %v6100_v42, %v11161_v41  ;;  %v11291_v51 = vmul.f32 %v6101_v21, %v11157_v63 }
0x143d   :  { %v6103_v24 = vmul.f32 %v9169_v44, %v6095_v35  ;;  %v11311_v63 = vmul.f32 %v6101_v21, %v11185_v47  ;;  %v7316_v47 = vld.sshfl [vmem:[%s11610_s8] sm:$0x13 pattern:$0x75316420]  ;;  %s9195_s8 = smov 64  }
0x143e   :  { %8354 = vmatprep.mubr.msk.f32.mxu0 %vm424_vm10, %v11266_v31  ;;  %v6102_v28 = vmul.f32 %v9171_v62, %v6094_v13  ;;  %v6290_v14 = vcombine.high %v7316_v47, %v7316_v47 }
0x143f   :  { %8355 = vmatmul.mubr.msk.f32.vlgmr.msra.gmra.mrb[116].mxu0 %vm424_vm10, %v11269_v20  ;;  %v11279_v23 = vmul.f32 %v6103_v24, %v11182_v19  ;;  %v11301_v41 = vmul.f32 %v6103_v24, %v11172_v6  ;;  %v11304_v19 = vmul.f32 %v6100_v42, %v11193_v4  ;;  %v11321_v6 = vmul.f32 %v6103_v24, %v11206_v40 }
0x1440   :  { %v11276_v22 = vmul.f32 %v6102_v28, %v11190_v46  ;;  %v11294_v46 = vmul.f32 %v6102_v28, %v11177_v3  ;;  %v11314_v3 = vmul.f32 %v6102_v28, %v11211_v60  ;;  %v6297_v4 = vrot.slane %v7316_v47, %v11658_v37 }
0x1441   :  { %v6304_v40 = vrot.slane %v6290_v14, %v11658_v37 }
0x1442   :  { %8357 = vmatprep.mubr.msk.f32.mxu0 %vm424_vm10, %v11276_v22  ;;  %v6309_v60 = vrot.slane %v6297_v4, %v11659_v55  ;;  %v6305_v10 = vcombine.high %v6297_v4, %v6297_v4 }
0x1443   :  { %8358 = vmatmul.mubr.msk.f32.gmra.mrb[118].mxu0 %vm424_vm10, %v11279_v23  ;;  %v6313_v8 = vrot.slane %v6304_v40, %v11659_v55 }
0x1444   :  { %8360 = vmatprep.mubr.msk.f32.mxu0 %vm424_vm10, %v11284_v1  ;;  %v6317_v39 = vrot.slane %v6305_v10, %v11659_v55 }
0x1447   :  { %8361 = vmatmul.mubr.msk.f32.gmra.mrb[120].mxu0 %vm424_vm10, %v11291_v51 }
0x1448   :  { %8363 = vmatprep.mubr.msk.f32.mxu0 %vm424_vm10, %v11294_v46 }
0x144b   :  { %8364 = vmatmul.mubr.msk.f32.gmra.mrb[122].mxu0 %vm424_vm10, %v11301_v41 }
0x144c   :  { %8366 = vmatprep.mubr.msk.f32.mxu0 %vm424_vm10, %v11304_v19 }
0x144f   :  { %8367 = vmatmul.mubr.msk.f32.gmra.mrb[124].mxu0 %vm424_vm10, %v11311_v63 }
0x1450   :  { %8369 = vmatprep.mubr.msk.f32.mxu0 %vm424_vm10, %v11314_v3 }
0x1453   :  { %8370 = vmatmul.mubr.msk.f32.gmra.mrb[126].mxu0 %vm424_vm10, %v11321_v6 }
0x1512   :  { %v8356_v15 = vpop.f32.mrb[116].mxu0 }
0x1513   :  { %v6223_v56 = vpop.f32.mrb[117].mxu0  ;;  %v11333_v34 = vadd.f32 %v8356_v15, %v6309_v60 }
0x1514   :  { %v11330_v59 = vadd.f32 %v6309_v60, %v6223_v56 }
0x1516   :  { %v8359_v0 = vpop.f32.mrb[118].mxu0  ;;  %8374 = vmatprep.mubr.msk.f32.mxu1 %vm6334_vm6, %v11330_v59 }
0x1517   :  { %v6233_v53 = vpop.f32.mrb[119].mxu0  ;;  %8375 = vmatmul.mubr.msk.f32.vlgmr.msra.gmra.mrb[84].mxu1 %vm6334_vm6, %v11333_v34  ;;  %v11342_v26 = vadd.f32 %v8359_v0, %v6309_v60 }
0x1518   :  { %v11339_v45 = vadd.f32 %v6309_v60, %v6233_v53 }
0x151a   :  { %v8362_v29 = vpop.f32.mrb[120].mxu0  ;;  %8377 = vmatprep.mubr.msk.f32.mxu1 %vm6334_vm6, %v11339_v45 }
0x151b   :  { %v6243_v37 = vpop.f32.mrb[121].mxu0  ;;  %8378 = vmatmul.mubr.msk.f32.gmra.mrb[86].mxu1 %vm6334_vm6, %v11342_v26  ;;  %v11350_v25 = vadd.f32 %v8362_v29, %v6313_v8 }
0x151c   :  { %v11348_v52 = vadd.f32 %v6313_v8, %v6243_v37 }
0x151e   :  { %v8365_v58 = vpop.f32.mrb[122].mxu0  ;;  %8380 = vmatprep.mubr.msk.f32.mxu1 %vm6334_vm6, %v11348_v52 }
0x151f   :  { %v6253_v5 = vpop.f32.mrb[123].mxu0  ;;  %8381 = vmatmul.mubr.msk.f32.gmra.mrb[88].mxu1 %vm6334_vm6, %v11350_v25  ;;  %v11359_v49 = vadd.f32 %v8365_v58, %v6313_v8 }
0x1520   :  { %v11356_v54 = vadd.f32 %v6313_v8, %v6253_v5 }
0x1522   :  { %v8368_v32 = vpop.f32.mrb[124].mxu0  ;;  %8383 = vmatprep.mubr.msk.f32.mxu1 %vm6334_vm6, %v11356_v54 }
0x1523   :  { %v6263_v43 = vpop.f32.mrb[125].mxu0  ;;  %8384 = vmatmul.mubr.msk.f32.gmra.mrb[90].mxu1 %vm6334_vm6, %v11359_v49  ;;  %v11367_v27 = vadd.f32 %v8368_v32, %v6317_v39 }
0x1524   :  { %v11365_v17 = vadd.f32 %v6317_v39, %v6263_v43 }
0x1526   :  { %v8371_v36 = vpop.f32.mrb[126].mxu0  ;;  %8386 = vmatprep.mubr.msk.f32.mxu1 %vm6334_vm6, %v11365_v17 }
0x1527   :  { %v6273_v2 = vpop.f32.mrb[127].mxu0  ;;  %8387 = vmatmul.mubr.msk.f32.gmra.mrb[92].mxu1 %vm6334_vm6, %v11367_v27  ;;  %v11375_v18 = vadd.f32 %v8371_v36, %v6317_v39 }
0x1528   :  { %v11373_v55 = vadd.f32 %v6317_v39, %v6273_v2 }
0x152a   :  { %8389 = vmatprep.mubr.msk.f32.mxu1 %vm6334_vm6, %v11373_v55 }
0x152b   :  { %8390 = vmatmul.mubr.msk.f32.gmra.mrb[94].mxu1 %vm6334_vm6, %v11375_v18 }
0x15ea   :  { %v11383_v11 = vpop.f32.mrb[84].mxu1 }
0x15eb   :  { %v11385_v38 = vpop.f32.mrb[85].mxu1  ;;  %v6501_v33 = vmul.f32 %v11383_v11, %v11333_v34  ;;  %v6521_v30 = vmul.f32 %v11383_v11, %v11383_v11 }
0x15ec   :  { %v6500_v12 = vmul.f32 %v11385_v38, %v11330_v59  ;;  %v6520_v48 = vmul.f32 %v11385_v38, %v11385_v38 }
0x15ee   :  { %v11387_v50 = vpop.f32.mrb[86].mxu1 }
0x15ef   :  { %v11389_v57 = vpop.f32.mrb[87].mxu1  ;;  %v6503_v47 = vmul.f32 %v11387_v50, %v11342_v26  ;;  %v6523_v4 = vmul.f32 %v11387_v50, %v11387_v50 }
0x15f0   :  { %v6502_v56 = vmul.f32 %v11389_v57, %v11339_v45  ;;  %v6522_v40 = vmul.f32 %v11389_v57, %v11389_v57 }
0x15f2   :  { %v8382_v9 = vpop.f32.mrb[88].mxu1 }
0x15f3   :  { %v6505_v16 = vmul.f32 %v8382_v9, %v11350_v25  ;;  %v6525_v7 = vmul.f32 %v8382_v9, %v8382_v9  ;;  %v11396_v21 = vpop.f32.mrb[89].mxu1 }
0x15f4   :  { %v6504_v42 = vmul.f32 %v11396_v21, %v11348_v52  ;;  %v6524_v35 = vmul.f32 %v11396_v21, %v11396_v21 }
0x15f5   :  { %v6509_v44 = vadd.f32 %v6505_v16, %v6501_v33  ;;  %v6529_v13 = vadd.f32 %v6525_v7, %v6521_v30 }
0x15f6   :  { %v6508_v62 = vadd.f32 %v6504_v42, %v6500_v12  ;;  %v6528_v24 = vadd.f32 %v6524_v35, %v6520_v48  ;;  %v11406_v28 = vpop.f32.mrb[90].mxu1 }
0x15f7   :  { %v6507_v60 = vmul.f32 %v11406_v28, %v11359_v49  ;;  %v6527_v14 = vmul.f32 %v11406_v28, %v11406_v28  ;;  %v11416_v15 = vpop.f32.mrb[91].mxu1 }
0x15f8   :  { %v6506_v0 = vmul.f32 %v11416_v15, %v11356_v54  ;;  %v6526_v53 = vmul.f32 %v11416_v15, %v11416_v15 }
0x15f9   :  { %v6511_v8 = vadd.f32 %v6507_v60, %v6503_v47  ;;  %v6531_v29 = vadd.f32 %v6527_v14, %v6523_v4 }
0x15fa   :  { %v6510_v37 = vadd.f32 %v6506_v0, %v6502_v56  ;;  %v6530_v10 = vadd.f32 %v6526_v53, %v6522_v40  ;;  %v8388_v58 = vpop.f32.mrb[92].mxu1 }
0x15fb   :  { %v6513_v5 = vmul.f32 %v8388_v58, %v11367_v27  ;;  %v6533_v39 = vmul.f32 %v8388_v58, %v8388_v58  ;;  %v6481_v32 = vpop.f32.mrb[93].mxu1 }
0x15fc   :  { %v6512_v43 = vmul.f32 %v6481_v32, %v11365_v17  ;;  %v6532_v36 = vmul.f32 %v6481_v32, %v6481_v32 }
0x15fd   :  { %v11428_v2 = vadd.f32 %v6513_v5, %v6509_v44  ;;  %v6537_v33 = vadd.f32 %v6533_v39, %v6529_v13  ;;  %v6601_v39 = vmul.f32 0.2, %v11333_v34 }
0x15fe   :  { %v11430_v30 = vadd.f32 %v6512_v43, %v6508_v62  ;;  %v6536_v16 = vadd.f32 %v6532_v36, %v6528_v24  ;;  %v8391_v7 = vpop.f32.mrb[94].mxu1 }
0x15ff   :  { %v6541_v12 = vadd.f32 1e-06, %v6537_v33  ;;  %v6515_v48 = vmul.f32 %v8391_v7, %v11375_v18  ;;  %v6535_v42 = vmul.f32 %v8391_v7, %v8391_v7  ;;  %v6491_v35 = vpop.f32.mrb[95].mxu1  ;;  %vm6577_vm7 = vcmp.ge.f32.partialorder %v11428_v2, 0.0 }
0x1600   :  { %v6540_v47 = vadd.f32 1e-06, %v6536_v16  ;;  %v6514_v4 = vmul.f32 %v6491_v35, %v11373_v55  ;;  %v6534_v60 = vmul.f32 %v6491_v35, %v6491_v35  ;;  %vm6576_vm8 = vcmp.ge.f32.partialorder %v11430_v30, 0.0 }
0x1601   :  { %9172 = vrcp.f32 %v6541_v12  ;;  %v11434_v14 = vadd.f32 %v6515_v48, %v6511_v8  ;;  %v6539_v56 = vadd.f32 %v6535_v42, %v6531_v29 }
0x1602   :  { %9174 = vrcp.f32 %v6540_v47  ;;  %v11436_v44 = vadd.f32 %v6514_v4, %v6510_v37  ;;  %v6538_v13 = vadd.f32 %v6534_v60, %v6530_v10  ;;  %v6605_v37 = vmul.f32 0.2, %v11350_v25 }
0x1603   :  { %v6543_v62 = vadd.f32 1e-06, %v6539_v56  ;;  %vm6579_vm9 = vcmp.ge.f32.partialorder %v11434_v14, 0.0 }
0x1604   :  { %v6542_v24 = vadd.f32 1e-06, %v6538_v13  ;;  %vm6578_vm11 = vcmp.ge.f32.partialorder %v11436_v44, 0.0 }
0x1605   :  { %9176 = vrcp.f32 %v6543_v62 }
0x1606   :  { %9178 = vrcp.f32 %v6542_v24 }
0x160b   :  { %v9173_v40 = vpop.eup %9172 }
0x160c   :  { %v9175_v0 = vpop.eup %9174  ;;  %v6549_v53 = vmul.f32 %v9173_v40, %v11428_v2 }
0x160d   :  { %v6548_v5 = vmul.f32 %v9175_v0, %v11430_v30 }
0x160e   :  { %v6553_v8 = vmul.f32 %v11383_v11, %v6549_v53  ;;  %v6557_v43 = vmul.f32 %v8382_v9, %v6549_v53  ;;  %v6561_v29 = vmul.f32 %v8388_v58, %v6549_v53 }
0x160f   :  { %v9177_v36 = vpop.eup %9176  ;;  %v6552_v10 = vmul.f32 %v6548_v5, %v11385_v38  ;;  %v6556_v33 = vmul.f32 %v6548_v5, %v11396_v21  ;;  %v6560_v16 = vmul.f32 %v6548_v5, %v6481_v32 }
0x1610   :  { %v9179_v12 = vpop.eup %9178  ;;  %v6565_v48 = vsub.f32 %v11333_v34, %v6553_v8  ;;  %v6569_v42 = vsub.f32 %v11350_v25, %v6557_v43  ;;  %v6551_v11 = vmul.f32 %v9177_v36, %v11434_v14  ;;  %v6573_v9 = vsub.f32 %v11367_v27, %v6561_v29 }
0x1611   :  { %v6572_v58 = vsub.f32 %v11365_v17, %v6560_v16  ;;  %v6550_v38 = vmul.f32 %v9179_v12, %v11436_v44  ;;  %v6564_v24 = vsub.f32 %v11330_v59, %v6552_v10  ;;  %v6608_v16 = vmul.f32 0.2, %v11365_v17 }
0x1612   :  { %v6555_v21 = vmul.f32 %v11387_v50, %v6551_v11  ;;  %v6559_v32 = vmul.f32 %v11406_v28, %v6551_v11  ;;  %v6563_v47 = vmul.f32 %v8391_v7, %v6551_v11  ;;  %v6593_v4 = vsel %vm6577_vm7, %v11350_v25, %v6569_v42 }
0x1613   :  { %v6554_v60 = vmul.f32 %v6550_v38, %v11389_v57  ;;  %v6558_v56 = vmul.f32 %v6550_v38, %v11416_v15  ;;  %v6562_v13 = vmul.f32 %v6550_v38, %v6491_v35  ;;  %v6617_v62 = vmul.f32 0.8, %v6593_v4 }
0x1614   :  { %v6567_v40 = vsub.f32 %v11342_v26, %v6555_v21  ;;  %v6571_v0 = vsub.f32 %v11359_v49, %v6559_v32  ;;  %v6589_v50 = vsel %vm6577_vm7, %v11333_v34, %v6565_v48  ;;  %v6568_v28 = vsub.f32 %v11348_v52, %v6556_v33 }
0x1615   :  { %v6575_v25 = vsub.f32 %v11375_v18, %v6563_v47  ;;  %v6566_v57 = vsub.f32 %v11339_v45, %v6554_v60  ;;  %v11470_v7 = vadd.f32 %v6617_v62, %v6605_v37  ;;  %v6613_v15 = vmul.f32 0.8, %v6589_v50 }
0x1616   :  { %v6596_v35 = vsel %vm6576_vm8, %v11365_v17, %v6572_v58  ;;  %v6591_v53 = vsel %vm6579_vm9, %v11342_v26, %v6567_v40  ;;  %v6597_v34 = vsel %vm6577_vm7, %v11367_v27, %v6573_v9  ;;  %v6570_v5 = vsub.f32 %v11356_v54, %v6558_v56 }
0x1617   :  { %6741 = vperm.xlu1 %8965, %v11470_v7   ;;  %v6595_v8 = vsel %vm6579_vm9, %v11359_v49, %v6571_v0  ;;  %v6574_v43 = vsub.f32 %v11373_v55, %v6562_v13  ;;  %v11488_v29 = vadd.f32 %v6613_v15, %v6601_v39  ;;  %v6590_v37 = vsel %vm6578_vm11, %v11339_v45, %v6566_v57 }
0x1618   :  { %v6588_v2 = vsel %vm6576_vm8, %v11330_v59, %v6564_v24  ;;  %v6620_v36 = vmul.f32 0.8, %v6596_v35  ;;  %v6599_v10 = vsel %vm6579_vm9, %v11375_v18, %v6575_v25  ;;  %v6592_v39 = vsel %vm6576_vm8, %v11348_v52, %v6568_v28 }
0x1619   :  { %6721 = vperm.xlu0 %8964, %v11488_v29   ;;  %v9192_v33 = vmov 2   ;;  %v6594_v12 = vsel %vm6578_vm11, %v11356_v54, %v6570_v5  ;;  %v11512_v14 = vsel %vm6578_vm11, %v11373_v55, %v6574_v43  ;;  %v6615_v30 = vmul.f32 0.8, %v6591_v53 }
0x161a   :  { %v11514_v48 = vadd.f32 %v6620_v36, %v6608_v16  ;;  %v6621_v42 = vmul.f32 0.8, %v6597_v34  ;;  %v6603_v17 = vmul.f32 0.2, %v11342_v26  ;;  %v6609_v11 = vmul.f32 0.2, %v11367_v27 }
0x161b   :  { %8966 = vset.pattern.permute.xlu1 %v9192_v33  ;;  %v6619_v58 = vmul.f32 0.8, %v6595_v8  ;;  %v6607_v38 = vmul.f32 0.2, %v11359_v49  ;;  %v6614_v32 = vmul.f32 0.8, %v6590_v37 }
0x161c   :  { %6789 = vperm.xlu1 %8966, %v11488_v29   ;;  %v6627_v9 = vadd.f32 %v6615_v30, %v6603_v17  ;;  %v6633_v44 = vadd.f32 %v6621_v42, %v6609_v11  ;;  %v6602_v26 = vmul.f32 0.2, %v11339_v45  ;;  %v6612_v27 = vmul.f32 0.8, %v6588_v2 }
0x161d   :  { %8972 = vset.pattern.permute.xlu0 %v9192_v33  ;;  %v6631_v21 = vadd.f32 %v6619_v58, %v6607_v38  ;;  %v6600_v4 = vmul.f32 0.2, %v11330_v59  ;;  %v6623_v60 = vmul.f32 0.8, %v6599_v10  ;;  %v6616_v13 = vmul.f32 0.8, %v6592_v39 }
0x161e   :  { %6829 = vperm.xlu0 %8972, %v11514_v48   ;;  %v6626_v47 = vadd.f32 %v6614_v32, %v6602_v26  ;;  %v6611_v49 = vmul.f32 0.2, %v11375_v18  ;;  %v6604_v62 = vmul.f32 0.2, %v11348_v52  ;;  %v9193_v40 = vmov 0  }
0x161f   :  { %v6624_v56 = vadd.f32 %v6612_v27, %v6600_v4  ;;  %v6618_v59 = vmul.f32 0.8, %v6594_v12  ;;  %v6606_v52 = vmul.f32 0.2, %v11356_v54  ;;  %v6622_v0 = vmul.f32 0.8, %v11512_v14 }
0x1620   :  { %6809 = vperm.xlu1 %8966, %v11470_v7   ;;  %v6635_v24 = vadd.f32 %v6623_v60, %v6611_v49  ;;  %v6628_v45 = vadd.f32 %v6616_v13, %v6604_v62  ;;  %v6610_v50 = vmul.f32 0.2, %v11373_v55 }
0x1621   :  { %v6630_v18 = vadd.f32 %v6618_v59, %v6606_v52 }
0x1622   :  { %8973 = vset.pattern.permute.xlu0 %v9191_v61  ;;  %v6634_v28 = vadd.f32 %v6622_v0, %v6610_v50 }
0x1623   :  { %6729 = vperm.xlu0 %8973, %v6627_v9  }
0x1624   :  { %8967 = vset.pattern.permute.xlu1 %v9191_v61 }
0x1625   :  { %6765 = vperm.xlu1 %8967, %v6633_v44  }
0x1627   :  { %8975 = vset.pattern.permute.xlu0 %v9192_v33 }
0x1628   :  { %6817 = vperm.xlu0 %8975, %v6631_v21  }
0x1629   :  { %8968 = vset.pattern.permute.xlu1 %v9192_v33 }
0x162a   :  { %6833 = vperm.xlu1 %8968, %v6633_v44  }
0x162c   :  { %6793 = vperm.xlu0 %8975, %v6626_v47  }
0x162e   :  { %8969 = vset.pattern.permute.xlu1 %v9191_v61 }
0x162f   :  { %6717 = vperm.xlu1 %8969, %v6624_v56  }
0x1630   :  { %8977 = vset.pattern.permute.xlu0 %v9191_v61 }
0x1631   :  { %6773 = vperm.xlu0 %8977, %v6635_v24  }
0x1633   :  { %6737 = vperm.xlu1 %8969, %v6628_v45  }
0x1635   :  { %8981 = vset.pattern.permute.xlu0 %v9193_v40 }
0x1636   :  { %6638 = vperm.xlu0 %8981, %v6624_v56  }
0x1637   :  { %8970 = vset.pattern.permute.xlu1 %v9192_v33 }
0x1638   :  { %6785 = vperm.xlu1 %8970, %v6624_v56  }
0x163a   :  { %6667 = vperm.xlu0 %8981, %v11470_v7  }
0x163c   :  { %6805 = vperm.xlu1 %8970, %v6628_v45  }
0x163e   :  { %6695 = vperm.xlu0 %8981, %v6633_v44  }
0x1640   :  { %8971 = vset.pattern.permute.xlu1 %v9191_v61 }
0x1641   :  { %6761 = vperm.xlu1 %8971, %v11514_v48  }
0x1642   :  { %6653 = vperm.xlu0 %8981, %v6627_v9  }
0x1645   :  { %6749 = vperm.xlu1 %8971, %v6631_v21  }
0x1646   :  { %6677 = vperm.xlu0 %8981, %v6631_v21  }
0x1649   :  { %8974 = vset.pattern.permute.xlu1 %v9192_v33 }
0x164a   :  { %6797 = vperm.xlu1 %8974, %v6627_v9   ;;  %6705 = vperm.xlu0 %8981, %v6635_v24  }
0x164e   :  { %8976 = vset.pattern.permute.xlu1 %v9191_v61  ;;  %9003 = vset.pattern.permute.xlu0 %v9192_v33 }
0x164f   :  { %6725 = vperm.xlu1 %8976, %v6626_v47  }
0x1653   :  { %6745 = vperm.xlu1 %8976, %v6630_v18  }
0x1657   :  { %8978 = vset.pattern.permute.xlu1 %v9192_v33 }
0x1658   :  { %6813 = vperm.xlu1 %8978, %v6630_v18  }
0x165c   :  { %8979 = vset.pattern.permute.xlu1 %v9191_v61 }
0x165d   :  { %6769 = vperm.xlu1 %8979, %v6634_v28  }
0x1661   :  { %8980 = vset.pattern.permute.xlu1 %v9192_v33  ;;  %v9194_v33 = vmov 0.0|0.0  }
0x1662   :  { %6837 = vperm.xlu1 %8980, %v6634_v28   ;;  %8731 = vmatprep.subr.bf16.mxu1 %v9194_v33 }
0x1666   :  { %6841 = vperm.xlu1 %8980, %v6635_v24  }
0x166a   :  { %8982 = vset.pattern.permute.xlu1 %v9193_v40 }
0x166b   :  { %6643 = vperm.xlu1 %8982, %v11488_v29  }
0x166f   :  { %6662 = vperm.xlu1 %8982, %v6628_v45  }
0x1673   :  { %6690 = vperm.xlu1 %8982, %v11514_v48  }
0x1677   :  { %6648 = vperm.xlu1 %8982, %v6626_v47  }
0x167b   :  { %6672 = vperm.xlu1 %8982, %v6630_v18  }
0x167f   :  { %6700 = vperm.xlu1 %8982, %v6634_v28  }
0x1696   :  { %v6742_v54 = vpop.permute.xlu1 %6741 }
0x1697   :  { %v6753_v36 = vmul.f32 %v6742_v54, %v11291_v51 }
0x1698   :  { %v6722_v35 = vpop.permute.xlu0 %6721 }
0x1699   :  { %v6733_v10 = vmul.f32 %v6722_v35, %v11269_v20 }
0x169b   :  { %v6790_v25 = vpop.permute.xlu1 %6789  ;;  %v6757_v9 = vadd.f32 %v6753_v36, %v6733_v10 }
0x169c   :  { %v6801_v5 = vmul.f32 %v6790_v25, %v11269_v20 }
0x169d   :  { %v6830_v8 = vpop.permute.xlu0 %6829 }
0x169e   :  { %v6844_v16 = vmul.f32 %v6830_v8, %v11304_v19  ;;  %v9198_v8 = vmov 0.0  }
0x169f   :  { %v6810_v55 = vpop.permute.xlu1 %6809  ;;  %8400 = vmatprep.mubr.msk.f32.mxu1 %vm9197_vm12, %v9198_v8 }
0x16a0   :  { %v6821_v34 = vmul.f32 %v6810_v55, %v11291_v51 }
0x16a2   :  { %v6825_v12 = vadd.f32 %v6821_v34, %v6801_v5  ;;  %v6730_v47 = vpop.permute.xlu0 %6729 }
0x16a3   :  { %v6735_v45 = vmul.f32 %v6730_v47, %v11279_v23 }
0x16a4   :  { %v6766_v57 = vpop.permute.xlu1 %6765 }
0x16a5   :  { %v6777_v48 = vmul.f32 %v6766_v57, %v11311_v63 }
0x16a7   :  { %v6781_v21 = vadd.f32 %v6777_v48, %v6757_v9  ;;  %v6818_v60 = vpop.permute.xlu0 %6817 }
0x16a8   :  { %v6823_v35 = vmul.f32 %v6818_v60, %v11301_v41 }
0x16a9   :  { %v6834_v7 = vpop.permute.xlu1 %6833 }
0x16aa   :  { %v6845_v29 = vmul.f32 %v6834_v7, %v11311_v63 }
0x16ab   :  { %v6794_v49 = vpop.permute.xlu0 %6793 }
0x16ac   :  { %v6849_v42 = vadd.f32 %v6845_v29, %v6825_v12 }
0x16ae   :  { %v6718_v61 = vpop.permute.xlu1 %6717 }
0x16af   :  { %v6732_v30 = vmul.f32 %v6718_v61, %v11266_v31 }
0x16b0   :  { %v6774_v59 = vpop.permute.xlu0 %6773 }
0x16b1   :  { %v6779_v50 = vmul.f32 %v6774_v59, %v11321_v6 }
0x16b2   :  { %v6738_v15 = vpop.permute.xlu1 %6737 }
0x16b3   :  { %v6752_v39 = vmul.f32 %v6738_v15, %v11284_v1 }
0x16b5   :  { %v6756_v44 = vadd.f32 %v6752_v39, %v6732_v30  ;;  %v6639_v39 = vpop.permute.xlu0 %6638 }
0x16b7   :  { %v6786_v53 = vpop.permute.xlu1 %6785 }
0x16b8   :  { %v6800_v37 = vmul.f32 %v6786_v53, %v11266_v31  ;;  %v6802_v53 = vmul.f32 %v6794_v49, %v11276_v22 }
0x16b9   :  { %v6668_v12 = vpop.permute.xlu0 %6667 }
0x16bb   :  { %v6806_v43 = vpop.permute.xlu1 %6805 }
0x16bc   :  { %v6820_v2 = vmul.f32 %v6806_v43, %v11284_v1 }
0x16bd   :  { %v6696_v48 = vpop.permute.xlu0 %6695 }
0x16be   :  { %v6824_v14 = vadd.f32 %v6820_v2, %v6800_v37 }
0x16c0   :  { %v6848_v17 = vadd.f32 %v6844_v16, %v6824_v14  ;;  %v6762_v11 = vpop.permute.xlu1 %6761 }
0x16c1   :  { %v6776_v58 = vmul.f32 %v6762_v11, %v11304_v19 }
0x16c2   :  { %v8988_v38 = vpack.i.bf16 %v6849_v42, %v6848_v17  ;;  %v6654_v42 = vpop.permute.xlu0 %6653 }
0x16c3   :  { %v6780_v32 = vadd.f32 %v6776_v58, %v6756_v44  ;;  %v6681_v58 = vmul.f32 %v6668_v12, %v11291_v51 }
0x16c4   :  { %v6750_v26 = vpop.permute.xlu1 %6749  ;;  %8989 = vrot.lane.b32.xlu0 %v8988_v38, %s9195_s8 }
0x16c5   :  { %v8983_v27 = vpack.i.bf16 %v6781_v21, %v6780_v32  ;;  %v6755_v62 = vmul.f32 %v6750_v26, %v11301_v41  ;;  %v6656_v26 = vmul.f32 %v6639_v39, %v11266_v31 }
0x16c6   :  { %v6678_v11 = vpop.permute.xlu0 %6677 }
0x16c7   :  { %8984 = vrot.lane.b32.xlu1 %v8983_v27, %s9196_s16  ;;  %v6759_v52 = vadd.f32 %v6755_v62, %v6735_v45 }
0x16c9   :  { %v6798_v4 = vpop.permute.xlu1 %6797  ;;  %v6783_v25 = vadd.f32 %v6779_v50, %v6759_v52 }
0x16ca   :  { %v6803_v61 = vmul.f32 %v6798_v4, %v11279_v23  ;;  %v6706_v38 = vpop.permute.xlu0 %6705  ;;  %v6709_v4 = vmul.f32 %v6696_v48, %v11311_v63  ;;  %v6683_v63 = vmul.f32 %v6678_v11, %v11301_v41 }
0x16cb   :  { %v6711_v50 = vmul.f32 %v6706_v38, %v11321_v6 }
0x16cc   :  { %v6827_v43 = vadd.f32 %v6823_v35, %v6803_v61 }
0x16ce   :  { %v6726_v56 = vpop.permute.xlu1 %6725 }
0x16cf   :  { %v6734_v18 = vmul.f32 %v6726_v56, %v11276_v22 }
0x16d2   :  { %v6746_v13 = vpop.permute.xlu1 %6745 }
0x16d3   :  { %v6754_v40 = vmul.f32 %v6746_v13, %v11294_v46 }
0x16d5   :  { %v6758_v28 = vadd.f32 %v6754_v40, %v6734_v18 }
0x16d7   :  { %v6814_v24 = vpop.permute.xlu1 %6813 }
0x16d8   :  { %v6822_v15 = vmul.f32 %v6814_v24, %v11294_v46 }
0x16da   :  { %v6826_v29 = vadd.f32 %v6822_v15, %v6802_v53 }
0x16dc   :  { %v6770_v0 = vpop.permute.xlu1 %6769 }
0x16dd   :  { %v6778_v54 = vmul.f32 %v6770_v0, %v11314_v3  ;;  %v6659_v0 = vmul.f32 %v6654_v42, %v11279_v23 }
0x16df   :  { %v6782_v55 = vadd.f32 %v6778_v54, %v6758_v28 }
0x16e1   :  { %v8993_v57 = vpack.i.bf16 %v6783_v25, %v6782_v55  ;;  %v6838_v7 = vpop.permute.xlu1 %6837  ;;  %v6687_v25 = vadd.f32 %v6683_v63, %v6659_v0 }
0x16e2   :  { %v6846_v34 = vmul.f32 %v6838_v7, %v11314_v3 }
0x16e3   :  { %8994 = vrot.lane.b32.xlu1 %v8993_v57, %s9196_s16  ;;  %v6715_v61 = vadd.f32 %v6711_v50, %v6687_v25 }
0x16e4   :  { %v6850_v2 = vadd.f32 %v6846_v34, %v6826_v29 }
0x16e5   :  { %v6842_v5 = vpop.permute.xlu1 %6841 }
0x16e6   :  { %v6847_v37 = vmul.f32 %v6842_v5, %v11321_v6 }
0x16e8   :  { %v6851_v36 = vadd.f32 %v6847_v37, %v6827_v43 }
0x16ea   :  { %v8998_v10 = vpack.i.bf16 %v6851_v36, %v6850_v2  ;;  %v6644_v16 = vpop.permute.xlu1 %6643 }
0x16eb   :  { %v6657_v44 = vmul.f32 %v6644_v16, %v11269_v20 }
0x16ec   :  { %8999 = vrot.lane.b32.xlu0 %v8998_v10, %s9195_s8 }
0x16ed   :  { %v6685_v27 = vadd.f32 %v6681_v58, %v6657_v44 }
0x16ee   :  { %v6663_v14 = vpop.permute.xlu1 %6662 }
0x16ef   :  { %v6680_v21 = vmul.f32 %v6663_v14, %v11284_v1  ;;  %v6713_v49 = vadd.f32 %v6709_v4, %v6685_v27 }
0x16f1   :  { %v6684_v60 = vadd.f32 %v6680_v21, %v6656_v26 }
0x16f2   :  { %v6691_v30 = vpop.permute.xlu1 %6690 }
0x16f3   :  { %v6708_v47 = vmul.f32 %v6691_v30, %v11304_v19 }
0x16f5   :  { %v6712_v62 = vadd.f32 %v6708_v47, %v6684_v60 }
0x16f6   :  { %v6649_v17 = vpop.permute.xlu1 %6648 }
0x16f7   :  { %v6658_v28 = vmul.f32 %v6649_v17, %v11276_v22 }
0x16fa   :  { %v6673_v9 = vpop.permute.xlu1 %6672 }
0x16fb   :  { %v6682_v52 = vmul.f32 %v6673_v9, %v11294_v46 }
0x16fd   :  { %v6686_v55 = vadd.f32 %v6682_v52, %v6658_v28 }
0x16fe   :  { %v6701_v32 = vpop.permute.xlu1 %6700 }
0x16ff   :  { %v6710_v54 = vmul.f32 %v6701_v32, %v11314_v3  ;;  %v6893_v3 = vld [vmem:[%s11611_s2] sm:$0x3] }
0x1701   :  { %v6714_v15 = vadd.f32 %v6710_v54, %v6686_v55 }
0x1736   :  { %v8990_v56 = vpop.permute.xlu0 %8989 }
0x1737   :  { %v8992_v51 = vunpack.i.h.bf16 %v8990_v56  ;;  %v8991_v45 = vunpack.i.l.bf16 %v8990_v56 }
0x1739   :  { %v8985_v13 = vpop.permute.xlu1 %8984 }
0x173a   :  { %v8987_v20 = vunpack.i.h.bf16 %v8985_v13  ;;  %v8986_v24 = vunpack.i.l.bf16 %v8985_v13 }
0x173c   :  { %v6885_v1 = vsel %vm424_vm10, %v6713_v49, %v8987_v20  ;;  %v6884_v40 = vsel %vm424_vm10, %v6712_v62, %v8986_v24 }
0x173d   :  { %v6889_v31 = vsel %vm6888_vm13, %v6884_v40, %v8991_v45  ;;  %v6890_v19 = vsel %vm6888_vm13, %v6885_v1, %v8992_v51 }
0x173e   :  { %v8732_v59 = vpack.c.bf16 %v6890_v19, %v6889_v31 }
0x1740   :  { %8733 = vmatpush3.bf16.msra.mxu1 %v8732_v59 }
0x1741   :  { %8734 = vmatprep.subr.bf16.mxu1 %v9194_v33 }
0x1755   :  { %v8995_v18 = vpop.permute.xlu1 %8994 }
0x1756   :  { %v8997_v57 = vunpack.i.h.bf16 %v8995_v18  ;;  %v8996_v7 = vunpack.i.l.bf16 %v8995_v18 }
0x1758   :  { %v6887_v46 = vsel %vm424_vm10, %v6715_v61, %v8997_v57  ;;  %v6886_v53 = vsel %vm424_vm10, %v6714_v15, %v8996_v7 }
0x175e   :  { %v9000_v33 = vpop.permute.xlu0 %8999 }
0x175f   :  { %v9002_v35 = vunpack.i.h.bf16 %v9000_v33  ;;  %v9001_v41 = vunpack.i.l.bf16 %v9000_v33 }
0x1761   :  { %v6891_v23 = vsel %vm6888_vm13, %v6886_v53, %v9001_v41  ;;  %v6892_v6 = vsel %vm6888_vm13, %v6887_v46, %v9002_v35 }
0x1762   :  { %v8735_v22 = vpack.c.bf16 %v6892_v6, %v6891_v23 }
0x1764   :  { %8736 = vmatpush3.bf16.msra.mxu1 %v8735_v22 }
0x1767   :  { %8401 = vmatmul.mubr.msk.f32.vlgmr.msra.gmra.mrb[96].mxu1 %vm424_vm10, %v6893_v3 }
0x183a   :  { %v6963_v34 = vpop.f32.mrb[96].mxu1 }
0x183b   :  { %6968 = vst.msk [vmem:[%s11612_s10] sm:$0x3] %vm6967_vm14, %v6963_v34  ;;  %v8402_v5 = vpop.f32.mrb[97].mxu1 }

</bundles_post_ra>
